<compile_context>
chip_gen: v5e
topology: v5e:2x2
jax: 0.10.0
libtpu: 0.0.40
codegen_flags: <defaults>
</compile_context>

<pallas_src>
import functools

import jax
import jax.numpy as jnp
from jax import lax
from jax.experimental import pallas as pl
from jax.experimental.pallas import tpu as pltpu

_EPS = 1e-12            # F.normalize default eps (denominator max(norm, eps))
_EPS2 = _EPS * _EPS     # compared against squared norms (rsqrt formulation)
_GEM_TINY = 1e-30       # keeps pow(0, 1/3) well-defined for all-zero channels


def cgd_head_kernel(x_ref, w_ref, out_ref, acc_ref, *, p_list, k):
    """One (batch-tile, channel-chunk) grid step of the CGD head.

    x_ref:   (TB, HW, TC)  input dtype  feature tile (channels on lanes)
    w_ref:   (n,  C,  k)   bfloat16     stacked projection weights (resident)
    out_ref: (TB, n*k)     float32      normalized concatenated descriptors
    acc_ref: (TB, n*k)     float32      projection accumulator across C chunks
    """
    c_idx = pl.program_id(1)

    @pl.when(c_idx == 0)
    def _init():
        acc_ref[...] = jnp.zeros_like(acc_ref)

    TB, HW, TC = x_ref.shape
    n_desc = len(p_list)
    inv_hw = jnp.float32(1.0 / HW)
    c0 = pl.multiple_of(c_idx * TC, TC)

    # One pooling at a time keeps the live vreg accumulator to a single
    # (TB, TC) f32 tile; each pooled chunk is folded straight into the
    # projection (bf16 x bf16 -> f32 MXU) so nothing larger stays live.
    for i, p in enumerate(p_list):              # n is tiny (<= 4): static unroll
        if p == 1:                              # SPoC: average pooling
            pooled = jnp.sum(x_ref[...].astype(jnp.float32), axis=1) * inv_hw
        elif p == float("inf"):                 # MAC: max pooling
            pooled = jnp.max(x_ref[...], axis=1).astype(jnp.float32)
        else:                                   # GeM, p == 3 (post-ReLU, x >= 0)
            xc = x_ref[...].astype(jnp.float32)
            m = jnp.sum(xc * xc * xc, axis=1) * inv_hw
            pooled = jnp.maximum(m, _GEM_TINY) ** (1.0 / 3.0)
        wc = w_ref[i, pl.ds(c0, TC), :]                          # (TC, k) bf16
        acc_ref[:, i * k:(i + 1) * k] += jnp.dot(
            pooled.astype(jnp.bfloat16), wc,
            preferred_element_type=jnp.float32)

    @pl.when(c_idx == pl.num_programs(1) - 1)
    def _finalize():
        # Per-descriptor L2 norm (Linear -> L2Norm), then F.normalize over the
        # concatenation; all via EUP rsqrt, one k-slice live at a time.
        tot = jnp.zeros((TB, 1), jnp.float32)
        inv_norms = []
        for i in range(n_desc):
            di = acc_ref[:, i * k:(i + 1) * k]
            sq = jnp.sum(di * di, axis=-1, keepdims=True)
            inv = lax.rsqrt(jnp.maximum(sq, _EPS2))
            inv_norms.append(inv)
            tot = tot + sq * inv * inv          # == ||normalized d_i||^2
        inv_tot = lax.rsqrt(jnp.maximum(tot, _EPS2))
        for i in range(n_desc):
            di = acc_ref[:, i * k:(i + 1) * k]
            out_ref[:, i * k:(i + 1) * k] = (
                di * (inv_norms[i] * inv_tot)).astype(out_ref.dtype)


def cgd_head(shared, weights, p_list):
    """CGD head: global descriptors (SPoC / MAC / GeM) + Linear + L2 norms.

    shared:  (B, H, W, C) or (B, HW, C) channels-last backbone feature map.
             bf16 recommended (halves the x HBM stream); any float dtype is
             streamed as-is (no extra wrapper cast pass is added).
    weights: list of n PyTorch-layout (k, C) Linear weights (bias=False).
    returns: (B, n*k) float32, L2-normalized concatenated descriptors.
    """
    if shared.ndim == 4:
        B, H, W, C = shared.shape
        shared = shared.reshape(B, H * W, C)      # contiguous reshape: free
    B, HW, C = shared.shape
    n = len(p_list)
    k = weights[0].shape[0]
    out_k = n * k
    for p in p_list:
        assert p in (1, 3, float("inf")), "only SPoC / MAC / GeM(p=3) supported"
    assert all(wt.shape == (k, C) for wt in weights)

    # Stacked bf16 weights (n, C, k): resident in VMEM, f32 MXU accumulation.
    w = jnp.stack([wt.T for wt in weights], axis=0).astype(jnp.bfloat16)
    w_bytes = n * C * k * 2
    xbytes = jnp.dtype(shared.dtype).itemsize

    # Generation-aware VMEM budget: ~100 MiB usable on 128-MiB parts
    # (v5e / v6e), ~52 MiB on v7x (64 MiB per TensorCore, leave headroom).
    try:
        phys = pltpu.get_tpu_info().vmem_capacity_bytes
    except Exception:
        phys = 64 * 1024 * 1024
    budget = 100 * 1024 * 1024 if phys >= 100 * 1024 * 1024 else 52 * 1024 * 1024

    def _pick_tc(tb):
        # Bound the in-body (tb, tc) f32 pooling accumulator to ~32 vregs.
        if C % 128 == 0:
            for cand in (1024, 512, 256, 128):
                if C % cand == 0 and tb * cand * 4 <= 128 * 1024:
                    return cand
            return 128
        return C

    def _need(tb, tc):
        return (2 * tb * HW * tc * xbytes        # double-buffered x tile
                + w_bytes                        # resident weights (1 copy)
                + 2 * tb * out_k * 4             # double-buffered output block
                + tb * out_k * 4                 # f32 accumulator scratch
                + (4 << 20))                     # slack for compiler internals

    # Batch tile: as large as VMEM allows (MXU row occupancy + HBM roofline),
    # but a multiple of 8 dividing B (or the full batch) so blocks stay
    # (8, 128)-aligned without masked sub-tile stores.
    TB = None
    for t in range(128, 7, -8):
        if t <= B and B % t == 0 and _need(t, _pick_tc(t)) <= budget:
            TB = t
            break
    if TB is None:
        TB = B          # full-batch block; block == full dim keeps alignment
    # Keep >= 2 grid steps over batch when cheap (v7x has two TensorCores).
    if TB == B and B >= 16 and (B // 2) % 8 == 0:
        TB = B // 2
    TC = _pick_tc(TB)
    vmem_limit = int(min(max(_need(TB, TC), 16 * 1024 * 1024), budget))

    kernel = functools.partial(cgd_head_kernel, p_list=tuple(p_list), k=k)

    def _call(w_spec):
        grid_spec = pltpu.PrefetchScalarGridSpec(
            num_scalar_prefetch=0,
            grid=(B // TB, C // TC),
            in_specs=[
                pl.BlockSpec((TB, HW, TC), lambda b, c: (b, 0, c)),  # x tile
                w_spec,                                              # weights
            ],
            out_specs=pl.BlockSpec((TB, out_k), lambda b, c: (b, 0)),
            scratch_shapes=[pltpu.VMEM((TB, out_k), jnp.float32)],
        )
        return pl.pallas_call(
            kernel,
            out_shape=jax.ShapeDtypeStruct((B, out_k), jnp.float32),
            grid_spec=grid_spec,
            compiler_params=pltpu.CompilerParams(
                dimension_semantics=("parallel", "arbitrary"),
                vmem_limit_bytes=vmem_limit,
            ),
        )(shared, w)

    try:
        # Whole weight array resident in VMEM as a single, un-pipelined copy.
        return _call(pl.BlockSpec(memory_space=pltpu.MemorySpace.VMEM))
    except Exception:
        # Fallback: full-array block with a constant index map (stays resident
        # because its block index never changes across grid steps).
        return _call(pl.BlockSpec((n, C, k), lambda b, c: (0, 0, 0)))


def cgd_head_ref(shared_bhwc, weights, p_list):
    """Pure-JAX f32 reference mirroring the PyTorch forward (channels-last)."""
    x = shared_bhwc.astype(jnp.float32)          # (B, HW, C)
    descs = []
    for p, wt in zip(p_list, weights):
        if p == 1:
            pooled = jnp.mean(x, axis=1)
        elif p == float("inf"):
            pooled = jnp.max(x, axis=1)
        else:
            m = jnp.mean(x ** p, axis=1)
            # x >= 0 (post-ReLU); tiny guard mirrors the kernel at m == 0.
            pooled = jnp.maximum(m, _GEM_TINY) ** (1.0 / p)
        d = pooled @ wt.T
        d = d / jnp.maximum(jnp.linalg.norm(d, axis=-1, keepdims=True), _EPS)
        descs.append(d)
    cat = jnp.concatenate(descs, axis=-1)
    return cat / jnp.maximum(jnp.linalg.norm(cat, axis=-1, keepdims=True), _EPS)


if __name__ == "__main__":
    # Small, deterministic configuration (C = 2048 is fixed by Linear(2048, k)).
    gd_config = "SMG"                 # n = 3 descriptors: avg, max, GeM(p=3)
    B, C, H, W = 2, 2048, 4, 4
    feature_dim = 384
    n = len(gd_config)
    k = feature_dim // n
    assert feature_dim % n == 0

    p_list = []
    for c in gd_config:
        if c == "S":
            p_list.append(1)
        elif c == "M":
            p_list.append(float("inf"))
        else:
            p_list.append(3)

    key = jax.random.PRNGKey(0)
    kx, *kws = jax.random.split(key, 1 + n)
    # Backbone feature map, channels-last and bf16 (post-ReLU, non-negative).
    # TODO(synk): in production the ResNet backbone should emit NHWC/bf16
    #             directly; here we construct it in that layout to avoid any
    #             extra HBM transpose/cast pass.
    shared_bhwc = jax.nn.relu(
        jax.random.normal(kx, (B, H * W, C), dtype=jnp.float32)
    ).astype(jnp.bfloat16)
    # Linear(2048, k, bias=False) weights, PyTorch layout (k, 2048).
    weights = [
        jax.random.normal(kw, (k, C), dtype=jnp.float32) * (1.0 / jnp.sqrt(C))
        for kw in kws
    ]

    out = cgd_head(shared_bhwc, weights, p_list)
    out = jax.block_until_ready(out)

    ref = cgd_head_ref(shared_bhwc, weights, p_list)
    assert out.shape == (B, feature_dim)
    # Kernel uses bf16 weights / pooled activations on the MXU (f32 accumulate),
    # so compare against the f32 reference with a bf16-appropriate tolerance.
    assert jnp.allclose(out, ref, atol=5e-3, rtol=5e-3), "mismatch vs reference"
    print("KERNEL_OK")
</pallas_src>

<mosaic_0001>
module attributes {stable_mosaic.version = 11 : i64} {
  func.func @cgd_head_kernel(%arg0: i32, %arg1: i32, %arg2: memref<2x16x1024xbf16, #tpu.memory_space<vmem>>, %arg3: memref<3x2048x128xbf16, #tpu.memory_space<vmem>>, %arg4: memref<2x384xf32, #tpu.memory_space<vmem>>, %arg5: memref<2x384xf32, #tpu.memory_space<vmem>>) attributes {dimension_semantics = [#tpu.dimension_semantics<parallel>, #tpu.dimension_semantics<arbitrary>], iteration_bounds = array<i64: 1, 2>, scalar_prefetch = 0 : i64, scratch_operands = 1 : i64, tpu.core_type = #tpu.core_type<tc>, window_params = [{transform_indices = @transform_0, window_bounds = array<i64: 2, 16, 1024>}, {pipeline_mode = #tpu.pipeline_mode<synchronous>, transform_indices = @transform_1, window_bounds = array<i64: 3, 2048, 128>}, {transform_indices = @transform_2, window_bounds = array<i64: 2, 384>}]} {
    %c0_i32 = arith.constant 0 : i32
    %0 = arith.cmpi eq, %arg1, %c0_i32 : i32
    %1 = arith.extui %0 : i1 to i32
    %c0_i32_0 = arith.constant 0 : i32
    %2 = arith.cmpi ne, %1, %c0_i32_0 : i32
    scf.if %2 {
      %cst_33 = arith.constant 0.000000e+00 : f32
      %51 = vector.broadcast %cst_33 : f32 to vector<2x384xf32>
      %c0_34 = arith.constant 0 : index
      %c0_35 = arith.constant 0 : index
      %52 = vector.load %arg5[%c0_34, %c0_35] : memref<2x384xf32, #tpu.memory_space<vmem>>, vector<2x384xf32>
      tpu.vector_store %arg5[%c0_34, %c0_35], %51 {strides = array<i32>} : memref<2x384xf32, #tpu.memory_space<vmem>>, vector<2x384xf32>,
    } else {
    }
    %c1024_i32 = arith.constant 1024 : i32
    %3 = arith.muli %arg1, %c1024_i32 : i32
    %4 = tpu.assume_multiple %3, 1024 : i32
    %c0 = arith.constant 0 : index
    %c0_1 = arith.constant 0 : index
    %c0_2 = arith.constant 0 : index
    %5 = vector.load %arg2[%c0, %c0_1, %c0_2] : memref<2x16x1024xbf16, #tpu.memory_space<vmem>>, vector<2x16x1024xbf16>
    %6 = arith.extf %5 : vector<2x16x1024xbf16> to vector<2x16x1024xf32>
    %cst = arith.constant dense<0.000000e+00> : vector<2x1024xf32>
    %7 = vector.multi_reduction <add>, %6, %cst [1] : vector<2x16x1024xf32> to vector<2x1024xf32>
    %cst_3 = arith.constant 6.250000e-02 : f32
    %8 = vector.broadcast %cst_3 : f32 to vector<2x1024xf32>
    %9 = arith.mulf %7, %8 : vector<2x1024xf32>
    %c0_4 = arith.constant 0 : index
    %10 = arith.index_cast %4 : i32 to index
    %c0_5 = arith.constant 0 : index
    %11 = vector.load %arg3[%c0_4, %10, %c0_5] : memref<3x2048x128xbf16, #tpu.memory_space<vmem>>, vector<1x1024x128xbf16>
    %12 = vector.shape_cast %11 : vector<1x1024x128xbf16> to vector<1024x128xbf16>
    %c0_6 = arith.constant 0 : index
    %c0_7 = arith.constant 0 : index
    %13 = vector.load %arg5[%c0_6, %c0_7] : memref<2x384xf32, #tpu.memory_space<vmem>>, vector<2x128xf32>
    %14 = arith.truncf %9 : vector<2x1024xf32> to vector<2x1024xbf16>
    %cst_8 = arith.constant dense<0.000000e+00> : vector<2x128xf32>
    %15 = tpu.matmul %14, %12, %cst_8 {dimension_numbers = #tpu.dot_dimension_numbers<[1], [0], [0], [1], [0, 0, 1, 1], [], []>} : vector<2x1024xbf16>, vector<1024x128xbf16>, vector<2x128xf32> -> vector<2x128xf32>
    %16 = arith.addf %13, %15 : vector<2x128xf32>
    %c0_9 = arith.constant 0 : index
    %c0_10 = arith.constant 0 : index
    %17 = vector.load %arg5[%c0_9, %c0_10] : memref<2x384xf32, #tpu.memory_space<vmem>>, vector<2x128xf32>
    tpu.vector_store %arg5[%c0_9, %c0_10], %16 {strides = array<i32>} : memref<2x384xf32, #tpu.memory_space<vmem>>, vector<2x128xf32>,
    %c0_11 = arith.constant 0 : index
    %c0_12 = arith.constant 0 : index
    %c0_13 = arith.constant 0 : index
    %18 = vector.load %arg2[%c0_11, %c0_12, %c0_13] : memref<2x16x1024xbf16, #tpu.memory_space<vmem>>, vector<2x16x1024xbf16>
    %cst_14 = arith.constant dense<0xFF80> : vector<2x1024xbf16>
    %19 = vector.multi_reduction <maximumf>, %18, %cst_14 [1] : vector<2x16x1024xbf16> to vector<2x1024xbf16>
    %20 = arith.extf %19 : vector<2x1024xbf16> to vector<2x1024xf32>
    %c1 = arith.constant 1 : index
    %21 = arith.index_cast %4 : i32 to index
    %c0_15 = arith.constant 0 : index
    %22 = vector.load %arg3[%c1, %21, %c0_15] : memref<3x2048x128xbf16, #tpu.memory_space<vmem>>, vector<1x1024x128xbf16>
    %23 = vector.shape_cast %22 : vector<1x1024x128xbf16> to vector<1024x128xbf16>
    %c0_16 = arith.constant 0 : index
    %c128 = arith.constant 128 : index
    %24 = vector.load %arg5[%c0_16, %c128] : memref<2x384xf32, #tpu.memory_space<vmem>>, vector<2x128xf32>
    %25 = arith.truncf %20 : vector<2x1024xf32> to vector<2x1024xbf16>
    %cst_17 = arith.constant dense<0.000000e+00> : vector<2x128xf32>
    %26 = tpu.matmul %25, %23, %cst_17 {dimension_numbers = #tpu.dot_dimension_numbers<[1], [0], [0], [1], [0, 0, 1, 1], [], []>} : vector<2x1024xbf16>, vector<1024x128xbf16>, vector<2x128xf32> -> vector<2x128xf32>
    %27 = arith.addf %24, %26 : vector<2x128xf32>
    %c0_18 = arith.constant 0 : index
    %c128_19 = arith.constant 128 : index
    %28 = vector.load %arg5[%c0_18, %c128_19] : memref<2x384xf32, #tpu.memory_space<vmem>>, vector<2x128xf32>
    tpu.vector_store %arg5[%c0_18, %c128_19], %27 {strides = array<i32>} : memref<2x384xf32, #tpu.memory_space<vmem>>, vector<2x128xf32>,
    %c0_20 = arith.constant 0 : index
    %c0_21 = arith.constant 0 : index
    %c0_22 = arith.constant 0 : index
    %29 = vector.load %arg2[%c0_20, %c0_21, %c0_22] : memref<2x16x1024xbf16, #tpu.memory_space<vmem>>, vector<2x16x1024xbf16>
    %30 = arith.extf %29 : vector<2x16x1024xbf16> to vector<2x16x1024xf32>
    %31 = arith.mulf %30, %30 : vector<2x16x1024xf32>
    %32 = arith.mulf %31, %30 : vector<2x16x1024xf32>
    %cst_23 = arith.constant dense<0.000000e+00> : vector<2x1024xf32>
    %33 = vector.multi_reduction <add>, %32, %cst_23 [1] : vector<2x16x1024xf32> to vector<2x1024xf32>
    %cst_24 = arith.constant 6.250000e-02 : f32
    %34 = vector.broadcast %cst_24 : f32 to vector<2x1024xf32>
    %35 = arith.mulf %33, %34 : vector<2x1024xf32>
    %cst_25 = arith.constant 1.000000e-30 : f32
    %36 = vector.broadcast %cst_25 : f32 to vector<2x1024xf32>
    %37 = arith.maximumf %35, %36 : vector<2x1024xf32>
    %cst_26 = arith.constant 0.333333343 : f32
    %38 = vector.broadcast %cst_26 : f32 to vector<2x1024xf32>
    %39 = math.powf %37, %38 : vector<2x1024xf32>
    %c2 = arith.constant 2 : index
    %40 = arith.index_cast %4 : i32 to index
    %c0_27 = arith.constant 0 : index
    %41 = vector.load %arg3[%c2, %40, %c0_27] : memref<3x2048x128xbf16, #tpu.memory_space<vmem>>, vector<1x1024x128xbf16>
    %42 = vector.shape_cast %41 : vector<1x1024x128xbf16> to vector<1024x128xbf16>
    %c0_28 = arith.constant 0 : index
    %c256 = arith.constant 256 : index
    %43 = vector.load %arg5[%c0_28, %c256] : memref<2x384xf32, #tpu.memory_space<vmem>>, vector<2x128xf32>
    %44 = arith.truncf %39 : vector<2x1024xf32> to vector<2x1024xbf16>
    %cst_29 = arith.constant dense<0.000000e+00> : vector<2x128xf32>
    %45 = tpu.matmul %44, %42, %cst_29 {dimension_numbers = #tpu.dot_dimension_numbers<[1], [0], [0], [1], [0, 0, 1, 1], [], []>} : vector<2x1024xbf16>, vector<1024x128xbf16>, vector<2x128xf32> -> vector<2x128xf32>
    %46 = arith.addf %43, %45 : vector<2x128xf32>
    %c0_30 = arith.constant 0 : index
    %c256_31 = arith.constant 256 : index
    %47 = vector.load %arg5[%c0_30, %c256_31] : memref<2x384xf32, #tpu.memory_space<vmem>>, vector<2x128xf32>
    tpu.vector_store %arg5[%c0_30, %c256_31], %46 {strides = array<i32>} : memref<2x384xf32, #tpu.memory_space<vmem>>, vector<2x128xf32>,
    %c1_i32 = arith.constant 1 : i32
    %48 = arith.cmpi eq, %arg1, %c1_i32 : i32
    %49 = arith.extui %48 : i1 to i32
    %c0_i32_32 = arith.constant 0 : i32
    %50 = arith.cmpi ne, %49, %c0_i32_32 : i32
    scf.if %50 {
      %cst_33 = arith.constant 0.000000e+00 : f32
      %51 = vector.broadcast %cst_33 : f32 to vector<2x1xf32>
      %c0_34 = arith.constant 0 : index
      %c0_35 = arith.constant 0 : index
      %52 = vector.load %arg5[%c0_34, %c0_35] : memref<2x384xf32, #tpu.memory_space<vmem>>, vector<2x128xf32>
      %53 = arith.mulf %52, %52 : vector<2x128xf32>
      %cst_36 = arith.constant dense<0.000000e+00> : vector<2xf32>
      %54 = vector.multi_reduction <add>, %53, %cst_36 [1] : vector<2x128xf32> to vector<2xf32>
      %55 = vector.shape_cast %54 : vector<2xf32> to vector<2x1xf32>
      %cst_37 = arith.constant 1.000000e-24 : f32
      %56 = vector.broadcast %cst_37 : f32 to vector<2x1xf32>
      %57 = arith.maximumf %55, %56 : vector<2x1xf32>
      %58 = math.rsqrt %57 : vector<2x1xf32>
      %59 = arith.mulf %55, %58 : vector<2x1xf32>
      %60 = arith.mulf %59, %58 : vector<2x1xf32>
      %61 = arith.addf %51, %60 : vector<2x1xf32>
      %c0_38 = arith.constant 0 : index
      %c128_39 = arith.constant 128 : index
      %62 = vector.load %arg5[%c0_38, %c128_39] : memref<2x384xf32, #tpu.memory_space<vmem>>, vector<2x128xf32>
      %63 = arith.mulf %62, %62 : vector<2x128xf32>
      %cst_40 = arith.constant dense<0.000000e+00> : vector<2xf32>
      %64 = vector.multi_reduction <add>, %63, %cst_40 [1] : vector<2x128xf32> to vector<2xf32>
      %65 = vector.shape_cast %64 : vector<2xf32> to vector<2x1xf32>
      %cst_41 = arith.constant 1.000000e-24 : f32
      %66 = vector.broadcast %cst_41 : f32 to vector<2x1xf32>
      %67 = arith.maximumf %65, %66 : vector<2x1xf32>
      %68 = math.rsqrt %67 : vector<2x1xf32>
      %69 = arith.mulf %65, %68 : vector<2x1xf32>
      %70 = arith.mulf %69, %68 : vector<2x1xf32>
      %71 = arith.addf %61, %70 : vector<2x1xf32>
      %c0_42 = arith.constant 0 : index
      %c256_43 = arith.constant 256 : index
      %72 = vector.load %arg5[%c0_42, %c256_43] : memref<2x384xf32, #tpu.memory_space<vmem>>, vector<2x128xf32>
      %73 = arith.mulf %72, %72 : vector<2x128xf32>
      %cst_44 = arith.constant dense<0.000000e+00> : vector<2xf32>
      %74 = vector.multi_reduction <add>, %73, %cst_44 [1] : vector<2x128xf32> to vector<2xf32>
      %75 = vector.shape_cast %74 : vector<2xf32> to vector<2x1xf32>
      %cst_45 = arith.constant 1.000000e-24 : f32
      %76 = vector.broadcast %cst_45 : f32 to vector<2x1xf32>
      %77 = arith.maximumf %75, %76 : vector<2x1xf32>
      %78 = math.rsqrt %77 : vector<2x1xf32>
      %79 = arith.mulf %75, %78 : vector<2x1xf32>
      %80 = arith.mulf %79, %78 : vector<2x1xf32>
      %81 = arith.addf %71, %80 : vector<2x1xf32>
      %cst_46 = arith.constant 1.000000e-24 : f32
      %82 = vector.broadcast %cst_46 : f32 to vector<2x1xf32>
      %83 = arith.maximumf %81, %82 : vector<2x1xf32>
      %84 = math.rsqrt %83 : vector<2x1xf32>
      %c0_47 = arith.constant 0 : index
      %c0_48 = arith.constant 0 : index
      %85 = vector.load %arg5[%c0_47, %c0_48] : memref<2x384xf32, #tpu.memory_space<vmem>>, vector<2x128xf32>
      %86 = arith.mulf %58, %84 : vector<2x1xf32>
      %87 = vector.broadcast %86 : vector<2x1xf32> to vector<2x128xf32>
      %88 = arith.mulf %85, %87 : vector<2x128xf32>
      %c0_49 = arith.constant 0 : index
      %c0_50 = arith.constant 0 : index
      %89 = vector.load %arg4[%c0_49, %c0_50] : memref<2x384xf32, #tpu.memory_space<vmem>>, vector<2x128xf32>
      tpu.vector_store %arg4[%c0_49, %c0_50], %88 {strides = array<i32>} : memref<2x384xf32, #tpu.memory_space<vmem>>, vector<2x128xf32>,
      %c0_51 = arith.constant 0 : index
      %c128_52 = arith.constant 128 : index
      %90 = vector.load %arg5[%c0_51, %c128_52] : memref<2x384xf32, #tpu.memory_space<vmem>>, vector<2x128xf32>
      %91 = arith.mulf %68, %84 : vector<2x1xf32>
      %92 = vector.broadcast %91 : vector<2x1xf32> to vector<2x128xf32>
      %93 = arith.mulf %90, %92 : vector<2x128xf32>
      %c0_53 = arith.constant 0 : index
      %c128_54 = arith.constant 128 : index
      %94 = vector.load %arg4[%c0_53, %c128_54] : memref<2x384xf32, #tpu.memory_space<vmem>>, vector<2x128xf32>
      tpu.vector_store %arg4[%c0_53, %c128_54], %93 {strides = array<i32>} : memref<2x384xf32, #tpu.memory_space<vmem>>, vector<2x128xf32>,
      %c0_55 = arith.constant 0 : index
      %c256_56 = arith.constant 256 : index
      %95 = vector.load %arg5[%c0_55, %c256_56] : memref<2x384xf32, #tpu.memory_space<vmem>>, vector<2x128xf32>
      %96 = arith.mulf %78, %84 : vector<2x1xf32>
      %97 = vector.broadcast %96 : vector<2x1xf32> to vector<2x128xf32>
      %98 = arith.mulf %95, %97 : vector<2x128xf32>
      %c0_57 = arith.constant 0 : index
      %c256_58 = arith.constant 256 : index
      %99 = vector.load %arg4[%c0_57, %c256_58] : memref<2x384xf32, #tpu.memory_space<vmem>>, vector<2x128xf32>
      tpu.vector_store %arg4[%c0_57, %c256_58], %98 {strides = array<i32>} : memref<2x384xf32, #tpu.memory_space<vmem>>, vector<2x128xf32>,
    } else {
    }
    return
  }
  func.func @transform_0(%arg0: i32, %arg1: i32) -> (i32, i32, i32) {
    %c0_i32 = arith.constant 0 : i32
    %c0_i32_0 = arith.constant 0 : i32
    return %arg0, %c0_i32, %arg1 : i32, i32, i32
  }
  func.func @transform_1(%arg0: i32, %arg1: i32) -> (i32, i32, i32) {
    %c0_i32 = arith.constant 0 : i32
    %c0_i32_0 = arith.constant 0 : i32
    %c0_i32_1 = arith.constant 0 : i32
    %c0_i32_2 = arith.constant 0 : i32
    return %c0_i32, %c0_i32_0, %c0_i32_1 : i32, i32, i32
  }
  func.func @transform_2(%arg0: i32, %arg1: i32) -> (i32, i32) {
    %c0_i32 = arith.constant 0 : i32
    %c0_i32_0 = arith.constant 0 : i32
    return %arg0, %c0_i32 : i32, i32
  }
}

module attributes {stable_mosaic.version = 11 : i64} {
  func.func @cgd_head_kernel(%arg0: i32, %arg1: i32, %arg2: memref<2x16x1024xbf16, #tpu.memory_space<vmem>>, %arg3: memref<3x2048x128xbf16, #tpu.memory_space<vmem>>, %arg4: memref<2x384xf32, #tpu.memory_space<vmem>>, %arg5: memref<2x384xf32, #tpu.memory_space<vmem>>) attributes {dimension_semantics = [#tpu.dimension_semantics<parallel>, #tpu.dimension_semantics<arbitrary>], iteration_bounds = array<i64: 1, 2>, scalar_prefetch = 0 : i64, scratch_operands = 1 : i64, tpu.core_type = #tpu.core_type<tc>, window_params = [{transform_indices = @transform_0, window_bounds = array<i64: 2, 16, 1024>}, {pipeline_mode = #tpu.pipeline_mode<synchronous>, transform_indices = @transform_1, window_bounds = array<i64: 3, 2048, 128>}, {transform_indices = @transform_2, window_bounds = array<i64: 2, 384>}]} {
    %c0_i32 = arith.constant 0 : i32
    %0 = arith.cmpi eq, %arg1, %c0_i32 : i32
    %1 = arith.extui %0 : i1 to i32
    %c0_i32_0 = arith.constant 0 : i32
    %2 = arith.cmpi ne, %1, %c0_i32_0 : i32
    scf.if %2 {
      %cst_33 = arith.constant 0.000000e+00 : f32
      %51 = vector.broadcast %cst_33 : f32 to vector<2x384xf32>
      %c0_34 = arith.constant 0 : index
      %c0_35 = arith.constant 0 : index
      %52 = vector.load %arg5[%c0_34, %c0_35] : memref<2x384xf32, #tpu.memory_space<vmem>>, vector<2x384xf32>
      tpu.vector_store %arg5[%c0_34, %c0_35], %51 {strides = array<i32>} : memref<2x384xf32, #tpu.memory_space<vmem>>, vector<2x384xf32>,
    } else {
    }
    %c1024_i32 = arith.constant 1024 : i32
    %3 = arith.muli %arg1, %c1024_i32 : i32
    %4 = tpu.assume_multiple %3, 1024 : i32
    %c0 = arith.constant 0 : index
    %c0_1 = arith.constant 0 : index
    %c0_2 = arith.constant 0 : index
    %5 = vector.load %arg2[%c0, %c0_1, %c0_2] : memref<2x16x1024xbf16, #tpu.memory_space<vmem>>, vector<2x16x1024xbf16>
    %6 = arith.extf %5 : vector<2x16x1024xbf16> to vector<2x16x1024xf32>
    %cst = arith.constant dense<0.000000e+00> : vector<2x1024xf32>
    %7 = vector.multi_reduction <add>, %6, %cst [1] : vector<2x16x1024xf32> to vector<2x1024xf32>
    %cst_3 = arith.constant 6.250000e-02 : f32
    %8 = vector.broadcast %cst_3 : f32 to vector<2x1024xf32>
    %9 = arith.mulf %7, %8 : vector<2x1024xf32>
    %c0_4 = arith.constant 0 : index
    %10 = arith.index_cast %4 : i32 to index
    %c0_5 = arith.constant 0 : index
    %11 = vector.load %arg3[%c0_4, %10, %c0_5] : memref<3x2048x128xbf16, #tpu.memory_space<vmem>>, vector<1x1024x128xbf16>
    %12 = vector.shape_cast %11 : vector<1x1024x128xbf16> to vector<1024x128xbf16>
    %c0_6 = arith.constant 0 : index
    %c0_7 = arith.constant 0 : index
    %13 = vector.load %arg5[%c0_6, %c0_7] : memref<2x384xf32, #tpu.memory_space<vmem>>, vector<2x128xf32>
    %14 = arith.truncf %9 : vector<2x1024xf32> to vector<2x1024xbf16>
    %cst_8 = arith.constant dense<0.000000e+00> : vector<2x128xf32>
    %15 = tpu.matmul %14, %12, %cst_8 {dimension_numbers = #tpu.dot_dimension_numbers<[1], [0], [0], [1], [0, 0, 1, 1], [], []>} : vector<2x1024xbf16>, vector<1024x128xbf16>, vector<2x128xf32> -> vector<2x128xf32>
    %16 = arith.addf %13, %15 : vector<2x128xf32>
    %c0_9 = arith.constant 0 : index
    %c0_10 = arith.constant 0 : index
    %17 = vector.load %arg5[%c0_9, %c0_10] : memref<2x384xf32, #tpu.memory_space<vmem>>, vector<2x128xf32>
    tpu.vector_store %arg5[%c0_9, %c0_10], %16 {strides = array<i32>} : memref<2x384xf32, #tpu.memory_space<vmem>>, vector<2x128xf32>,
    %c0_11 = arith.constant 0 : index
    %c0_12 = arith.constant 0 : index
    %c0_13 = arith.constant 0 : index
    %18 = vector.load %arg2[%c0_11, %c0_12, %c0_13] : memref<2x16x1024xbf16, #tpu.memory_space<vmem>>, vector<2x16x1024xbf16>
    %cst_14 = arith.constant dense<0xFF80> : vector<2x1024xbf16>
    %19 = vector.multi_reduction <maximumf>, %18, %cst_14 [1] : vector<2x16x1024xbf16> to vector<2x1024xbf16>
    %20 = arith.extf %19 : vector<2x1024xbf16> to vector<2x1024xf32>
    %c1 = arith.constant 1 : index
    %21 = arith.index_cast %4 : i32 to index
    %c0_15 = arith.constant 0 : index
    %22 = vector.load %arg3[%c1, %21, %c0_15] : memref<3x2048x128xbf16, #tpu.memory_space<vmem>>, vector<1x1024x128xbf16>
    %23 = vector.shape_cast %22 : vector<1x1024x128xbf16> to vector<1024x128xbf16>
    %c0_16 = arith.constant 0 : index
    %c128 = arith.constant 128 : index
    %24 = vector.load %arg5[%c0_16, %c128] : memref<2x384xf32, #tpu.memory_space<vmem>>, vector<2x128xf32>
    %25 = arith.truncf %20 : vector<2x1024xf32> to vector<2x1024xbf16>
    %cst_17 = arith.constant dense<0.000000e+00> : vector<2x128xf32>
    %26 = tpu.matmul %25, %23, %cst_17 {dimension_numbers = #tpu.dot_dimension_numbers<[1], [0], [0], [1], [0, 0, 1, 1], [], []>} : vector<2x1024xbf16>, vector<1024x128xbf16>, vector<2x128xf32> -> vector<2x128xf32>
    %27 = arith.addf %24, %26 : vector<2x128xf32>
    %c0_18 = arith.constant 0 : index
    %c128_19 = arith.constant 128 : index
    %28 = vector.load %arg5[%c0_18, %c128_19] : memref<2x384xf32, #tpu.memory_space<vmem>>, vector<2x128xf32>
    tpu.vector_store %arg5[%c0_18, %c128_19], %27 {strides = array<i32>} : memref<2x384xf32, #tpu.memory_space<vmem>>, vector<2x128xf32>,
    %c0_20 = arith.constant 0 : index
    %c0_21 = arith.constant 0 : index
    %c0_22 = arith.constant 0 : index
    %29 = vector.load %arg2[%c0_20, %c0_21, %c0_22] : memref<2x16x1024xbf16, #tpu.memory_space<vmem>>, vector<2x16x1024xbf16>
    %30 = arith.extf %29 : vector<2x16x1024xbf16> to vector<2x16x1024xf32>
    %31 = arith.mulf %30, %30 : vector<2x16x1024xf32>
    %32 = arith.mulf %31, %30 : vector<2x16x1024xf32>
    %cst_23 = arith.constant dense<0.000000e+00> : vector<2x1024xf32>
    %33 = vector.multi_reduction <add>, %32, %cst_23 [1] : vector<2x16x1024xf32> to vector<2x1024xf32>
    %cst_24 = arith.constant 6.250000e-02 : f32
    %34 = vector.broadcast %cst_24 : f32 to vector<2x1024xf32>
    %35 = arith.mulf %33, %34 : vector<2x1024xf32>
    %cst_25 = arith.constant 1.000000e-30 : f32
    %36 = vector.broadcast %cst_25 : f32 to vector<2x1024xf32>
    %37 = arith.maximumf %35, %36 : vector<2x1024xf32>
    %cst_26 = arith.constant 0.333333343 : f32
    %38 = vector.broadcast %cst_26 : f32 to vector<2x1024xf32>
    %39 = math.powf %37, %38 : vector<2x1024xf32>
    %c2 = arith.constant 2 : index
    %40 = arith.index_cast %4 : i32 to index
    %c0_27 = arith.constant 0 : index
    %41 = vector.load %arg3[%c2, %40, %c0_27] : memref<3x2048x128xbf16, #tpu.memory_space<vmem>>, vector<1x1024x128xbf16>
    %42 = vector.shape_cast %41 : vector<1x1024x128xbf16> to vector<1024x128xbf16>
    %c0_28 = arith.constant 0 : index
    %c256 = arith.constant 256 : index
    %43 = vector.load %arg5[%c0_28, %c256] : memref<2x384xf32, #tpu.memory_space<vmem>>, vector<2x128xf32>
    %44 = arith.truncf %39 : vector<2x1024xf32> to vector<2x1024xbf16>
    %cst_29 = arith.constant dense<0.000000e+00> : vector<2x128xf32>
    %45 = tpu.matmul %44, %42, %cst_29 {dimension_numbers = #tpu.dot_dimension_numbers<[1], [0], [0], [1], [0, 0, 1, 1], [], []>} : vector<2x1024xbf16>, vector<1024x128xbf16>, vector<2x128xf32> -> vector<2x128xf32>
    %46 = arith.addf %43, %45 : vector<2x128xf32>
    %c0_30 = arith.constant 0 : index
    %c256_31 = arith.constant 256 : index
    %47 = vector.load %arg5[%c0_30, %c256_31] : memref<2x384xf32, #tpu.memory_space<vmem>>, vector<2x128xf32>
    tpu.vector_store %arg5[%c0_30, %c256_31], %46 {strides = array<i32>} : memref<2x384xf32, #tpu.memory_space<vmem>>, vector<2x128xf32>,
    %c1_i32 = arith.constant 1 : i32
    %48 = arith.cmpi eq, %arg1, %c1_i32 : i32
    %49 = arith.extui %48 : i1 to i32
    %c0_i32_32 = arith.constant 0 : i32
    %50 = arith.cmpi ne, %49, %c0_i32_32 : i32
    scf.if %50 {
      %cst_33 = arith.constant 0.000000e+00 : f32
      %51 = vector.broadcast %cst_33 : f32 to vector<2x1xf32>
      %c0_34 = arith.constant 0 : index
      %c0_35 = arith.constant 0 : index
      %52 = vector.load %arg5[%c0_34, %c0_35] : memref<2x384xf32, #tpu.memory_space<vmem>>, vector<2x128xf32>
      %53 = arith.mulf %52, %52 : vector<2x128xf32>
      %cst_36 = arith.constant dense<0.000000e+00> : vector<2xf32>
      %54 = vector.multi_reduction <add>, %53, %cst_36 [1] : vector<2x128xf32> to vector<2xf32>
      %55 = vector.shape_cast %54 : vector<2xf32> to vector<2x1xf32>
      %cst_37 = arith.constant 1.000000e-24 : f32
      %56 = vector.broadcast %cst_37 : f32 to vector<2x1xf32>
      %57 = arith.maximumf %55, %56 : vector<2x1xf32>
      %58 = math.rsqrt %57 : vector<2x1xf32>
      %59 = arith.mulf %55, %58 : vector<2x1xf32>
      %60 = arith.mulf %59, %58 : vector<2x1xf32>
      %61 = arith.addf %51, %60 : vector<2x1xf32>
      %c0_38 = arith.constant 0 : index
      %c128_39 = arith.constant 128 : index
      %62 = vector.load %arg5[%c0_38, %c128_39] : memref<2x384xf32, #tpu.memory_space<vmem>>, vector<2x128xf32>
      %63 = arith.mulf %62, %62 : vector<2x128xf32>
      %cst_40 = arith.constant dense<0.000000e+00> : vector<2xf32>
      %64 = vector.multi_reduction <add>, %63, %cst_40 [1] : vector<2x128xf32> to vector<2xf32>
      %65 = vector.shape_cast %64 : vector<2xf32> to vector<2x1xf32>
      %cst_41 = arith.constant 1.000000e-24 : f32
      %66 = vector.broadcast %cst_41 : f32 to vector<2x1xf32>
      %67 = arith.maximumf %65, %66 : vector<2x1xf32>
      %68 = math.rsqrt %67 : vector<2x1xf32>
      %69 = arith.mulf %65, %68 : vector<2x1xf32>
      %70 = arith.mulf %69, %68 : vector<2x1xf32>
      %71 = arith.addf %61, %70 : vector<2x1xf32>
      %c0_42 = arith.constant 0 : index
      %c256_43 = arith.constant 256 : index
      %72 = vector.load %arg5[%c0_42, %c256_43] : memref<2x384xf32, #tpu.memory_space<vmem>>, vector<2x128xf32>
      %73 = arith.mulf %72, %72 : vector<2x128xf32>
      %cst_44 = arith.constant dense<0.000000e+00> : vector<2xf32>
      %74 = vector.multi_reduction <add>, %73, %cst_44 [1] : vector<2x128xf32> to vector<2xf32>
      %75 = vector.shape_cast %74 : vector<2xf32> to vector<2x1xf32>
      %cst_45 = arith.constant 1.000000e-24 : f32
      %76 = vector.broadcast %cst_45 : f32 to vector<2x1xf32>
      %77 = arith.maximumf %75, %76 : vector<2x1xf32>
      %78 = math.rsqrt %77 : vector<2x1xf32>
      %79 = arith.mulf %75, %78 : vector<2x1xf32>
      %80 = arith.mulf %79, %78 : vector<2x1xf32>
      %81 = arith.addf %71, %80 : vector<2x1xf32>
      %cst_46 = arith.constant 1.000000e-24 : f32
      %82 = vector.broadcast %cst_46 : f32 to vector<2x1xf32>
      %83 = arith.maximumf %81, %82 : vector<2x1xf32>
      %84 = math.rsqrt %83 : vector<2x1xf32>
      %c0_47 = arith.constant 0 : index
      %c0_48 = arith.constant 0 : index
      %85 = vector.load %arg5[%c0_47, %c0_48] : memref<2x384xf32, #tpu.memory_space<vmem>>, vector<2x128xf32>
      %86 = arith.mulf %58, %84 : vector<2x1xf32>
      %87 = vector.broadcast %86 : vector<2x1xf32> to vector<2x128xf32>
      %88 = arith.mulf %85, %87 : vector<2x128xf32>
      %c0_49 = arith.constant 0 : index
      %c0_50 = arith.constant 0 : index
      %89 = vector.load %arg4[%c0_49, %c0_50] : memref<2x384xf32, #tpu.memory_space<vmem>>, vector<2x128xf32>
      tpu.vector_store %arg4[%c0_49, %c0_50], %88 {strides = array<i32>} : memref<2x384xf32, #tpu.memory_space<vmem>>, vector<2x128xf32>,
      %c0_51 = arith.constant 0 : index
      %c128_52 = arith.constant 128 : index
      %90 = vector.load %arg5[%c0_51, %c128_52] : memref<2x384xf32, #tpu.memory_space<vmem>>, vector<2x128xf32>
      %91 = arith.mulf %68, %84 : vector<2x1xf32>
      %92 = vector.broadcast %91 : vector<2x1xf32> to vector<2x128xf32>
      %93 = arith.mulf %90, %92 : vector<2x128xf32>
      %c0_53 = arith.constant 0 : index
      %c128_54 = arith.constant 128 : index
      %94 = vector.load %arg4[%c0_53, %c128_54] : memref<2x384xf32, #tpu.memory_space<vmem>>, vector<2x128xf32>
      tpu.vector_store %arg4[%c0_53, %c128_54], %93 {strides = array<i32>} : memref<2x384xf32, #tpu.memory_space<vmem>>, vector<2x128xf32>,
      %c0_55 = arith.constant 0 : index
      %c256_56 = arith.constant 256 : index
      %95 = vector.load %arg5[%c0_55, %c256_56] : memref<2x384xf32, #tpu.memory_space<vmem>>, vector<2x128xf32>
      %96 = arith.mulf %78, %84 : vector<2x1xf32>
      %97 = vector.broadcast %96 : vector<2x1xf32> to vector<2x128xf32>
      %98 = arith.mulf %95, %97 : vector<2x128xf32>
      %c0_57 = arith.constant 0 : index
      %c256_58 = arith.constant 256 : index
      %99 = vector.load %arg4[%c0_57, %c256_58] : memref<2x384xf32, #tpu.memory_space<vmem>>, vector<2x128xf32>
      tpu.vector_store %arg4[%c0_57, %c256_58], %98 {strides = array<i32>} : memref<2x384xf32, #tpu.memory_space<vmem>>, vector<2x128xf32>,
    } else {
    }
    return
  }
  func.func @transform_0(%arg0: i32, %arg1: i32) -> (i32, i32, i32) {
    %c0_i32 = arith.constant 0 : i32
    %c0_i32_0 = arith.constant 0 : i32
    return %arg0, %c0_i32, %arg1 : i32, i32, i32
  }
  func.func @transform_1(%arg0: i32, %arg1: i32) -> (i32, i32, i32) {
    %c0_i32 = arith.constant 0 : i32
    %c0_i32_0 = arith.constant 0 : i32
    %c0_i32_1 = arith.constant 0 : i32
    %c0_i32_2 = arith.constant 0 : i32
    return %c0_i32, %c0_i32_0, %c0_i32_1 : i32, i32, i32
  }
  func.func @transform_2(%arg0: i32, %arg1: i32) -> (i32, i32) {
    %c0_i32 = arith.constant 0 : i32
    %c0_i32_0 = arith.constant 0 : i32
    return %arg0, %c0_i32 : i32, i32
  }
}

</mosaic_0001>

<bundles_post_ra>
// kernel: tpu_custom_call.1
= control target key start
LH: loop header
LB: loop body
LE: loop exit
PB: predicated region body
PF: predicated region fallthrough
CT: control target
= control target key end

     0   :  { %7 = vsyncpa [#allocation4], 0  ;;  %s6138_s0 = inlined_call_operand.hbm [shape: bf16[2,16,2048], index: 0, kind: input, shape index: {}]   ;;  %s6139_s1 = inlined_call_operand.hbm [shape: bf16[3,2048,128], index: 1, kind: input, shape index: {}]   ;;  %s6140_s2 = inlined_call_operand.hbm [shape: f32[2,384], index: 2, kind: output, shape index: {}]  }
   0x1   :  { %9 = vsyncpa [#allocation4 + $0x1], 0 }
   0x2   :  { %10 = vsyncpa [#allocation7], 0 }
   0x3   :  { %11 = vsyncpa [#allocation5], 0  ;;  %s5012_s9 = smov 0   ;;  %s5014_s10 = smov 0  }
   0x4   :  { %s5016_s11 = smov 0   ;;  %s5018_s12 = smov 0  }
   0x5   :  { %s5020_s13 = smov 0   ;;  %s5022_s14 = smov 0  }
   0x6 LB: > { %s3069_s15 = sadd.s32 4294967295, %s4987_s14   ;;  %p51_p0 = scmp.ne.s32.totalorder %s4971_s10, %s4967_s9  ;;  %s4987_s14 = sphi %s5022_s14, %s17_s14   ;;  %s4983_s13 = sphi %s5020_s13, %s6184_s13   ;;  %s4979_s12 = sphi %s5018_s12, %s6183_s12   ;;  %s4975_s11 = sphi %s5016_s11, %s6182_s11   ;;  %s4971_s10 = sphi %s5014_s10, %s6181_s10   ;;  %s4967_s9 = sphi %s5012_s9, %s6180_s9  }
   0x7   : > { %p5044_p1 = scmp.eq.s32.totalorder %s3069_s15, 0  ;;  %p3070_p2 = scmp.ge.s32.totalorder %s4987_s14, 1 }
   0x8   : > { %p109_p3 = scmp.lt.s32.totalorder %s4987_s14, 3  ;;  %s120_s20 = sshll.u32 %s6139_s1, 4  ;;  %s121_s20 = int_to_ptr.hbm [resolvable:$true] %s120_s20 }
   0x9   : > { %p5052_p4 = por %p5044_p1, %p51_p0  ;;  %s4989_s22 = smov [#allocation6]  }
   0xa   : > { %p5059_p5 = pnand %p3070_p2, %p109_p3  ;;  %s122_s23 = sshll.u32 %s4989_s22, 4  ;;  %s123_s23 = int_to_ptr.vmem [resolvable:$true] %s122_s23 }
   0xb   : > { %s4990_s24 = smov 64   ;;  %s4991_s25 = smov 4  }
   0xc   : > { %p4700_p6 = pneg %p5059_p5  ;;  %s26_s26 = sadd.s32 1, %s4983_s13 }
   0xd   : > { %p27_p8 = scmp.ge.s32.totalorder %s26_s26, 2  ;;  %s38_s27 = sadd.s32 1, %s4975_s11 }
   0xe   : > { %p4701_p7 = pnand %p4700_p6, %p5044_p1  ;;  %p45_p9 = scmp.ne.s32.totalorder %s4975_s11, %s4971_s10 }
   0xf   : > { %p46_p10 = scmp.eq.s32.totalorder %s4987_s14, 0  ;;  %s6186_s26 = smov (%p27_p8, %s26_s26), 0 }
  0x10   : > { %4703 = dma.hbm_to_vmem [thread:$0]  (!%p4701_p7), %s121_s20, 49152, %s123_s23, [#allocation7], %s4990_s24, %s4990_s24, %s4991_s25  }
  0x11   : > { %p5074_p11 = por %p46_p10, %p45_p9  ;;  %p4709_p12 = scmp.lt.s32.totalorder %s4987_s14, 2 }
  0x12   : > { %s34_s29 = ssub.s32 %s4983_s13, %s6186_s26  ;;  %s136_s30 = sand.u32 1, %s4975_s11  }
  0x13   : > { %p36_p13 = scmp.eq.s32.totalorder %s34_s29, 0  ;;  %s3073_s3 = sshll.u32 %s136_s30, 7 }
  0x14   : > { %s4113_s4 = sshll.u32 %s4983_s13, 5  ;;  %s140_s18 = scalar_lea.vmem [#allocation3], %s3073_s3 }
  0x15   : > { %s5084_s5 = scalar_select %p36_p13, %s4975_s11, %s38_s27  }
  0x16   : > { %s148_s8 = scalar_lea.hbm %s6138_s0, %s4113_s4  ;;  %s151_s19 = sshll.u32 %s140_s18, 4  ;;  %s152_s19 = int_to_ptr.vmem [resolvable:$true] %s151_s19 }
  0x17   : > { %s149_s9 = sshll.u32 %s148_s8, 4  ;;  %p4705_p0 = pnand %p4709_p12, %p5074_p11  ;;  %s150_s9 = int_to_ptr.hbm [resolvable:$true] %s149_s9 }
  0x18   : > { %s137_s20 = scalar_lea.sflag [#allocation4], %s136_s30  ;;  %s4992_s22 = smov 1024  }
  0x19   : > { %s4993_s23 = smov 512   ;;  %s4994_s24 = smov 32  }
  0x1a   : > { %4707 = dma.hbm_to_vmem [thread:$0]  (!%p4705_p0), %s150_s9, 2048, %s152_s19, %s137_s20, %s4992_s22, %s4993_s23, %s4994_s24  }
  0x1b   : > { %163 = sbr.rel (%p5059_p5) target bundleno = 673 (0x2a1), region = 28  ;;  %s165_s25 = sand.u32 (!%p5059_p5), 1, %s4971_s10  }
  0x1c   : > { %s3077_s27 = sshll.u32 (!%p5059_p5), %s165_s25, 7  ;;  %s166_s29 = scalar_lea.sflag (!%p5059_p5), [#allocation4], %s165_s25 }
  0x1d   : > { %s5096_s3 = scalar_lea.vmem (!%p5059_p5), [#allocation3], %s3077_s27 }
  0x20   : > { %4954 = dma.done.wait (%p5052_p4), %s166_s29, 2048  }
  0x21   : > { %4956 = vsyncadd (%p5052_p4), %s166_s29, 4294965248 }
  0x22   : > { %4958 = dma.done.wait (%p5044_p1), [#allocation7], 49152  }
  0x23   : > { %4960 = vsyncadd (%p5044_p1), [#allocation7], 4294918144  ;;  %p3079_p2 = scmp.ne.s32.totalorder %s4979_s12, 0 }
  0x25   : > { %196 = sbr.rel (%p3079_p2) target bundleno = 44 (0x2c), region = 40 }
  0x2a   : > { %v4995_v0 = vmov 0.0  }
  0x2b   : > { %197 = vst [vmem:[#allocation2] sm:$0x3f] %v4995_v0 }
  0x2c PF: > { %s3080_s17 = sshll.u32 %s4979_s12, 10  ;;  %v5109_v1 = vld [vmem:[%s5096_s3 + $0x8] sm:$0xff]  ;;  %v5124_v8 = vld [vmem:[%s5096_s3] sm:$0xff]  ;;  %vm556_vm0 = vcmask 1041409   ;;  %p4108_p1 = scmp.ne.s32.totalorder %s4979_s12, 1 }
  0x2d   : > { %v5112_v2 = vld [vmem:[%s5096_s3 + $0x28] sm:$0xff]  ;;  %s375_s16 = sshra.s32 %s3080_s17, 3  ;;  %v217_v5 = vunpack.c.l.bf16 %v5109_v1  ;;  %v5127_v9 = vld [vmem:[%s5096_s3 + $0x20] sm:$0xff]  ;;  %v218_v10 = vunpack.c.h.bf16 %v5109_v1  ;;  %v215_v14 = vunpack.c.l.bf16 %v5124_v8  ;;  %v6153_v31 = vunpack.c.h.bf16 %v5124_v8 }
  0x2e   : > { %v5115_v3 = vld [vmem:[%s5096_s3 + $0x48] sm:$0xff]  ;;  %v225_v6 = vunpack.c.l.bf16 %v5112_v2  ;;  %s3081_s21 = sshll.u32 %s375_s16, 2  ;;  %v5132_v12 = vld [vmem:[%s5096_s3 + $0x40] sm:$0xff]  ;;  %v223_v15 = vunpack.c.l.bf16 %v5127_v9  ;;  %v226_v16 = vunpack.c.h.bf16 %v5112_v2  ;;  %v6156_v32 = vunpack.c.h.bf16 %v5127_v9 }
  0x2f   : > { %v5118_v4 = vld [vmem:[%s5096_s3 + $0x68] sm:$0xff]  ;;  %v233_v7 = vunpack.c.l.bf16 %v5115_v3  ;;  %v5135_v13 = vld [vmem:[%s5096_s3 + $0x60] sm:$0xff]  ;;  %v231_v18 = vunpack.c.l.bf16 %v5132_v12  ;;  %v6157_v20 = vunpack.c.h.bf16 %v5115_v3  ;;  %s5147_s28 = scalar_lea.vmem [#allocation6], %s3081_s21  ;;  %v6151_v43 = vunpack.c.h.bf16 %v5132_v12 }
  0x30   : > { %v241_v11 = vunpack.c.l.bf16 %v5118_v4  ;;  %v261_v17 = vadd.f32 %v225_v6, %v217_v5  ;;  %v239_v19 = vunpack.c.l.bf16 %v5135_v13  ;;  %v4121_v21 = vld [vmem:[%s5147_s28 + $0x38] sm:$0xff]  ;;  %v247_v25 = vadd.f32 %v223_v15, %v215_v14  ;;  %v4120_v33 = vld [vmem:[%s5147_s28 + $0x30] sm:$0xff]  ;;  %v4119_v53 = vld [vmem:[%s5147_s28 + $0x28] sm:$0xff] }
  0x31   : > { %v4129_v22 = vld [vmem:[%s5147_s28 + $0x78] sm:$0xff]  ;;  %v242_v26 = vunpack.c.h.bf16 %v5118_v4  ;;  %v268_v27 = vadd.f32 %v226_v16, %v218_v10  ;;  %965 = vmatpush.bf16.msra.mxu0 %v4121_v21  ;;  %v4128_v34 = vld [vmem:[%s5147_s28 + $0x70] sm:$0xff]  ;;  %v6152_v44 = vunpack.c.h.bf16 %v5135_v13  ;;  %v254_v51 = vadd.f32 %v6156_v32, %v6153_v31  ;;  %v4127_v54 = vld [vmem:[%s5147_s28 + $0x68] sm:$0xff] }
  0x32   : > { %v4137_v23 = vld [vmem:[%s5147_s28 + $0xb8] sm:$0xff]  ;;  %v317_v24 = vadd.f32 %v241_v11, %v233_v7  ;;  %v262_v29 = vrot.slane %v261_v17, 4  ;;  %v303_v30 = vadd.f32 %v239_v19, %v231_v18  ;;  %978 = vmatpush.bf16.msra.mxu1 %v4129_v22  ;;  %v248_v36 = vrot.slane %v247_v25, 4  ;;  %v4136_v39 = vld [vmem:[%s5147_s28 + $0xb0] sm:$0xff]  ;;  %v4135_v59 = vld [vmem:[%s5147_s28 + $0xa8] sm:$0xff] }
  0x33   : > { %v4145_v28 = vld [vmem:[%s5147_s28 + $0xf8] sm:$0xff]  ;;  %v269_v37 = vrot.slane %v268_v27, 4  ;;  %v324_v38 = vadd.f32 %v242_v26, %v6157_v20  ;;  %991 = vmatpush.bf16.msra.mxu2 %v4137_v23  ;;  %v4144_v40 = vld [vmem:[%s5147_s28 + $0xf0] sm:$0xff]  ;;  %v310_v52 = vadd.f32 %v6152_v44, %v6151_v43  ;;  %v4143_v60 = vld [vmem:[%s5147_s28 + $0xe8] sm:$0xff]  ;;  %v255_v63 = vrot.slane %v254_v51, 4 }
  0x34   : > { %v318_v35 = vrot.slane %v317_v24, 4  ;;  %1004 = vmatpush.bf16.msra.mxu3 %v4145_v28  ;;  %v263_v41 = vadd.f32 %v262_v29, %v261_v17  ;;  %v304_v42 = vrot.slane %v303_v30, 4  ;;  %v249_v46 = vadd.f32 %v248_v36, %v247_v25  ;;  %v4118_v29 = vld [vmem:[%s5147_s28 + $0x20] sm:$0xff]  ;;  %v4160_v32 = vld [vmem:[%s5147_s28 + $0x170] sm:$0xff] }
  0x35   : > { %v270_v47 = vadd.f32 %v269_v37, %v268_v27  ;;  %v325_v48 = vrot.slane %v324_v38, 4  ;;  %966 = vmatpush.bf16.msra.mxu0 %v4120_v33  ;;  %v311_v0 = vrot.slane %v310_v52, 4  ;;  %v256_v27 = vadd.f32 %v255_v63, %v254_v51  ;;  %v4134_v37 = vld [vmem:[%s5147_s28 + $0xa0] sm:$0xff] }
  0x36   : > { %v319_v45 = vadd.f32 %v318_v35, %v317_v24  ;;  %v264_v49 = vrot.slane %v263_v41, 2  ;;  %v305_v50 = vadd.f32 %v304_v42, %v303_v30  ;;  %979 = vmatpush.bf16.msra.mxu1 %v4128_v34  ;;  %v250_v56 = vrot.slane %v249_v46, 2  ;;  %v4126_v30 = vld [vmem:[%s5147_s28 + $0x60] sm:$0xff] }
  0x37   : > { %v271_v57 = vrot.slane %v270_v47, 2  ;;  %v326_v58 = vadd.f32 %v325_v48, %v324_v38  ;;  %992 = vmatpush.bf16.msra.mxu2 %v4136_v39  ;;  %v312_v28 = vadd.f32 %v311_v0, %v310_v52  ;;  %v4142_v38 = vld [vmem:[%s5147_s28 + $0xe0] sm:$0xff] }
  0x38   : > { %v320_v55 = vrot.slane %v319_v45, 2  ;;  %1005 = vmatpush.bf16.msra.mxu3 %v4144_v40  ;;  %v265_v61 = vadd.f32 %v264_v49, %v263_v41  ;;  %v306_v62 = vrot.slane %v305_v50, 2  ;;  %v251_v21 = vadd.f32 %v250_v56, %v249_v46 }
  0x39   : > { %v272_v22 = vadd.f32 %v271_v57, %v270_v47  ;;  %v327_v23 = vrot.slane %v326_v58, 2  ;;  %967 = vmatpush.bf16.msra.mxu0 %v4119_v53  ;;  %v257_v41 = vrot.slane %v256_v27, 2  ;;  %v313_v42 = vrot.slane %v312_v28, 2  ;;  %v4117_v53 = vld [vmem:[%s5147_s28 + $0x18] sm:$0xff] }
  0x3a   : > { %v321_v17 = vadd.f32 %v320_v55, %v319_v45  ;;  %v266_v24 = vrot.slane %v265_v61, 1  ;;  %v307_v25 = vadd.f32 %v306_v62, %v305_v50  ;;  %980 = vmatpush.bf16.msra.mxu1 %v4127_v54  ;;  %v252_v34 = vrot.slane %v251_v21, 1  ;;  %v4125_v54 = vld [vmem:[%s5147_s28 + $0x58] sm:$0xff] }
  0x3b   : > { %v273_v35 = vrot.slane %v272_v22, 1  ;;  %v328_v36 = vadd.f32 %v327_v23, %v326_v58  ;;  %993 = vmatpush.bf16.msra.mxu2 %v4135_v59  ;;  %v258_v51 = vadd.f32 %v257_v41, %v256_v27  ;;  %v314_v52 = vadd.f32 %v313_v42, %v312_v28  ;;  %v4133_v59 = vld [vmem:[%s5147_s28 + $0x98] sm:$0xff]  ;;  %v4116_v23 = vld [vmem:[%s5147_s28 + $0x10] sm:$0xff] }
  0x3c   : > { %v322_v33 = vrot.slane %v321_v17, 1  ;;  %1006 = vmatpush.bf16.msra.mxu3 %v4143_v60  ;;  %v267_v39 = vadd.f32 %v266_v24, %v265_v61  ;;  %v308_v40 = vrot.slane %v307_v25, 1  ;;  %v253_v46 = vadd.f32 %v252_v34, %v251_v21  ;;  %v4141_v60 = vld [vmem:[%s5147_s28 + $0xd8] sm:$0xff] }
  0x3d   : > { %v274_v47 = vadd.f32 %v273_v35, %v272_v22  ;;  %v329_v48 = vrot.slane %v328_v36, 1  ;;  %968 = vmatpush.bf16.msra.mxu0 %v4118_v29  ;;  %v259_v63 = vrot.slane %v258_v51, 1  ;;  %v315_v0 = vrot.slane %v314_v52, 1  ;;  %v5204_v29 = vld [vmem:[%s5096_s3 + $0x18] sm:$0xff] }
  0x3e   : > { %v323_v45 = vadd.f32 %v322_v33, %v321_v17  ;;  %v361_v49 = vmul.f32 0.0625, %v267_v39  ;;  %v309_v50 = vadd.f32 %v308_v40, %v307_v25  ;;  %981 = vmatpush.bf16.msra.mxu1 %v4126_v30  ;;  %v359_v56 = vmul.f32 0.0625, %v253_v46  ;;  %v4124_v30 = vld [vmem:[%s5147_s28 + $0x50] sm:$0xff]  ;;  %v5216_v46 = vld [vmem:[%s5096_s3 + $0x78] sm:$0xff] }
  0x3f   : > { %v330_v57 = vadd.f32 %v329_v48, %v328_v36  ;;  %v362_v58 = vmul.f32 0.0625, %v274_v47  ;;  %994 = vmatpush.bf16.msra.mxu2 %v4134_v37  ;;  %v260_v28 = vadd.f32 %v259_v63, %v258_v51  ;;  %v316_v36 = vadd.f32 %v315_v0, %v314_v52  ;;  %v5208_v37 = vld [vmem:[%s5096_s3 + $0x38] sm:$0xff]  ;;  %v4132_v39 = vld [vmem:[%s5147_s28 + $0x90] sm:$0xff] }
  0x40   : > { %v369_v55 = vmul.f32 0.0625, %v323_v45  ;;  %1007 = vmatpush.bf16.msra.mxu3 %v4142_v38  ;;  %v510_v61 = vpack.c.bf16 %v361_v49, %v361_v49  ;;  %v367_v62 = vmul.f32 0.0625, %v309_v50  ;;  %v508_v21 = vpack.c.bf16 %v359_v56, %v359_v56  ;;  %v5211_v38 = vld [vmem:[%s5096_s3 + $0x58] sm:$0xff]  ;;  %v4140_v40 = vld [vmem:[%s5147_s28 + $0xd0] sm:$0xff] }
  0x41   : > { %v370_v22 = vmul.f32 0.0625, %v330_v57  ;;  %v511_v27 = vpack.c.bf16 %v362_v58, %v362_v58  ;;  %969 = vmatpush.bf16.msra.mxu0 %v4117_v53  ;;  %v360_v45 = vmul.f32 0.0625, %v260_v28  ;;  %v6143_v47 = vunpack.c.l.bf16 %v5204_v29  ;;  %v5224_v52 = vld [vmem:[%s5096_s3 + $0x10] sm:$0xff] }
  0x42   : > { %v518_v17 = vpack.c.bf16 %v369_v55, %v369_v55  ;;  %v542_v24 = vunpack.c.l.b16 %v510_v61  ;;  %v516_v25 = vpack.c.bf16 %v367_v62, %v367_v62  ;;  %982 = vmatpush.bf16.msra.mxu1 %v4125_v54  ;;  %v540_v34 = vunpack.c.l.b16 %v508_v21  ;;  %v5233_v57 = vld [vmem:[%s5096_s3 + $0x30] sm:$0xff]  ;;  %v4131_v21 = vld [vmem:[%s5147_s28 + $0x88] sm:$0xff] }
  0x43   : > { %v519_v35 = vpack.c.bf16 %v370_v22, %v370_v22  ;;  %995 = vmatpush.bf16.msra.mxu2 %v4133_v59  ;;  %v543_v42 = vunpack.c.l.b16 %v511_v27  ;;  %v368_v50 = vmul.f32 0.0625, %v316_v36  ;;  %v6146_v51 = vunpack.c.l.bf16 %v5208_v37  ;;  %v5236_v58 = vld [vmem:[%s5096_s3 + $0x50] sm:$0xff]  ;;  %v4115_v59 = vld [vmem:[%s5147_s28 + $0x8] sm:$0xff] }
  0x44   : > { %v550_v33 = vunpack.c.l.b16 %v518_v17  ;;  %1008 = vmatpush.bf16.msra.mxu3 %v4141_v60  ;;  %v548_v41 = vunpack.c.l.b16 %v516_v25  ;;  %v509_v55 = vpack.c.bf16 %v360_v45, %v360_v45  ;;  %v6141_v56 = vunpack.c.l.bf16 %v5211_v38  ;;  %v4123_v60 = vld [vmem:[%s5147_s28 + $0x48] sm:$0xff]  ;;  %v5247_v17 = vld [vmem:[%s5096_s3 + $0x70] sm:$0xff] }
  0x45   : > { %v551_v49 = vunpack.c.l.b16 %v519_v35  ;;  %970 = vmatpush.bf16.msra.mxu0 %v4116_v23  ;;  %v517_v63 = vpack.c.bf16 %v368_v50, %v368_v50  ;;  %v6142_v0 = vunpack.c.l.bf16 %v5216_v46  ;;  %v4139_v22 = vld [vmem:[%s5147_s28 + $0xc8] sm:$0xff]  ;;  %v289_v25 = vadd.f32 %v6146_v51, %v6143_v47  ;;  %v4161_v47 = vld [vmem:[%s5147_s28 + $0x178] sm:$0xff] }
  0x46   : > { %v5220_v48 = vsel %vm556_vm0, %v550_v33, %v542_v24  ;;  %v5229_v54 = vsel %vm556_vm0, %v548_v41, %v540_v34  ;;  %983 = vmatpush.bf16.msra.mxu1 %v4124_v30  ;;  %v541_v24 = vunpack.c.l.b16 %v509_v55  ;;  %v6144_v27 = vunpack.c.l.bf16 %v5224_v52  ;;  %v4114_v41 = vld [vmem:[%s5147_s28] sm:$0xff] }
  0x47   : > { %v567_v53 = vpack.c.b16 %v5220_v48, %v5220_v48  ;;  %v565_v61 = vpack.c.b16 %v5229_v54, %v5229_v54  ;;  %v5243_v62 = vsel %vm556_vm0, %v551_v49, %v543_v42  ;;  %996 = vmatpush.bf16.msra.mxu2 %v4132_v39  ;;  %v549_v28 = vunpack.c.l.b16 %v517_v63  ;;  %v4122_v42 = vld [vmem:[%s5147_s28 + $0x40] sm:$0xff]  ;;  %v4159_v54 = vld [vmem:[%s5147_s28 + $0x168] sm:$0xff] }
  0x48   : > { %1009 = vmatpush.bf16.msra.mxu3 %v4140_v40  ;;  %v568_v23 = vpack.c.b16 %v5243_v62, %v5243_v62  ;;  %v345_v30 = vadd.f32 %v6142_v0, %v6141_v56  ;;  %v6145_v33 = vunpack.c.l.bf16 %v5233_v57  ;;  %v6147_v34 = vunpack.c.l.bf16 %v5236_v58  ;;  %v4138_v63 = vld [vmem:[%s5147_s28 + $0xc0] sm:$0xff]  ;;  %v4153_v0 = vld [vmem:[%s5147_s28 + $0x138] sm:$0xff]  ;;  %v4167_v62 = vld [vmem:[%s5147_s28 + $0x1a8] sm:$0xff] }
  0x49   : > { %v290_v35 = vrot.slane %v289_v25, 4  ;;  %v6148_v36 = vunpack.c.l.bf16 %v5247_v17  ;;  %v6149_v39 = vunpack.c.h.bf16 %v5204_v29  ;;  %v6150_v40 = vunpack.c.h.bf16 %v5208_v37  ;;  %971 = vmatpush.bf16.msra.mxu0 %v4115_v59  ;;  %v4130_v59 = vld [vmem:[%s5147_s28 + $0x80] sm:$0xff] }
  0x4a   : > { %984 = vmatpush.bf16.msra.mxu1 %v4123_v60  ;;  %v558_v45 = vsel %vm556_vm0, %v549_v28, %v541_v24  ;;  %v346_v49 = vrot.slane %v345_v30, 4  ;;  %v275_v50 = vadd.f32 %v6145_v33, %v6144_v27  ;;  %v6154_v55 = vunpack.c.h.bf16 %v5211_v38 }
  0x4b   : > { %997 = vmatpush.bf16.msra.mxu2 %v4131_v21  ;;  %v566_v60 = vpack.c.b16 %v558_v45, %v558_v45  ;;  %v291_v56 = vadd.f32 %v290_v35, %v289_v25  ;;  %v331_v24 = vadd.f32 %v6148_v36, %v6147_v34  ;;  %v6155_v28 = vunpack.c.h.bf16 %v5216_v46  ;;  %v4169_v45 = vld [vmem:[%s5147_s28 + $0x1b8] sm:$0xff] }
  0x4c   : > { %1010 = vmatpush.bf16.msra.mxu3 %v4139_v22  ;;  %v347_v27 = vadd.f32 %v346_v49, %v345_v30  ;;  %v276_v33 = vrot.slane %v275_v50, 4  ;;  %v296_v21 = vadd.f32 %v6150_v40, %v6149_v39  ;;  %v220_v22 = vunpack.c.h.bf16 %v5224_v52  ;;  %v4177_v25 = vld [vmem:[%s5147_s28 + $0x1f8] sm:$0xff] }
  0x4d   : > { %v292_v35 = vrot.slane %v291_v56, 2  ;;  %v332_v51 = vrot.slane %v331_v24, 4  ;;  %v352_v34 = vadd.f32 %v6155_v28, %v6154_v55  ;;  %v228_v30 = vunpack.c.h.bf16 %v5233_v57  ;;  %972 = vmatpush.bf16.msra.mxu0 %v4114_v41  ;;  %v4152_v28 = vld [vmem:[%s5147_s28 + $0x130] sm:$0xff] }
  0x4e   : > { %985 = vmatpush.bf16.msra.mxu1 %v4122_v42  ;;  %v348_v49 = vrot.slane %v347_v27, 2  ;;  %v277_v36 = vadd.f32 %v276_v33, %v275_v50  ;;  %v297_v39 = vrot.slane %v296_v21, 4  ;;  %v236_v40 = vunpack.c.h.bf16 %v5236_v58  ;;  %v4168_v50 = vld [vmem:[%s5147_s28 + $0x1b0] sm:$0xff] }
  0x4f   : > { %998 = vmatpush.bf16.msra.mxu2 %v4130_v59  ;;  %v293_v43 = vadd.f32 %v292_v35, %v291_v56  ;;  %v333_v44 = vadd.f32 %v332_v51, %v331_v24  ;;  %v353_v31 = vrot.slane %v352_v34, 4  ;;  %v244_v55 = vunpack.c.h.bf16 %v5247_v17  ;;  %v4176_v56 = vld [vmem:[%s5147_s28 + $0x1f0] sm:$0xff] }
  0x50   : > { %1011 = vmatpush.bf16.msra.mxu3 %v4138_v63  ;;  %v349_v41 = vadd.f32 %v348_v49, %v347_v27  ;;  %v278_v42 = vrot.slane %v277_v36, 2  ;;  %v298_v20 = vadd.f32 %v297_v39, %v296_v21  ;;  %v282_v33 = vadd.f32 %v228_v30, %v220_v22  ;;  %973 = vmatmul.bf16.vlgmr.msra.gmra.mxu0 %v565_v61 }
  0x51   : > { %1017 = vmatpush.bf16.msrb.mxu0 %v4153_v0  ;;  %v334_v51 = vrot.slane %v333_v44, 2  ;;  %v354_v59 = vadd.f32 %v353_v31, %v352_v34  ;;  %v294_v0 = vrot.slane %v293_v43, 1  ;;  %986 = vmatmul.bf16.vlgmr.msra.gmra.mxu1 %v566_v60 }
  0x52   : > { %1030 = vmatpush.bf16.msrb.mxu1 %v4161_v47  ;;  %v338_v47 = vadd.f32 %v244_v55, %v236_v40  ;;  %999 = vmatmul.bf16.vlgmr.msra.gmra.mxu2 %v567_v53  ;;  %v279_v27 = vadd.f32 %v278_v42, %v277_v36  ;;  %v299_v39 = vrot.slane %v298_v20, 2  ;;  %v283_v63 = vrot.slane %v282_v33, 4  ;;  %v4151_v53 = vld [vmem:[%s5147_s28 + $0x128] sm:$0xff] }
  0x53   : > { %1043 = vmatpush.bf16.msrb.mxu2 %v4169_v45  ;;  %1012 = vmatmul.bf16.vlgmr.msra.gmra.mxu3 %v568_v23  ;;  %v350_v31 = vrot.slane %v349_v41, 1  ;;  %v335_v34 = vadd.f32 %v334_v51, %v333_v44  ;;  %v355_v48 = vrot.slane %v354_v59, 2  ;;  %v4175_v45 = vld [vmem:[%s5147_s28 + $0x1e8] sm:$0xff]  ;;  %v295_v35 = vadd.f32 %v294_v0, %v293_v43  ;;  %v4166_v43 = vld [vmem:[%s5147_s28 + $0x1a0] sm:$0xff] }
  0x54   : > { %1056 = vmatpush.bf16.msrb.mxu3 %v4177_v25  ;;  %v339_v24 = vrot.slane %v338_v47, 4  ;;  %v280_v61 = vrot.slane %v279_v27, 1  ;;  %v300_v21 = vadd.f32 %v299_v39, %v298_v20  ;;  %v284_v36 = vadd.f32 %v283_v63, %v282_v33  ;;  %v4150_v20 = vld [vmem:[%s5147_s28 + $0x120] sm:$0xff] }
  0x55   : > { %1018 = vmatpush.bf16.msrb.mxu0 %v4152_v28  ;;  %v336_v23 = vrot.slane %v335_v34, 1  ;;  %v356_v25 = vadd.f32 %v355_v48, %v354_v59  ;;  %v4158_v33 = vld [vmem:[%s5147_s28 + $0x160] sm:$0xff]  ;;  %v4149_v48 = vld [vmem:[%s5147_s28 + $0x118] sm:$0xff] }
  0x56   : > { %1031 = vmatpush.bf16.msrb.mxu1 %v4160_v32  ;;  %v340_v60 = vadd.f32 %v339_v24, %v338_v47  ;;  %v301_v44 = vrot.slane %v300_v21, 1  ;;  %v285_v28 = vrot.slane %v284_v36, 2  ;;  %v351_v32 = vadd.f32 %v350_v31, %v349_v41  ;;  %v4174_v59 = vld [vmem:[%s5147_s28 + $0x1e0] sm:$0xff]  ;;  %v4157_v24 = vld [vmem:[%s5147_s28 + $0x158] sm:$0xff] }
  0x57   : > { %1044 = vmatpush.bf16.msrb.mxu2 %v4168_v50  ;;  %v281_v49 = vadd.f32 %v280_v61, %v279_v27  ;;  %v357_v42 = vrot.slane %v356_v25, 1  ;;  %v337_v50 = vadd.f32 %v336_v23, %v335_v34  ;;  %v365_v27 = vmul.f32 0.0625, %v295_v35 }
  0x58   : > { %1057 = vmatpush.bf16.msrb.mxu3 %v4176_v56  ;;  %v341_v51 = vrot.slane %v340_v60, 2  ;;  %v302_v56 = vadd.f32 %v301_v44, %v300_v21  ;;  %v286_v39 = vadd.f32 %v285_v28, %v284_v36  ;;  %v373_v63 = vmul.f32 0.0625, %v351_v32  ;;  %v4165_v21 = vld [vmem:[%s5147_s28 + $0x198] sm:$0xff]  ;;  %v4148_v44 = vld [vmem:[%s5147_s28 + $0x110] sm:$0xff] }
  0x59   : > { %1019 = vmatpush.bf16.msrb.mxu0 %v4151_v53  ;;  %v358_v47 = vadd.f32 %v357_v42, %v356_v25  ;;  %v363_v34 = vmul.f32 0.0625, %v281_v49  ;;  %v371_v53 = vmul.f32 0.0625, %v337_v50  ;;  %v4173_v36 = vld [vmem:[%s5147_s28 + $0x1d8] sm:$0xff]  ;;  %v514_v25 = vpack.c.bf16 %v365_v27, %v365_v27  ;;  %v4156_v28 = vld [vmem:[%s5147_s28 + $0x150] sm:$0xff]  ;;  %v4163_v27 = vld [vmem:[%s5147_s28 + $0x188] sm:$0xff] }
  0x5a   : > { %1032 = vmatpush.bf16.msrb.mxu1 %v4159_v54  ;;  %v342_v0 = vadd.f32 %v341_v51, %v340_v60  ;;  %v287_v41 = vrot.slane %v286_v39, 1  ;;  %v366_v54 = vmul.f32 0.0625, %v302_v56  ;;  %v522_v60 = vpack.c.bf16 %v373_v63, %v373_v63  ;;  %v4164_v51 = vld [vmem:[%s5147_s28 + $0x190] sm:$0xff]  ;;  %v4171_v63 = vld [vmem:[%s5147_s28 + $0x1c8] sm:$0xff] }
  0x5b   : > { %1045 = vmatpush.bf16.msrb.mxu2 %v4167_v62  ;;  %v374_v62 = vmul.f32 0.0625, %v358_v47  ;;  %v512_v32 = vpack.c.bf16 %v363_v34, %v363_v34  ;;  %v520_v49 = vpack.c.bf16 %v371_v53, %v371_v53  ;;  %v4146_v53 = vld [vmem:[%s5147_s28 + $0x100] sm:$0xff] }
  0x5c   : > { %1058 = vmatpush.bf16.msrb.mxu3 %v4175_v45  ;;  %v343_v31 = vrot.slane %v342_v0, 1  ;;  %v288_v61 = vadd.f32 %v287_v41, %v286_v39  ;;  %v515_v42 = vpack.c.bf16 %v366_v54, %v366_v54  ;;  %v4147_v39 = vld [vmem:[%s5147_s28 + $0x108] sm:$0xff]  ;;  %v554_v47 = vunpack.c.l.b16 %v522_v60  ;;  %v4154_v54 = vld [vmem:[%s5147_s28 + $0x140] sm:$0xff]  ;;  %v4193_v60 = vld [vmem:[%s5147_s28 + $0x478] sm:$0xff] }
  0x5d   : > { %1020 = vmatpush.bf16.msrb.mxu0 %v4150_v20  ;;  %v4172_v20 = vld [vmem:[%s5147_s28 + $0x1d0] sm:$0xff]  ;;  %v552_v41 = vunpack.c.l.b16 %v520_v49  ;;  %v1189_v49 = vmax.f32 %v233_v7, %v241_v11  ;;  %v1119_v7 = vmax.f32 %v215_v14, %v223_v15  ;;  %v1175_v11 = vmax.f32 %v231_v18, %v239_v19 }
  0x5e   : > { %1033 = vmatpush.bf16.msrb.mxu1 %v4158_v33  ;;  %v344_v45 = vadd.f32 %v343_v31, %v342_v0  ;;  %v364_v23 = vmul.f32 0.0625, %v288_v61  ;;  %v523_v33 = vpack.c.bf16 %v374_v62, %v374_v62  ;;  %v544_v0 = vunpack.c.l.b16 %v512_v32  ;;  %v4200_v18 = vld [vmem:[%s5147_s28 + $0x4b0] sm:$0xff] }
  0x5f   : > { %1046 = vmatpush.bf16.msrb.mxu2 %v4166_v43  ;;  %v4155_v43 = vld [vmem:[%s5147_s28 + $0x148] sm:$0xff]  ;;  %v547_v31 = vunpack.c.l.b16 %v515_v42  ;;  %v1133_v32 = vmax.f32 %v217_v5, %v225_v6  ;;  %v1190_v6 = vrot.slane %v1189_v49, 4  ;;  %v4208_v19 = vld [vmem:[%s5147_s28 + $0x4f0] sm:$0xff]  ;;  %v1176_v1 = vrot.slane %v1175_v11, 4 }
  0x60   : > { %1059 = vmatpush.bf16.msrb.mxu3 %v4174_v59  ;;  %v372_v35 = vmul.f32 0.0625, %v344_v45  ;;  %v513_v50 = vpack.c.bf16 %v364_v23, %v364_v23  ;;  %v546_v59 = vunpack.c.l.b16 %v514_v25  ;;  %v561_v62 = vsel %vm556_vm0, %v552_v41, %v544_v0  ;;  %v4185_v25 = vld [vmem:[%s5147_s28 + $0x438] sm:$0xff]  ;;  %v5360_v42 = vld [vmem:[%s5096_s3 + $0x8] sm:$0xff] }
  0x61   : > { %1021 = vmatpush.bf16.msrb.mxu0 %v4149_v48  ;;  %v555_v48 = vunpack.c.l.b16 %v523_v33  ;;  %v1134_v5 = vrot.slane %v1133_v32, 4  ;;  %v5384_v14 = vunpack.c.l.bf16 %v5360_v42  ;;  %v1191_v2 = vmax.f32 %v1189_v49, %v1190_v6 }
  0x62   : > { %1034 = vmatpush.bf16.msrb.mxu1 %v4157_v24  ;;  %v521_v56 = vpack.c.bf16 %v372_v35, %v372_v35  ;;  %v545_v24 = vunpack.c.l.b16 %v513_v50  ;;  %v563_v61 = vsel %vm556_vm0, %v554_v47, %v546_v59  ;;  %v4201_v35 = vld [vmem:[%s5147_s28 + $0x4b8] sm:$0xff]  ;;  %v6162_v59 = vunpack.c.h.bf16 %v5115_v3 }
  0x63   : > { %1047 = vmatpush.bf16.msrb.mxu2 %v4165_v21  ;;  %v4162_v21 = vld [vmem:[%s5147_s28 + $0x180] sm:$0xff]  ;;  %v564_v45 = vsel %vm556_vm0, %v555_v48, %v547_v31  ;;  %v1135_v0 = vmax.f32 %v1133_v32, %v1134_v5  ;;  %v1120_v41 = vrot.slane %v1119_v7, 4 }
  0x64   : > { %1060 = vmatpush.bf16.msrb.mxu3 %v4173_v36  ;;  %v553_v34 = vunpack.c.l.b16 %v521_v56  ;;  %v4170_v36 = vld [vmem:[%s5147_s28 + $0x1c0] sm:$0xff]  ;;  %v572_v33 = vpack.c.b16 %v564_v45, %v564_v45  ;;  %v4184_v56 = vld [vmem:[%s5147_s28 + $0x430] sm:$0xff]  ;;  %v1196_v47 = vmax.f32 %v6162_v59, %v242_v26 }
  0x65   : > { %1022 = vmatpush.bf16.msrb.mxu0 %v4148_v44  ;;  %v4209_v44 = vld [vmem:[%s5147_s28 + $0x4f8] sm:$0xff]  ;;  %v1136_v48 = vrot.slane %v1135_v0, 2  ;;  %v4190_v5 = vld [vmem:[%s5147_s28 + $0x460] sm:$0xff] }
  0x66   : > { %1035 = vmatpush.bf16.msrb.mxu1 %v4156_v28  ;;  %v562_v23 = vsel %vm556_vm0, %v553_v34, %v545_v24  ;;  %v571_v28 = vpack.c.b16 %v563_v61, %v563_v61  ;;  %v1197_v4 = vrot.slane %v1196_v47, 4  ;;  %v1192_v24 = vrot.slane %v1191_v2, 2 }
  0x67   : > { %1048 = vmatpush.bf16.msrb.mxu2 %v4164_v51  ;;  %v5363_v51 = vld [vmem:[%s5096_s3 + $0x28] sm:$0xff]  ;;  %v570_v50 = vpack.c.b16 %v562_v23, %v562_v23  ;;  %v1121_v34 = vmax.f32 %v1119_v7, %v1120_v41 }
  0x68   : > { %1061 = vmatpush.bf16.msrb.mxu3 %v4172_v20  ;;  %v569_v20 = vpack.c.b16 %v561_v62, %v561_v62  ;;  %v5387_v15 = vunpack.c.l.bf16 %v5363_v51  ;;  %v1137_v62 = vmax.f32 %v1135_v0, %v1136_v48  ;;  %v1193_v45 = vmax.f32 %v1191_v2, %v1192_v24 }
  0x69   : > { %1023 = vmatpush.bf16.msrb.mxu0 %v4147_v39  ;;  %v4192_v39 = vld [vmem:[%s5147_s28 + $0x470] sm:$0xff]  ;;  %v1122_v23 = vrot.slane %v1121_v34, 2 }
  0x6a   : > { %1036 = vmatpush.bf16.msrb.mxu1 %v4155_v43  ;;  %v1140_v43 = vmax.f32 %v218_v10, %v226_v16  ;;  %v6163_v10 = vunpack.c.h.bf16 %v5127_v9  ;;  %v6164_v16 = vunpack.c.h.bf16 %v5124_v8  ;;  %v4191_v9 = vld [vmem:[%s5147_s28 + $0x468] sm:$0xff]  ;;  %v1198_v8 = vmax.f32 %v1196_v47, %v1197_v4 }
  0x6b   : > { %1049 = vmatpush.bf16.msrb.mxu2 %v4163_v27  ;;  %v6165_v27 = vunpack.c.h.bf16 %v5135_v13  ;;  %v4207_v13 = vld [vmem:[%s5147_s28 + $0x4e8] sm:$0xff]  ;;  %v1138_v32 = vrot.slane %v1137_v62, 1  ;;  %v1194_v49 = vrot.slane %v1193_v45, 1 }
  0x6c   : > { %1062 = vmatpush.bf16.msrb.mxu3 %v4171_v63  ;;  %v1141_v3 = vrot.slane %v1140_v43, 4  ;;  %v1126_v26 = vmax.f32 %v6164_v16, %v6163_v10  ;;  %v6166_v63 = vunpack.c.h.bf16 %v5132_v12  ;;  %v4199_v12 = vld [vmem:[%s5147_s28 + $0x4a8] sm:$0xff] }
  0x6d   : > { %1024 = vmatpush.bf16.msrb.mxu0 %v4146_v53  ;;  %v1177_v53 = vmax.f32 %v1175_v11, %v1176_v1  ;;  %v1139_v59 = vmax.f32 %v1137_v62, %v1138_v32  ;;  %v1195_v47 = vmax.f32 %v1193_v45, %v1194_v49 }
  0x6e   : > { %1037 = vmatpush.bf16.msrb.mxu1 %v4154_v54  ;;  %v1182_v31 = vmax.f32 %v6166_v63, %v6165_v27  ;;  %v4183_v54 = vld [vmem:[%s5147_s28 + $0x428] sm:$0xff]  ;;  %v1142_v61 = vmax.f32 %v1140_v43, %v1141_v3  ;;  %v4206_v43 = vld [vmem:[%s5147_s28 + $0x4e0] sm:$0xff]  ;;  %v4189_v27 = vld [vmem:[%s5147_s28 + $0x458] sm:$0xff] }
  0x6f   : > { %1050 = vmatpush.bf16.msrb.mxu2 %v4162_v21  ;;  %v1127_v21 = vrot.slane %v1126_v26, 4  ;;  %v1233_v3 = vpack.c.bf16 %v1139_v59, %v1139_v59  ;;  %v1241_v4 = vpack.c.bf16 %v1195_v47, %v1195_v47 }
  0x70   : > { %1063 = vmatpush.bf16.msrb.mxu3 %v4170_v36  ;;  %1025 = vmatmul.bf16.vlgmr.msrb.gmra.mxu0 %v569_v20  ;;  %v1183_v36 = vrot.slane %v1182_v31, 4  ;;  %v1123_v20 = vmax.f32 %v1121_v34, %v1122_v23  ;;  %v4197_v34 = vld [vmem:[%s5147_s28 + $0x498] sm:$0xff] }
  0x71   : > { %1819 = vmatpush.bf16.msra.mxu0 %v4185_v25  ;;  %1038 = vmatmul.bf16.vlgmr.msrb.gmra.mxu1 %v570_v50  ;;  %v1178_v25 = vrot.slane %v1177_v53, 2  ;;  %v4182_v50 = vld [vmem:[%s5147_s28 + $0x420] sm:$0xff] }
  0x72   : > { %1832 = vmatpush.bf16.msra.mxu1 %v4193_v60  ;;  %1051 = vmatmul.bf16.vlgmr.msrb.gmra.mxu2 %v571_v28  ;;  %v1143_v60 = vrot.slane %v1142_v61, 2  ;;  %v1184_v28 = vmax.f32 %v1182_v31, %v1183_v36 }
  0x73   : > { %1845 = vmatpush.bf16.msra.mxu2 %v4201_v35  ;;  %1064 = vmatmul.bf16.vlgmr.msrb.gmra.mxu3 %v572_v33  ;;  %v1199_v35 = vrot.slane %v1198_v8, 2  ;;  %v1179_v33 = vmax.f32 %v1177_v53, %v1178_v25  ;;  %v4205_v53 = vld [vmem:[%s5147_s28 + $0x4d8] sm:$0xff]  ;;  %v6167_v25 = vunpack.c.l.bf16 %v5208_v37 }
  0x74   : > { %1858 = vmatpush.bf16.msra.mxu3 %v4209_v44  ;;  %v1128_v44 = vmax.f32 %v1126_v26, %v1127_v21  ;;  %v1144_v6 = vmax.f32 %v1142_v61, %v1143_v60  ;;  %v4181_v26 = vld [vmem:[%s5147_s28 + $0x418] sm:$0xff]  ;;  %v6168_v60 = vunpack.c.l.bf16 %v5204_v29 }
  0x75   : > { %1820 = vmatpush.bf16.msra.mxu0 %v4184_v56  ;;  %v1200_v7 = vmax.f32 %v1198_v8, %v1199_v35  ;;  %v1185_v56 = vrot.slane %v1184_v28, 2 }
  0x76   : > { %1833 = vmatpush.bf16.msra.mxu1 %v4192_v39  ;;  %v1129_v11 = vrot.slane %v1128_v44, 2  ;;  %v4198_v39 = vld [vmem:[%s5147_s28 + $0x4a0] sm:$0xff]  ;;  %v1145_v0 = vrot.slane %v1144_v6, 1  ;;  %v1161_v35 = vmax.f32 %v6168_v60, %v6167_v25 }
  0x77   : > { %1846 = vmatpush.bf16.msra.mxu2 %v4200_v18  ;;  %v1124_v18 = vrot.slane %v1123_v20, 1  ;;  %v1201_v2 = vrot.slane %v1200_v7, 1  ;;  %v1186_v1 = vmax.f32 %v1184_v28, %v1185_v56  ;;  %v4188_v28 = vld [vmem:[%s5147_s28 + $0x450] sm:$0xff]  ;;  %v6169_v56 = vunpack.c.l.bf16 %v5216_v46 }
  0x78   : > { %1859 = vmatpush.bf16.msra.mxu3 %v4208_v19  ;;  %v1180_v19 = vrot.slane %v1179_v33, 1  ;;  %v1130_v41 = vmax.f32 %v1128_v44, %v1129_v11  ;;  %v1146_v63 = vmax.f32 %v1144_v6, %v1145_v0  ;;  %v4180_v44 = vld [vmem:[%s5147_s28 + $0x410] sm:$0xff]  ;;  %v1162_v11 = vrot.slane %v1161_v35, 4 }
  0x79   : > { %1821 = vmatpush.bf16.msra.mxu0 %v4183_v54  ;;  %v1125_v10 = vmax.f32 %v1123_v20, %v1124_v18  ;;  %v1202_v31 = vmax.f32 %v1200_v7, %v1201_v2  ;;  %v1187_v24 = vrot.slane %v1186_v1, 1  ;;  %v1397_v54 = vunpack.c.l.b16 %v1233_v3 }
  0x7a   : > { %1834 = vmatpush.bf16.msra.mxu1 %v4191_v9  ;;  %v1181_v16 = vmax.f32 %v1179_v33, %v1180_v19  ;;  %v1131_v48 = vrot.slane %v1130_v41, 1  ;;  %v1405_v9 = vunpack.c.l.b16 %v1241_v4  ;;  %v1234_v21 = vpack.c.bf16 %v1146_v63, %v1146_v63 }
  0x7b   : > { %1847 = vmatpush.bf16.msra.mxu2 %v4199_v12  ;;  %v1231_v61 = vpack.c.bf16 %v1125_v10, %v1125_v10  ;;  %v1242_v36 = vpack.c.bf16 %v1202_v31, %v1202_v31  ;;  %v6171_v19 = vunpack.c.l.bf16 %v5233_v57  ;;  %v6172_v0 = vunpack.c.l.bf16 %v5224_v52  ;;  %v4179_v10 = vld [vmem:[%s5147_s28 + $0x408] sm:$0xff]  ;;  %v4178_v57 = vld [vmem:[%s5147_s28 + $0x400] sm:$0xff] }
  0x7c   : > { %1860 = vmatpush.bf16.msra.mxu3 %v4207_v13  ;;  %v1239_v8 = vpack.c.bf16 %v1181_v16, %v1181_v16  ;;  %v1132_v12 = vmax.f32 %v1130_v41, %v1131_v48  ;;  %v1188_v13 = vmax.f32 %v1186_v1, %v1187_v24  ;;  %v5412_v62 = vsel %vm556_vm0, %v1405_v9, %v1397_v54  ;;  %v4187_v16 = vld [vmem:[%s5147_s28 + $0x448] sm:$0xff] }
  0x7d   : > { %1822 = vmatpush.bf16.msra.mxu0 %v4182_v50  ;;  %v1395_v45 = vunpack.c.l.b16 %v1231_v61  ;;  %v1421_v32 = vpack.c.b16 %v5412_v62, %v5412_v62  ;;  %v1398_v49 = vunpack.c.l.b16 %v1234_v21  ;;  %v1406_v20 = vunpack.c.l.b16 %v1242_v36  ;;  %v4196_v50 = vld [vmem:[%s5147_s28 + $0x490] sm:$0xff]  ;;  %v4195_v61 = vld [vmem:[%s5147_s28 + $0x488] sm:$0xff] }
  0x7e   : > { %1835 = vmatpush.bf16.msra.mxu1 %v4190_v5  ;;  %v1403_v23 = vunpack.c.l.b16 %v1239_v8  ;;  %v1232_v33 = vpack.c.bf16 %v1132_v12, %v1132_v12  ;;  %v4204_v5 = vld [vmem:[%s5147_s28 + $0x4d0] sm:$0xff]  ;;  %v1240_v7 = vpack.c.bf16 %v1188_v13, %v1188_v13  ;;  %v1147_v2 = vmax.f32 %v6172_v0, %v6171_v19  ;;  %v4203_v8 = vld [vmem:[%s5147_s28 + $0x4c8] sm:$0xff] }
  0x7f   : > { %1848 = vmatpush.bf16.msra.mxu2 %v4198_v39  ;;  %v6170_v39 = vunpack.c.l.bf16 %v5211_v38  ;;  %v5434_v47 = vsel %vm556_vm0, %v1406_v20, %v1398_v49  ;;  %v1163_v3 = vmax.f32 %v1161_v35, %v1162_v11  ;;  %v6174_v63 = vunpack.c.l.bf16 %v5236_v58  ;;  %v4186_v35 = vld [vmem:[%s5147_s28 + $0x440] sm:$0xff]  ;;  %v4225_v11 = vld [vmem:[%s5147_s28 + $0x578] sm:$0xff] }
  0x80   : > { %1861 = vmatpush.bf16.msra.mxu3 %v4206_v43  ;;  %v5425_v6 = vsel %vm556_vm0, %v1403_v23, %v1395_v45  ;;  %v1396_v18 = vunpack.c.l.b16 %v1232_v33  ;;  %v1422_v41 = vpack.c.b16 %v5434_v47, %v5434_v47  ;;  %v1404_v1 = vunpack.c.l.b16 %v1240_v7  ;;  %v4202_v49 = vld [vmem:[%s5147_s28 + $0x4c0] sm:$0xff]  ;;  %v4217_v7 = vld [vmem:[%s5147_s28 + $0x538] sm:$0xff] }
  0x81   : > { %1823 = vmatpush.bf16.msra.mxu0 %v4181_v26  ;;  %v1217_v43 = vmax.f32 %v6170_v39, %v6169_v56  ;;  %v1419_v59 = vpack.c.b16 %v5425_v6, %v5425_v6  ;;  %v1148_v26 = vrot.slane %v1147_v2, 4  ;;  %v6175_v48 = vunpack.c.h.bf16 %v5208_v37  ;;  %v4233_v58 = vld [vmem:[%s5147_s28 + $0x5b8] sm:$0xff] }
  0x82   : > { %1836 = vmatpush.bf16.msra.mxu1 %v4189_v27  ;;  %v6173_v27 = vunpack.c.l.bf16 %v5247_v17  ;;  %v6176_v24 = vunpack.c.h.bf16 %v5204_v29  ;;  %v6178_v54 = vunpack.c.h.bf16 %v5211_v38  ;;  %v5459_v21 = vsel %vm556_vm0, %v1404_v1, %v1396_v18  ;;  %v5478_v18 = vld [vmem:[%s5096_s3 + $0x48] sm:$0xff] }
  0x83   : > { %1849 = vmatpush.bf16.msra.mxu2 %v4197_v34  ;;  %v1218_v4 = vrot.slane %v1217_v43, 4  ;;  %v1164_v36 = vrot.slane %v1163_v3, 2  ;;  %v1154_v29 = vmax.f32 %v220_v22, %v228_v30  ;;  %v1420_v37 = vpack.c.b16 %v5459_v21, %v5459_v21  ;;  %v4239_v21 = vld [vmem:[%s5147_s28 + $0x5e8] sm:$0xff] }
  0x84   : > { %1862 = vmatpush.bf16.msra.mxu3 %v4205_v53  ;;  %v1203_v31 = vmax.f32 %v6174_v63, %v6173_v27  ;;  %v1168_v34 = vmax.f32 %v6176_v24, %v6175_v48  ;;  %v6177_v53 = vunpack.c.h.bf16 %v5216_v46  ;;  %v1149_v38 = vmax.f32 %v1147_v2, %v1148_v26  ;;  %v5483_v63 = vld [vmem:[%s5096_s3 + $0x68] sm:$0xff] }
  0x85   : > { %1824 = vmatpush.bf16.msra.mxu0 %v4180_v44  ;;  %v1219_v12 = vmax.f32 %v1217_v43, %v1218_v4  ;;  %v1165_v45 = vmax.f32 %v1163_v3, %v1164_v36  ;;  %v1155_v60 = vrot.slane %v1154_v29, 4  ;;  %v1210_v44 = vmax.f32 %v236_v40, %v244_v55  ;;  %v4241_v40 = vld [vmem:[%s5147_s28 + $0x5f8] sm:$0xff]  ;;  %v4216_v48 = vld [vmem:[%s5147_s28 + $0x530] sm:$0xff] }
  0x86   : > { %1837 = vmatpush.bf16.msra.mxu1 %v4188_v28  ;;  %v1224_v9 = vmax.f32 %v6178_v54, %v6177_v53  ;;  %v1204_v46 = vrot.slane %v1203_v31, 4  ;;  %v1169_v13 = vrot.slane %v1168_v34, 4  ;;  %v1150_v52 = vrot.slane %v1149_v38, 2  ;;  %v4194_v28 = vld [vmem:[%s5147_s28 + $0x480] sm:$0xff]  ;;  %v4224_v24 = vld [vmem:[%s5147_s28 + $0x570] sm:$0xff] }
  0x87   : > { %1850 = vmatpush.bf16.msra.mxu2 %v4196_v50  ;;  %v1220_v23 = vrot.slane %v1219_v12, 2  ;;  %v1166_v20 = vrot.slane %v1165_v45, 1  ;;  %v1211_v17 = vrot.slane %v1210_v44, 4  ;;  %v1975_v47 = vmul.f32 %v5384_v14, %v5384_v14 }
  0x88   : > { %1863 = vmatpush.bf16.msra.mxu3 %v4204_v5  ;;  %v1225_v25 = vrot.slane %v1224_v9, 4  ;;  %v1205_v22 = vmax.f32 %v1203_v31, %v1204_v46  ;;  %v1170_v30 = vmax.f32 %v1168_v34, %v1169_v13  ;;  %v1156_v5 = vmax.f32 %v1154_v29, %v1155_v60  ;;  %v4223_v60 = vld [vmem:[%s5147_s28 + $0x568] sm:$0xff] }
  0x89   : > { %1825 = vmatpush.bf16.msra.mxu0 %v4179_v10  ;;  %v1221_v33 = vmax.f32 %v1219_v12, %v1220_v23  ;;  %v1151_v56 = vmax.f32 %v1149_v38, %v1150_v52  ;;  %v1167_v55 = vmax.f32 %v1165_v45, %v1166_v20  ;;  %v1212_v10 = vmax.f32 %v1210_v44, %v1211_v17 }
  0x8a   : > { %1838 = vmatpush.bf16.msra.mxu1 %v4187_v16  ;;  %v1226_v50 = vmax.f32 %v1224_v9, %v1225_v25  ;;  %v1206_v39 = vrot.slane %v1205_v22, 2  ;;  %v1171_v43 = vrot.slane %v1170_v30, 2  ;;  %v1157_v2 = vrot.slane %v1156_v5, 2 }
  0x8b   : > { %1851 = vmatpush.bf16.msra.mxu2 %v4195_v61  ;;  %v1222_v19 = vrot.slane %v1221_v33, 1  ;;  %v1152_v1 = vrot.slane %v1151_v56, 1  ;;  %v1237_v26 = vpack.c.bf16 %v1167_v55, %v1167_v55  ;;  %v5486_v31 = vunpack.c.l.bf16 %v5478_v18  ;;  %v4232_v61 = vld [vmem:[%s5147_s28 + $0x5b0] sm:$0xff] }
  0x8c   : > { %1864 = vmatpush.bf16.msra.mxu3 %v4203_v8  ;;  %v1227_v0 = vrot.slane %v1226_v50, 2  ;;  %v1207_v3 = vmax.f32 %v1205_v22, %v1206_v39  ;;  %v1172_v4 = vmax.f32 %v1170_v30, %v1171_v43  ;;  %v1158_v9 = vmax.f32 %v1156_v5, %v1157_v2  ;;  %v4240_v8 = vld [vmem:[%s5147_s28 + $0x5f0] sm:$0xff]  ;;  %v4214_v5 = vld [vmem:[%s5147_s28 + $0x520] sm:$0xff] }
  0x8d   : > { %1826 = vmatpush.bf16.msra.mxu0 %v4178_v57  ;;  %v1223_v16 = vmax.f32 %v1221_v33, %v1222_v19  ;;  %v1153_v34 = vmax.f32 %v1151_v56, %v1152_v1  ;;  %v1401_v12 = vunpack.c.l.b16 %v1237_v26  ;;  %v1213_v38 = vrot.slane %v1212_v10, 2  ;;  %v4238_v43 = vld [vmem:[%s5147_s28 + $0x5e0] sm:$0xff]  ;;  %v4221_v26 = vld [vmem:[%s5147_s28 + $0x558] sm:$0xff] }
  0x8e   : > { %1839 = vmatpush.bf16.msra.mxu1 %v4186_v35  ;;  %v1228_v27 = vmax.f32 %v1226_v50, %v1227_v0  ;;  %v1208_v53 = vrot.slane %v1207_v3, 1  ;;  %v1173_v54 = vrot.slane %v1172_v4, 1  ;;  %v1159_v45 = vrot.slane %v1158_v9, 1  ;;  %v5531_v19 = vld [vmem:[%s5096_s3] sm:$0xff] }
  0x8f   : > { %1852 = vmatpush.bf16.msra.mxu2 %v4194_v28  ;;  %v1245_v36 = vpack.c.bf16 %v1223_v16, %v1223_v16  ;;  %v1967_v23 = vunpack.c.l.bf16 %v5483_v63  ;;  %v1214_v6 = vmax.f32 %v1212_v10, %v1213_v38  ;;  %v1983_v30 = vmul.f32 %v5387_v15, %v5387_v15  ;;  %v5537_v1 = vld [vmem:[%s5096_s3 + $0x20] sm:$0xff]  ;;  %v4213_v16 = vld [vmem:[%s5147_s28 + $0x518] sm:$0xff] }
  0x90   : > { %1865 = vmatpush.bf16.msra.mxu3 %v4202_v49  ;;  %v1229_v29 = vrot.slane %v1228_v27, 1  ;;  %1827 = vmatmul.bf16.vlgmr.msra.gmra.mxu0 %v1419_v59  ;;  %v1209_v46 = vmax.f32 %v1207_v3, %v1208_v53  ;;  %v1174_v13 = vmax.f32 %v1172_v4, %v1173_v54  ;;  %v4215_v59 = vld [vmem:[%s5147_s28 + $0x528] sm:$0xff]  ;;  %v1160_v52 = vmax.f32 %v1158_v9, %v1159_v45  ;;  %v4229_v53 = vld [vmem:[%s5147_s28 + $0x598] sm:$0xff] }
  0x91   : > { %1871 = vmatpush.bf16.msrb.mxu0 %v4217_v7  ;;  %1840 = vmatmul.bf16.vlgmr.msra.gmra.mxu1 %v1420_v37  ;;  %v1409_v62 = vunpack.c.l.b16 %v1245_v36  ;;  %v1215_v22 = vrot.slane %v1214_v6, 1  ;;  %v1944_v28 = vunpack.c.h.bf16 %v5360_v42  ;;  %v1991_v33 = vmul.f32 %v5486_v31, %v5486_v31  ;;  %v4222_v7 = vld [vmem:[%s5147_s28 + $0x560] sm:$0xff]  ;;  %v4237_v54 = vld [vmem:[%s5147_s28 + $0x5d8] sm:$0xff] }
  0x92   : > { %1884 = vmatpush.bf16.msrb.mxu1 %v4225_v11  ;;  %1853 = vmatmul.bf16.vlgmr.msra.gmra.mxu2 %v1421_v32  ;;  %v1235_v32 = vpack.c.bf16 %v1153_v34, %v1153_v34  ;;  %v1230_v25 = vmax.f32 %v1228_v27, %v1229_v29  ;;  %v1243_v57 = vpack.c.bf16 %v1209_v46, %v1209_v46  ;;  %v4230_v42 = vld [vmem:[%s5147_s28 + $0x5a0] sm:$0xff]  ;;  %v1952_v55 = vunpack.c.h.bf16 %v5363_v51 }
  0x93   : > { %1897 = vmatpush.bf16.msrb.mxu2 %v4233_v58  ;;  %1866 = vmatmul.bf16.vlgmr.msra.gmra.mxu3 %v1422_v41  ;;  %v1238_v35 = vpack.c.bf16 %v1174_v13, %v1174_v13  ;;  %v4231_v41 = vld [vmem:[%s5147_s28 + $0x5a8] sm:$0xff]  ;;  %v5512_v37 = vsel %vm556_vm0, %v1409_v62, %v1401_v12  ;;  %v1999_v50 = vmul.f32 %v1967_v23, %v1967_v23  ;;  %v1960_v4 = vunpack.c.h.bf16 %v5478_v18  ;;  %v4212_v62 = vld [vmem:[%s5147_s28 + $0x510] sm:$0xff] }
  0x94   : > { %1910 = vmatpush.bf16.msrb.mxu3 %v4241_v40  ;;  %v1246_v44 = vpack.c.bf16 %v1230_v25, %v1230_v25  ;;  %v1399_v49 = vunpack.c.l.b16 %v1235_v32  ;;  %v1407_v20 = vunpack.c.l.b16 %v1243_v57  ;;  %v1425_v11 = vpack.c.b16 %v5512_v37, %v5512_v37  ;;  %v4220_v32 = vld [vmem:[%s5147_s28 + $0x550] sm:$0xff]  ;;  %v4263_v37 = vld [vmem:[%s5147_s28 + $0x8a8] sm:$0xff] }
  0x95   : > { %1872 = vmatpush.bf16.msrb.mxu0 %v4216_v48  ;;  %v2007_v56 = vmul.f32 %v1975_v47, %v5384_v14  ;;  %v2015_v39 = vmul.f32 %v1983_v30, %v5387_v15  ;;  %v5527_v17 = vunpack.c.l.b16 %v1238_v35  ;;  %v1216_v58 = vmax.f32 %v1214_v6, %v1215_v22  ;;  %v4228_v57 = vld [vmem:[%s5147_s28 + $0x590] sm:$0xff] }
  0x96   : > { %1885 = vmatpush.bf16.msrb.mxu1 %v4224_v24  ;;  %v1236_v40 = vpack.c.bf16 %v1160_v52, %v1160_v52  ;;  %v5533_v0 = vunpack.c.l.b16 %v1246_v44  ;;  %v2023_v14 = vmul.f32 %v1991_v33, %v5486_v31  ;;  %v2031_v15 = vmul.f32 %v1999_v50, %v1967_v23  ;;  %v5547_v24 = vld [vmem:[%s5096_s3 + $0x40] sm:$0xff]  ;;  %v4236_v35 = vld [vmem:[%s5147_s28 + $0x5d0] sm:$0xff] }
  0x97   : > { %1898 = vmatpush.bf16.msrb.mxu2 %v4232_v61  ;;  %v2051_v2 = vadd.f32 %v2015_v39, %v2007_v56  ;;  %v5540_v3 = vsel %vm556_vm0, %v1407_v20, %v1399_v49  ;;  %v1968_v51 = vunpack.c.h.bf16 %v5483_v63  ;;  %v1976_v10 = vmul.f32 %v1944_v28, %v1944_v28  ;;  %v5553_v61 = vld [vmem:[%s5096_s3 + $0x60] sm:$0xff] }
  0x98   : > { %1911 = vmatpush.bf16.msrb.mxu3 %v4240_v8  ;;  %v2107_v31 = vadd.f32 %v2031_v15, %v2023_v14  ;;  %v1984_v48 = vmul.f32 %v1952_v55, %v1952_v55  ;;  %v1941_v34 = vunpack.c.l.bf16 %v5531_v19  ;;  %v1244_v18 = vpack.c.bf16 %v1216_v58, %v1216_v58  ;;  %v4227_v58 = vld [vmem:[%s5147_s28 + $0x588] sm:$0xff] }
  0x99   : > { %1873 = vmatpush.bf16.msrb.mxu0 %v4215_v59  ;;  %v2052_v27 = vrot.slane %v2051_v2, 4  ;;  %v1992_v63 = vmul.f32 %v1960_v4, %v1960_v4  ;;  %v2000_v9 = vmul.f32 %v1968_v51, %v1968_v51  ;;  %v1949_v8 = vunpack.c.l.bf16 %v5537_v1 }
  0x9a   : > { %1886 = vmatpush.bf16.msrb.mxu1 %v4223_v60  ;;  %v1400_v36 = vunpack.c.l.b16 %v1236_v40  ;;  %v2108_v29 = vrot.slane %v2107_v31, 4  ;;  %v2008_v38 = vmul.f32 %v1976_v10, %v1944_v28  ;;  %v2016_v46 = vmul.f32 %v1984_v48, %v1952_v55  ;;  %v4235_v40 = vld [vmem:[%s5147_s28 + $0x5c8] sm:$0xff]  ;;  %v4210_v48 = vld [vmem:[%s5147_s28 + $0x500] sm:$0xff] }
  0x9b   : > { %1899 = vmatpush.bf16.msrb.mxu2 %v4231_v41  ;;  %v2053_v12 = vadd.f32 %v2052_v27, %v2051_v2  ;;  %v2024_v13 = vmul.f32 %v1992_v63, %v1960_v4  ;;  %v2032_v45 = vmul.f32 %v2000_v9, %v1968_v51  ;;  %v1957_v23 = vunpack.c.l.bf16 %v5547_v24  ;;  %v4226_v9 = vld [vmem:[%s5147_s28 + $0x580] sm:$0xff] }
  0x9c   : > { %1912 = vmatpush.bf16.msrb.mxu3 %v4239_v21  ;;  %v2109_v6 = vadd.f32 %v2108_v29, %v2107_v31  ;;  %v1965_v59 = vunpack.c.l.bf16 %v5553_v61  ;;  %v1973_v60 = vmul.f32 %v1941_v34, %v1941_v34  ;;  %v1408_v47 = vunpack.c.l.b16 %v1244_v18  ;;  %v4249_v29 = vld [vmem:[%s5147_s28 + $0x838] sm:$0xff] }
  0x9d   : > { %1874 = vmatpush.bf16.msrb.mxu0 %v4214_v5  ;;  %v2054_v25 = vrot.slane %v2053_v12, 2  ;;  %v2058_v41 = vadd.f32 %v2016_v46, %v2008_v38  ;;  %v2114_v21 = vadd.f32 %v2032_v45, %v2024_v13  ;;  %v1981_v52 = vmul.f32 %v1949_v8, %v1949_v8  ;;  %v4211_v5 = vld [vmem:[%s5147_s28 + $0x508] sm:$0xff]  ;;  %v4257_v38 = vld [vmem:[%s5147_s28 + $0x878] sm:$0xff] }
  0x9e   : > { %1887 = vmatpush.bf16.msrb.mxu1 %v4222_v7  ;;  %v2110_v30 = vrot.slane %v2109_v6, 2  ;;  %v1989_v44 = vmul.f32 %v1957_v23, %v1957_v23  ;;  %v1997_v28 = vmul.f32 %v1965_v59, %v1965_v59  ;;  %v2005_v33 = vmul.f32 %v1973_v60, %v1941_v34  ;;  %v4219_v7 = vld [vmem:[%s5147_s28 + $0x548] sm:$0xff]  ;;  %v4218_v34 = vld [vmem:[%s5147_s28 + $0x540] sm:$0xff] }
  0x9f   : > { %1900 = vmatpush.bf16.msrb.mxu2 %v4230_v42  ;;  %v2055_v22 = vadd.f32 %v2054_v25, %v2053_v12  ;;  %v2059_v49 = vrot.slane %v2058_v41, 4  ;;  %v2115_v20 = vrot.slane %v2114_v21, 4  ;;  %v2013_v50 = vmul.f32 %v1981_v52, %v1949_v8  ;;  %v4248_v52 = vld [vmem:[%s5147_s28 + $0x830] sm:$0xff] }
  0xa0   : > { %1913 = vmatpush.bf16.msrb.mxu3 %v4238_v43  ;;  %v2111_v39 = vadd.f32 %v2110_v30, %v2109_v6  ;;  %v2021_v42 = vmul.f32 %v1989_v44, %v1957_v23  ;;  %v2029_v43 = vmul.f32 %v1997_v28, %v1965_v59  ;;  %v1423_v2 = vpack.c.b16 %v5540_v3, %v5540_v3  ;;  %v4265_v23 = vld [vmem:[%s5147_s28 + $0x8b8] sm:$0xff] }
  0xa1   : > { %1875 = vmatpush.bf16.msrb.mxu0 %v4213_v16  ;;  %v2056_v56 = vrot.slane %v2055_v22, 1  ;;  %v2060_v55 = vadd.f32 %v2059_v49, %v2058_v41  ;;  %v2116_v14 = vadd.f32 %v2115_v20, %v2114_v21  ;;  %v2037_v15 = vadd.f32 %v2013_v50, %v2005_v33  ;;  %v4264_v49 = vld [vmem:[%s5147_s28 + $0x8b0] sm:$0xff] }
  0xa2   : > { %1888 = vmatpush.bf16.msrb.mxu1 %v4221_v26  ;;  %v2112_v51 = vrot.slane %v2111_v39, 1  ;;  %v2093_v10 = vadd.f32 %v2029_v43, %v2021_v42  ;;  %v1418_v16 = vsel %vm556_vm0, %v5533_v0, %v5527_v17  ;;  %v4234_v17 = vld [vmem:[%s5147_s28 + $0x5c0] sm:$0xff]  ;;  %v1950_v59 = vunpack.c.h.bf16 %v5537_v1  ;;  %v4272_v20 = vld [vmem:[%s5147_s28 + $0x8f0] sm:$0xff] }
  0xa3   : > { %1901 = vmatpush.bf16.msrb.mxu2 %v4229_v53  ;;  %v2057_v4 = vadd.f32 %v2056_v56, %v2055_v22  ;;  %v2061_v26 = vrot.slane %v2060_v55, 2  ;;  %v2117_v27 = vrot.slane %v2116_v14, 2  ;;  %v2038_v31 = vrot.slane %v2037_v15, 4  ;;  %v4256_v22 = vld [vmem:[%s5147_s28 + $0x870] sm:$0xff]  ;;  %v4247_v56 = vld [vmem:[%s5147_s28 + $0x828] sm:$0xff] }
  0xa4   : > { %1914 = vmatpush.bf16.msrb.mxu3 %v4237_v54  ;;  %v1416_v53 = vsel %vm556_vm0, %v1408_v47, %v1400_v36  ;;  %v2113_v54 = vadd.f32 %v2112_v51, %v2111_v39  ;;  %v2094_v63 = vrot.slane %v2093_v10, 4  ;;  %v1942_v36 = vunpack.c.h.bf16 %v5531_v19  ;;  %v4255_v39 = vld [vmem:[%s5147_s28 + $0x868] sm:$0xff] }
  0xa5   : > { %1876 = vmatpush.bf16.msrb.mxu0 %v4212_v62  ;;  %v2151_v18 = vmul.f32 0.0625, %v2057_v4  ;;  %v2062_v0 = vadd.f32 %v2061_v26, %v2060_v55  ;;  %v2118_v8 = vadd.f32 %v2117_v27, %v2116_v14  ;;  %v2039_v12 = vadd.f32 %v2038_v31, %v2037_v15  ;;  %v4273_v62 = vld [vmem:[%s5147_s28 + $0x8f8] sm:$0xff]  ;;  %v4246_v26 = vld [vmem:[%s5147_s28 + $0x820] sm:$0xff] }
  0xa6   : > { %1889 = vmatpush.bf16.msrb.mxu1 %v4220_v32  ;;  %v2159_v46 = vmul.f32 0.0625, %v2113_v54  ;;  %v2095_v45 = vadd.f32 %v2094_v63, %v2093_v10  ;;  %v1426_v60 = vpack.c.b16 %v1418_v16, %v1418_v16  ;;  %v1424_v19 = vpack.c.b16 %v1416_v53, %v1416_v53  ;;  %v4254_v27 = vld [vmem:[%s5147_s28 + $0x860] sm:$0xff] }
  0xa7   : > { %1902 = vmatpush.bf16.msrb.mxu2 %v4228_v57  ;;  %v5578_v13 = vmax.f32 %v2151_v18, 1e-30  ;;  %v2063_v32 = vrot.slane %v2062_v0, 1  ;;  %v2119_v25 = vrot.slane %v2118_v8, 1  ;;  %v2040_v6 = vrot.slane %v2039_v12, 2  ;;  %v4262_v53 = vld [vmem:[%s5147_s28 + $0x8a0] sm:$0xff] }
  0xa8   : > { %1915 = vmatpush.bf16.msrb.mxu3 %v4236_v35  ;;  %v5584_v57 = vmax.f32 %v2159_v46, 1e-30  ;;  %v2096_v47 = vrot.slane %v2095_v45, 2  ;;  %v1958_v21 = vunpack.c.h.bf16 %v5547_v24  ;;  %v1966_v1 = vunpack.c.h.bf16 %v5553_v61  ;;  %v4270_v54 = vld [vmem:[%s5147_s28 + $0x8e0] sm:$0xff] }
  0xa9   : > { %1877 = vmatpush.bf16.msrb.mxu0 %v4211_v5  ;;  %v5587_v35 = vand.u32 2147483647, %v5578_v13  ;;  %v2064_v41 = vadd.f32 %v2063_v32, %v2062_v0  ;;  %v2120_v44 = vadd.f32 %v2119_v25, %v2118_v8  ;;  %v1974_v28 = vmul.f32 %v1942_v36, %v1942_v36  ;;  %v4253_v0 = vld [vmem:[%s5147_s28 + $0x858] sm:$0xff] }
  0xaa   : > { %1890 = vmatpush.bf16.msrb.mxu1 %v4219_v7  ;;  %v5595_v30 = vand.u32 2147483647, %v5584_v57  ;;  %v2041_v33 = vadd.f32 %v2040_v6, %v2039_v12  ;;  %v2097_v61 = vadd.f32 %v2096_v47, %v2095_v45  ;;  %v1982_v50 = vmul.f32 %v1950_v59, %v1950_v59  ;;  %v4252_v47 = vld [vmem:[%s5147_s28 + $0x850] sm:$0xff] }
  0xab   : > { %1903 = vmatpush.bf16.msrb.mxu2 %v4227_v58  ;;  %4769 = vlog2.f32 %v5587_v35  ;;  %v2152_v24 = vmul.f32 0.0625, %v2064_v41  ;;  %v1990_v5 = vmul.f32 %v1958_v21, %v1958_v21  ;;  %v1998_v7 = vmul.f32 %v1966_v1, %v1966_v1 }
  0xac   : > { %1916 = vmatpush.bf16.msrb.mxu3 %v4235_v40  ;;  %4771 = vlog2.f32 %v5595_v30  ;;  %v2160_v42 = vmul.f32 0.0625, %v2120_v44  ;;  %v2042_v3 = vrot.slane %v2041_v33, 1  ;;  %v2098_v58 = vrot.slane %v2097_v61, 1 }
  0xad   : > { %1878 = vmatpush.bf16.msrb.mxu0 %v4210_v48  ;;  %v5608_v43 = vmax.f32 %v2152_v24, 1e-30  ;;  %v2006_v40 = vmul.f32 %v1974_v28, %v1942_v36  ;;  %v2014_v55 = vmul.f32 %v1982_v50, %v1950_v59  ;;  %v2022_v51 = vmul.f32 %v1990_v5, %v1958_v21 }
  0xae   : > { %1891 = vmatpush.bf16.msrb.mxu1 %v4218_v34  ;;  %v5612_v15 = vmax.f32 %v2160_v42, 1e-30  ;;  %v2030_v10 = vmul.f32 %v1998_v7, %v1966_v1  ;;  %v2043_v48 = vadd.f32 %v2042_v3, %v2041_v33  ;;  %v2099_v34 = vadd.f32 %v2098_v58, %v2097_v61  ;;  %v4260_v1 = vld [vmem:[%s5147_s28 + $0x890] sm:$0xff]  ;;  %v4243_v33 = vld [vmem:[%s5147_s28 + $0x808] sm:$0xff] }
  0xaf   : > { %1904 = vmatpush.bf16.msrb.mxu2 %v4226_v9  ;;  %v2044_v63 = vadd.f32 %v2014_v55, %v2006_v40  ;;  %v4251_v61 = vld [vmem:[%s5147_s28 + $0x848] sm:$0xff]  ;;  %v5658_v7 = vld [vmem:[%s5096_s3 + $0x10] sm:$0xff]  ;;  %vm4370_vm1 = vweird.f32 %v5587_v35  ;;  %v4373_v42 = vand.u32 2147483648, %v5578_v13  ;;  %vm4372_vm2 = vcmp.eq.f32.partialorder %v5587_v35, 0.0 }
  0xb0   : > { %1917 = vmatpush.bf16.msrb.mxu3 %v4234_v17  ;;  %1879 = vmatmul.bf16.vlgmr.msrb.gmra.mxu0 %v1423_v2  ;;  %v5615_v2 = vand.u32 2147483647, %v5608_v43  ;;  %v5621_v31 = vand.u32 2147483647, %v5612_v15  ;;  %v2100_v9 = vadd.f32 %v2030_v10, %v2022_v51  ;;  %v4245_v17 = vld [vmem:[%s5147_s28 + $0x818] sm:$0xff]  ;;  %v2149_v8 = vmul.f32 0.0625, %v2043_v48 }
  0xb1   : > { %2785 = vmatpush.bf16.msra.mxu0 %v4249_v29  ;;  %1892 = vmatmul.bf16.vlgmr.msrb.gmra.mxu1 %v1424_v19  ;;  %v4770_v14 = vpop.eup %4769  ;;  %v2157_v12 = vmul.f32 0.0625, %v2099_v34  ;;  %v4261_v29 = vld [vmem:[%s5147_s28 + $0x898] sm:$0xff]  ;;  %v2045_v46 = vrot.slane %v2044_v63, 4  ;;  %v4397_v40 = vand.u32 2147483648, %v5608_v43  ;;  %vm4355_vm3 = vcmp.lt.f32.partialorder %v5578_v13, 0.0  ;;  %v4250_v48 = vld [vmem:[%s5147_s28 + $0x840] sm:$0xff] }
  0xb2   : > { %2798 = vmatpush.bf16.msra.mxu1 %v4257_v38  ;;  %1905 = vmatmul.bf16.vlgmr.msrb.gmra.mxu2 %v1425_v11  ;;  %v4271_v11 = vld [vmem:[%s5147_s28 + $0x8e8] sm:$0xff]  ;;  %v4360_v4 = vmul.f32 -0.33333334, %v4770_v14  ;;  %v4772_v16 = vpop.eup %4771  ;;  %4773 = vlog2.f32 %v5615_v2  ;;  %v4269_v38 = vld [vmem:[%s5147_s28 + $0x8d8] sm:$0xff]  ;;  %v5630_v36 = vmax.f32 %v2149_v8, 1e-30  ;;  %vm4562_vm4 = vweird.f32 %v5595_v30 }
  0xb3   : > { %2811 = vmatpush.bf16.msra.mxu2 %v4265_v23  ;;  %1918 = vmatmul.bf16.vlgmr.msrb.gmra.mxu3 %v1426_v60  ;;  %v4552_v18 = vmul.f32 -0.33333334, %v4772_v16  ;;  %v5632_v23 = vmax.f32 %v2157_v12, 1e-30  ;;  %v2046_v25 = vadd.f32 %v2045_v46, %v2044_v63  ;;  %v2101_v6 = vrot.slane %v2100_v9, 4  ;;  %v4244_v60 = vld [vmem:[%s5147_s28 + $0x810] sm:$0xff] }
  0xb4   : > { %2824 = vmatpush.bf16.msra.mxu3 %v4273_v62  ;;  %4775 = vpow2.f32 %v4360_v4  ;;  %v5641_v41 = vand.u32 2147483647, %v5630_v36  ;;  %v5673_v55 = vld [vmem:[%s5096_s3 + $0x50] sm:$0xff]  ;;  %v4589_v4 = vand.u32 2147483648, %v5612_v15  ;;  %v5681_v16 = vunpack.c.l.bf16 %v5658_v7 }
  0xb5   : > { %2786 = vmatpush.bf16.msra.mxu0 %v4248_v52  ;;  %4777 = vlog2.f32 %v5621_v31  ;;  %v4268_v52 = vld [vmem:[%s5147_s28 + $0x8d0] sm:$0xff]  ;;  %v5648_v44 = vand.u32 2147483647, %v5632_v23  ;;  %v2102_v24 = vadd.f32 %v2101_v6, %v2100_v9  ;;  %vm4354_vm5 = vcmp.eq.f32.partialorder %v5578_v13, 0.0  ;;  %v4281_v46 = vld [vmem:[%s5147_s28 + $0x938] sm:$0xff] }
  0xb6   : > { %2799 = vmatpush.bf16.msra.mxu1 %v4256_v22  ;;  %4779 = vpow2.f32 %v4552_v18  ;;  %vm4564_vm6 = vcmp.eq.f32.partialorder %v5595_v30, 0.0  ;;  %v5691_v18 = vld [vmem:[%s5096_s3 + $0x70] sm:$0xff]  ;;  %vm4357_vm7 = vcmp.eq.f32.partialorder %v5587_v35, inf  ;;  %vm4547_vm8 = vcmp.lt.f32.partialorder %v5584_v57, 0.0 }
  0xb7   : > { %2812 = vmatpush.bf16.msra.mxu2 %v4264_v49  ;;  %v2103_v10 = vrot.slane %v2102_v24, 2  ;;  %vm4546_vm9 = vcmp.eq.f32.partialorder %v5584_v57, 0.0  ;;  %vm4549_vm10 = vcmp.eq.f32.partialorder %v5595_v30, inf  ;;  %vm4394_vm11 = vweird.f32 %v5615_v2 }
  0xb8   : > { %2825 = vmatpush.bf16.msra.mxu3 %v4272_v20  ;;  %v4774_v45 = vpop.eup %4773  ;;  %v2047_v20 = vrot.slane %v2046_v25, 2  ;;  %vm4396_vm12 = vcmp.eq.f32.partialorder %v5615_v2, 0.0  ;;  %vm4379_vm13 = vcmp.lt.f32.partialorder %v5608_v43, 0.0  ;;  %vm4586_vm15 = vweird.f32 %v5621_v31 }
  0xb9   : > { %2787 = vmatpush.bf16.msra.mxu0 %v4247_v56  ;;  %v4384_v32 = vmul.f32 -0.33333334, %v4774_v45  ;;  %v4259_v56 = vld [vmem:[%s5147_s28 + $0x888] sm:$0xff]  ;;  %v4289_v45 = vld [vmem:[%s5147_s28 + $0x978] sm:$0xff]  ;;  %vm4588_vm14 = vcmp.eq.f32.partialorder %v5621_v31, 0.0 }
  0xba   : > { %2800 = vmatpush.bf16.msra.mxu1 %v4255_v39  ;;  %v5634_v62 = vpop.eup %4775  ;;  %v4267_v39 = vld [vmem:[%s5147_s28 + $0x8c8] sm:$0xff]  ;;  %v2048_v51 = vadd.f32 %v2047_v20, %v2046_v25 }
  0xbb   : > { %2813 = vmatpush.bf16.msra.mxu2 %v4263_v37  ;;  %v4778_v59 = vpop.eup %4777  ;;  %v4362_v19 = vmul.f32 %v5634_v62, %v5634_v62  ;;  %4781 = vpow2.f32 %v4384_v32  ;;  %v4565_v37 = vand.u32 2147483648, %v5584_v57 }
  0xbc   : > { %2826 = vmatpush.bf16.msra.mxu3 %v4271_v11  ;;  %v5643_v21 = vpop.eup %4779  ;;  %v4576_v22 = vmul.f32 -0.33333334, %v4778_v59  ;;  %4783 = vlog2.f32 %v5641_v41  ;;  %v5667_v11 = vld [vmem:[%s5096_s3 + $0x30] sm:$0xff]  ;;  %v2049_v12 = vrot.slane %v2048_v51, 1 }
  0xbd   : > { %2788 = vmatpush.bf16.msra.mxu0 %v4246_v26  ;;  %v4363_v28 = vmul.f32 %v4362_v19, %v5587_v35  ;;  %v4554_v49 = vmul.f32 %v5643_v21, %v5643_v21  ;;  %v5694_v63 = vunpack.c.l.bf16 %v5667_v11 }
  0xbe   : > { %2801 = vmatpush.bf16.msra.mxu1 %v4254_v27  ;;  %4785 = vpow2.f32 %v4576_v22  ;;  %v4242_v27 = vld [vmem:[%s5147_s28 + $0x800] sm:$0xff]  ;;  %v5716_v22 = vunpack.c.l.bf16 %v5691_v18 }
  0xbf   : > { %2814 = vmatpush.bf16.msra.mxu2 %v4262_v53  ;;  %v4364_v50 = vmul.f32 %v4363_v28, %v4362_v19  ;;  %v4555_v5 = vmul.f32 %v4554_v49, %v5595_v30  ;;  %4787 = vlog2.f32 %v5648_v44  ;;  %v4305_v19 = vld [vmem:[%s5147_s28 + $0x9f8] sm:$0xff] }
  0xc0   : > { %2827 = vmatpush.bf16.msra.mxu3 %v4270_v54 }
  0xc1   : > { %2789 = vmatpush.bf16.msra.mxu0 %v4245_v17  ;;  %v4365_v3 = vsub.f32 %v4364_v50, %v5634_v62  ;;  %v4556_v58 = vmul.f32 %v4555_v5, %v4554_v49  ;;  %v5675_v14 = vpop.eup %4781  ;;  %v4258_v17 = vld [vmem:[%s5147_s28 + $0x880] sm:$0xff]  ;;  %v5726_v50 = vmul.f32 %v5694_v63, %v5694_v63  ;;  %v4288_v5 = vld [vmem:[%s5147_s28 + $0x970] sm:$0xff] }
  0xc2   : > { %2802 = vmatpush.bf16.msra.mxu1 %v4253_v0  ;;  %v4784_v26 = vpop.eup %4783  ;;  %v4386_v54 = vmul.f32 %v5675_v14, %v5675_v14  ;;  %v4266_v0 = vld [vmem:[%s5147_s28 + $0x8c0] sm:$0xff] }
  0xc3   : > { %2815 = vmatpush.bf16.msra.mxu2 %v4261_v29  ;;  %v4366_v34 = vmul.f32 -0.33333334, %v4365_v3  ;;  %v4557_v53 = vsub.f32 %v4556_v58, %v5643_v21  ;;  %v4312_v8 = vmul.f32 -0.33333334, %v4784_v26  ;;  %v2104_v29 = vadd.f32 %v2103_v10, %v2102_v24  ;;  %v4296_v58 = vld [vmem:[%s5147_s28 + $0x9b0] sm:$0xff] }
  0xc4   : > { %2828 = vmatpush.bf16.msra.mxu3 %v4269_v38  ;;  %v5696_v9 = vpop.eup %4785  ;;  %v5703_v38 = vunpack.c.l.bf16 %v5673_v55  ;;  %v4387_v6 = vmul.f32 %v4386_v54, %v5615_v2  ;;  %v4325_v26 = vand.u32 2147483648, %v5630_v36 }
  0xc5   : > { %2790 = vmatpush.bf16.msra.mxu0 %v4244_v60  ;;  %v4367_v32 = vadd.f32 %v5634_v62, %v4366_v34  ;;  %v4558_v25 = vmul.f32 -0.33333334, %v4557_v53  ;;  %v4578_v59 = vmul.f32 %v5696_v9, %v5696_v9  ;;  %v4788_v60 = vpop.eup %4787  ;;  %4789 = vpow2.f32 %v4312_v8 }
  0xc6   : > { %2803 = vmatpush.bf16.msra.mxu1 %v4252_v47  ;;  %v4297_v47 = vld [vmem:[%s5147_s28 + $0x9b8] sm:$0xff]  ;;  %v4388_v49 = vmul.f32 %v4387_v6, %v4386_v54  ;;  %v4504_v20 = vmul.f32 -0.33333334, %v4788_v60  ;;  %v4287_v6 = vld [vmem:[%s5147_s28 + $0x968] sm:$0xff] }
  0xc7   : > { %2816 = vmatpush.bf16.msra.mxu2 %v4260_v1  ;;  %v2050_v1 = vadd.f32 %v2049_v12, %v2048_v51  ;;  %v4368_v62 = vmul.f32 %v4367_v32, %v5578_v13  ;;  %v4559_v28 = vadd.f32 %v5643_v21, %v4558_v25  ;;  %v4579_v24 = vmul.f32 %v4578_v59, %v5621_v31  ;;  %v4280_v21 = vld [vmem:[%s5147_s28 + $0x930] sm:$0xff]  ;;  %v4279_v25 = vld [vmem:[%s5147_s28 + $0x928] sm:$0xff] }
  0xc8   : > { %2829 = vmatpush.bf16.msra.mxu3 %v4268_v52  ;;  %v2105_v52 = vrot.slane %v2104_v29, 1  ;;  %v4389_v3 = vsub.f32 %v4388_v49, %v5675_v14  ;;  %4791 = vpow2.f32 %v4504_v20  ;;  %v4304_v51 = vld [vmem:[%s5147_s28 + $0x9f0] sm:$0xff] }
  0xc9   : > { %2791 = vmatpush.bf16.msra.mxu0 %v4243_v33  ;;  %v2150_v33 = vmul.f32 0.0625, %v2050_v1  ;;  %v4580_v10 = vmul.f32 %v4579_v24, %v4578_v59 }
  0xca   : > { %2804 = vmatpush.bf16.msra.mxu1 %v4251_v61  ;;  %v1977_v61 = vmul.f32 %v5681_v16, %v5681_v16  ;;  %v4390_v54 = vmul.f32 -0.33333334, %v4389_v3 }
  0xcb   : > { %2817 = vmatpush.bf16.msra.mxu2 %v4259_v56  ;;  %v4369_v56 = vmul.f32 %v4368_v62, %v4367_v32  ;;  %v4581_v12 = vsub.f32 %v4580_v10, %v5696_v9 }
  0xcc   : > { %2830 = vmatpush.bf16.msra.mxu3 %v4267_v39  ;;  %v4560_v39 = vmul.f32 %v4559_v28, %v5584_v57  ;;  %v4391_v32 = vadd.f32 %v5675_v14, %v4390_v54 }
  0xcd   : > { %2792 = vmatpush.bf16.msra.mxu0 %v4242_v27  ;;  %v2106_v27 = vadd.f32 %v2105_v52, %v2104_v29  ;;  %v4371_v34 = vsel %vm4370_vm1, %v5578_v13, %v4369_v56  ;;  %vm4381_vm1 = vcmp.eq.f32.partialorder %v5615_v2, inf  ;;  %v5759_v29 = vmax.f32 %v2150_v33, 1e-30 }
  0xce   : > { %2805 = vmatpush.bf16.msra.mxu1 %v4250_v48  ;;  %v5739_v48 = vmul.f32 %v5703_v38, %v5703_v38  ;;  %v4561_v53 = vmul.f32 %v4560_v39, %v4559_v28  ;;  %v4374_v8 = vsel %vm4372_vm2, %v4373_v42, %v4371_v34  ;;  %vm4571_vm2 = vcmp.lt.f32.partialorder %v5612_v15, 0.0 }
  0xcf   : > { %2818 = vmatpush.bf16.msra.mxu2 %v4258_v17  ;;  %v5748_v17 = vmul.f32 %v5716_v22, %v5716_v22  ;;  %v4582_v14 = vmul.f32 -0.33333334, %v4581_v12  ;;  %v2158_v1 = vmul.f32 0.0625, %v2106_v27  ;;  %v4392_v13 = vmul.f32 %v4391_v32, %v5608_v43 }
  0xd0   : > { %2831 = vmatpush.bf16.msra.mxu3 %v4266_v0  ;;  %v5750_v0 = vpop.eup %4789  ;;  %v4563_v42 = vsel %vm4562_vm4, %v5584_v57, %v4561_v53  ;;  %vm4573_vm4 = vcmp.eq.f32.partialorder %v5621_v31, inf }
  0xd1   : > { %2837 = vmatpush.bf16.msrb.mxu0 %v4281_v46  ;;  %v5762_v46 = vmul.f32 %v1977_v61, %v5681_v16  ;;  %v4314_v16 = vmul.f32 %v5750_v0, %v5750_v0  ;;  %v4566_v60 = vsel %vm4564_vm6, %v4565_v37, %v4563_v42  ;;  %v4792_v52 = vpop.eup %4791  ;;  %v4583_v24 = vadd.f32 %v5696_v9, %v4582_v14 }
  0xd2   : > { %2850 = vmatpush.bf16.msrb.mxu1 %v4289_v45  ;;  %v4375_v45 = vsel %vm4355_vm3, nan, %v4374_v8  ;;  %vm4570_vm3 = vcmp.eq.f32.partialorder %v5612_v15, 0.0  ;;  %v4567_v28 = vsel %vm4547_vm8, nan, %v4566_v60  ;;  %v4506_v33 = vmul.f32 %v4792_v52, %v4792_v52 }
  0xd3   : > { %2863 = vmatpush.bf16.msrb.mxu2 %v4297_v47  ;;  %v4376_v59 = vsel %vm4354_vm5, 0.0, %v4375_v45  ;;  %v4295_v47 = vld [vmem:[%s5147_s28 + $0x9a8] sm:$0xff]  ;;  %v4315_v49 = vmul.f32 %v4314_v16, %v5641_v41  ;;  %v4568_v37 = vsel %vm4546_vm9, 0.0, %v4567_v28  ;;  %v4393_v61 = vmul.f32 %v4392_v13, %v4391_v32 }
  0xd4   : > { %2876 = vmatpush.bf16.msrb.mxu3 %v4305_v19  ;;  %v4303_v19 = vld [vmem:[%s5147_s28 + $0x9e8] sm:$0xff]  ;;  %v4377_v62 = vsel %vm4357_vm7, inf, %v4376_v59  ;;  %v4569_v35 = vsel %vm4549_vm10, inf, %v4568_v37  ;;  %v4584_v3 = vmul.f32 %v4583_v24, %v5612_v15  ;;  %vm4322_vm5 = vweird.f32 %v5641_v41 }
  0xd5   : > { %2838 = vmatpush.bf16.msrb.mxu0 %v4280_v21  ;;  %v2331_v20 = vpack.c.bf16 %v4377_v62, %v4377_v62  ;;  %v4316_v21 = vmul.f32 %v4315_v49, %v4314_v16  ;;  %v2339_v56 = vpack.c.bf16 %v4569_v35, %v4569_v35  ;;  %v4507_v57 = vmul.f32 %v4506_v33, %v5648_v44 }
  0xd6   : > { %2851 = vmatpush.bf16.msrb.mxu1 %v4288_v5  ;;  %v5797_v5 = vand.u32 2147483647, %v5759_v29  ;;  %v4395_v30 = vsel %vm4394_vm11, %v5608_v43, %v4393_v61  ;;  %vm4324_vm6 = vcmp.eq.f32.partialorder %v5641_v41, 0.0  ;;  %v4585_v27 = vmul.f32 %v4584_v3, %v4583_v24 }
  0xd7   : > { %2864 = vmatpush.bf16.msrb.mxu2 %v4296_v58  ;;  %v2363_v39 = vunpack.c.l.b16 %v2331_v20  ;;  %v4317_v9 = vsub.f32 %v4316_v21, %v5750_v0  ;;  %v2017_v58 = vmul.f32 %v5726_v50, %v5694_v63  ;;  %v4398_v10 = vsel %vm4396_vm12, %v4397_v40, %v4395_v30 }
  0xd8   : > { %2877 = vmatpush.bf16.msrb.mxu3 %v4304_v51  ;;  %4793 = vlog2.f32 %v5797_v5  ;;  %v2371_v51 = vunpack.c.l.b16 %v2339_v56  ;;  %vm4307_vm7 = vcmp.lt.f32.partialorder %v5630_v36, 0.0  ;;  %v4508_v34 = vmul.f32 %v4507_v57, %v4506_v33 }
  0xd9   : > { %2839 = vmatpush.bf16.msrb.mxu0 %v4279_v25  ;;  %v4399_v53 = vsel %vm4379_vm13, nan, %v4398_v10  ;;  %vm4306_vm8 = vcmp.eq.f32.partialorder %v5630_v36, 0.0  ;;  %v4318_v54 = vmul.f32 -0.33333334, %v4317_v9  ;;  %v5818_v8 = vmax.f32 %v2158_v1, 1e-30 }
  0xda   : > { %2852 = vmatpush.bf16.msrb.mxu1 %v4287_v6  ;;  %v2025_v63 = vmul.f32 %v5739_v48, %v5703_v38  ;;  %v2379_v50 = vsel %vm556_vm0, %v2371_v51, %v2363_v39  ;;  %vm6179_vm9 = vcmp.eq.f32.partialorder %v5608_v43, 0.0  ;;  %v4587_v12 = vsel %vm4586_vm15, %v5612_v15, %v4585_v27 }
  0xdb   : > { %2865 = vmatpush.bf16.msrb.mxu2 %v4295_v47  ;;  %v4400_v40 = vsel %vm6179_vm9, 0.0, %v4399_v53  ;;  %v4509_v45 = vsub.f32 %v4508_v34, %v4792_v52  ;;  %v2387_v42 = vpack.c.b16 %v2379_v50, %v2379_v50  ;;  %v4590_v25 = vsel %vm4588_vm14, %v4589_v4, %v4587_v12 }
  0xdc   : > { %2878 = vmatpush.bf16.msrb.mxu3 %v4303_v19  ;;  %v4401_v32 = vsel %vm4381_vm1, inf, %v4400_v40  ;;  %v4319_v38 = vadd.f32 %v5750_v0, %v4318_v54  ;;  %vm4499_vm10 = vcmp.lt.f32.partialorder %v5632_v23, 0.0  ;;  %v4591_v43 = vsel %vm4571_vm2, nan, %v4590_v25  ;;  %v4286_v25 = vld [vmem:[%s5147_s28 + $0x960] sm:$0xff] }
  0xdd   : > { %v2332_v48 = vpack.c.bf16 %v4401_v32, %v4401_v32  ;;  %v4510_v6 = vmul.f32 -0.33333334, %v4509_v45  ;;  %v2033_v16 = vmul.f32 %v5748_v17, %v5716_v22  ;;  %2819 = vmatmul.bf16.vlgmr.msra.gmra.mxu2 %v2387_v42  ;;  %v4592_v2 = vsel %vm4570_vm3, 0.0, %v4591_v43  ;;  %v4278_v32 = vld [vmem:[%s5147_s28 + $0x920] sm:$0xff] }
  0xde   : > { %v4794_v59 = vpop.eup %4793  ;;  %vm4309_vm11 = vcmp.eq.f32.partialorder %v5641_v41, inf  ;;  %v4320_v4 = vmul.f32 %v4319_v38, %v5630_v36  ;;  %vm4498_vm12 = vcmp.eq.f32.partialorder %v5632_v23, 0.0  ;;  %v4593_v0 = vsel %vm4573_vm4, inf, %v4592_v2  ;;  %2840 = vmatpush.bf16.msrb.mxu0 %v4278_v32  ;;  %2853 = vmatpush.bf16.msrb.mxu1 %v4286_v25 }
  0xdf   : > { %v2364_v60 = vunpack.c.l.b16 %v2332_v48  ;;  %v4511_v14 = vadd.f32 %v4792_v52, %v4510_v6  ;;  %v4336_v47 = vmul.f32 -0.33333334, %v4794_v59  ;;  %v2340_v19 = vpack.c.bf16 %v4593_v0, %v4593_v0 }
  0xe0   : > { %v4321_v1 = vmul.f32 %v4320_v4, %v4319_v38  ;;  %v5848_v22 = vand.u32 2147483647, %v5818_v8  ;;  %v2065_v15 = vadd.f32 %v2017_v58, %v5762_v46  ;;  %vm4514_vm13 = vweird.f32 %v5648_v44  ;;  %v4294_v38 = vld [vmem:[%s5147_s28 + $0x9a0] sm:$0xff] }
  0xe1   : > { %v4512_v17 = vmul.f32 %v4511_v14, %v5632_v23  ;;  %4795 = vpow2.f32 %v4336_v47  ;;  %v2121_v62 = vadd.f32 %v2033_v16, %v2025_v63  ;;  %v2372_v28 = vunpack.c.l.b16 %v2340_v19  ;;  %v5892_v47 = vpop.f32.mrf.mxu0  ;;  %2866 = vmatpush.bf16.msrb.mxu2 %v4294_v38 }
  0xe2   : > { %v4323_v31 = vsel %vm4322_vm5, %v5630_v36, %v4321_v1  ;;  %v4517_v52 = vand.u32 2147483648, %v5632_v23  ;;  %4797 = vlog2.f32 %v5848_v22  ;;  %vm4501_vm14 = vcmp.eq.f32.partialorder %v5648_v44, inf }
  0xe3   : > { %v4326_v46 = vsel %vm4324_vm6, %v4325_v26, %v4323_v31  ;;  %v4513_v13 = vmul.f32 %v4512_v17, %v4511_v14  ;;  %vm4516_vm15 = vcmp.eq.f32.partialorder %v5648_v44, 0.0  ;;  %v2380_v49 = vsel %vm556_vm0, %v2372_v28, %v2364_v60  ;;  %v4277_v60 = vld [vmem:[%s5147_s28 + $0x918] sm:$0xff] }
  0xe4   : > { %v4327_v37 = vsel %vm4307_vm7, nan, %v4326_v46  ;;  %v2066_v20 = vrot.slane %v2065_v15, 4  ;;  %v2122_v24 = vrot.slane %v2121_v62, 4  ;;  %v2388_v33 = vpack.c.b16 %v2380_v49, %v2380_v49  ;;  %v4285_v14 = vld [vmem:[%s5147_s28 + $0x958] sm:$0xff]  ;;  %2841 = vmatpush.bf16.msrb.mxu0 %v4277_v60  ;;  %v4298_v60 = vld [vmem:[%s5147_s28 + $0x9c0] sm:$0xff] }
  0xe5   : > { %v4328_v35 = vsel %vm4306_vm8, 0.0, %v4327_v37  ;;  %v4515_v26 = vsel %vm4514_vm13, %v5632_v23, %v4513_v13  ;;  %v1946_v61 = vunpack.c.h.bf16 %v5658_v7  ;;  %v1954_v36 = vunpack.c.h.bf16 %v5667_v11  ;;  %v4301_v17 = vld [vmem:[%s5147_s28 + $0x9d8] sm:$0xff]  ;;  %2854 = vmatpush.bf16.msrb.mxu1 %v4285_v14 }
  0xe6   : > { %v4329_v21 = vsel %vm4309_vm11, inf, %v4328_v35  ;;  %v4518_v56 = vsel %vm4516_vm15, %v4517_v52, %v4515_v26  ;;  %v2067_v39 = vadd.f32 %v2066_v20, %v2065_v15  ;;  %v2123_v3 = vadd.f32 %v2122_v24, %v2121_v62  ;;  %2832 = vmatmul.bf16.vlgmr.msra.gmra.mxu3 %v2388_v33  ;;  %v4293_v15 = vld [vmem:[%s5147_s28 + $0x998] sm:$0xff] }
  0xe7   : > { %v4796_v57 = vpop.eup %4795  ;;  %v4519_v30 = vsel %vm4499_vm10, nan, %v4518_v56  ;;  %v2329_v9 = vpack.c.bf16 %v4329_v21, %v4329_v21  ;;  %v1962_v58 = vunpack.c.h.bf16 %v5673_v55  ;;  %v1970_v63 = vunpack.c.h.bf16 %v5691_v18  ;;  %v4302_v18 = vld [vmem:[%s5147_s28 + $0x9e0] sm:$0xff]  ;;  %v4284_v21 = vld [vmem:[%s5147_s28 + $0x950] sm:$0xff]  ;;  %2867 = vmatpush.bf16.msrb.mxu2 %v4293_v15 }
  0xe8   : > { %v4798_v51 = vpop.eup %4797  ;;  %v4520_v7 = vsel %vm4498_vm12, 0.0, %v4519_v30  ;;  %v4338_v10 = vmul.f32 %v4796_v57, %v4796_v57  ;;  %v2068_v41 = vrot.slane %v2067_v39, 2  ;;  %v2124_v27 = vrot.slane %v2123_v3, 2  ;;  %2879 = vmatpush.bf16.msrb.mxu3 %v4302_v18  ;;  %v5897_v31 = vld [vmem:[%s5096_s3 + $0x18] sm:$0xff]  ;;  %v4292_v30 = vld [vmem:[%s5147_s28 + $0x990] sm:$0xff] }
  0xe9   : > { %v4521_v34 = vsel %vm4501_vm14, inf, %v4520_v7  ;;  %v2361_v53 = vunpack.c.l.b16 %v2329_v9  ;;  %v4528_v54 = vmul.f32 -0.33333334, %v4798_v51  ;;  %v1978_v40 = vmul.f32 %v1946_v61, %v1946_v61  ;;  %v5900_v49 = vld [vmem:[%s5096_s3 + $0x38] sm:$0xff]  ;;  %v4300_v9 = vld [vmem:[%s5147_s28 + $0x9d0] sm:$0xff]  ;;  %2855 = vmatpush.bf16.msrb.mxu1 %v4284_v21 }
  0xea   : > { %v2337_v11 = vpack.c.bf16 %v4521_v34, %v4521_v34  ;;  %v4339_v55 = vmul.f32 %v4338_v10, %v5797_v5  ;;  %v2069_v50 = vadd.f32 %v2068_v41, %v2067_v39  ;;  %v2125_v23 = vadd.f32 %v2124_v27, %v2123_v3  ;;  %v5906_v33 = vld [vmem:[%s5096_s3 + $0x58] sm:$0xff] }
  0xeb   : > { %4799 = vpow2.f32 %v4528_v54  ;;  %v1986_v12 = vmul.f32 %v1954_v36, %v1954_v36  ;;  %v1994_v45 = vmul.f32 %v1962_v58, %v1962_v58  ;;  %v2002_v6 = vmul.f32 %v1970_v63, %v1970_v63  ;;  %v5915_v39 = vld [vmem:[%s5096_s3 + $0x78] sm:$0xff]  ;;  %2868 = vmatpush.bf16.msrb.mxu2 %v4292_v30 }
  0xec   : > { %v2369_v42 = vunpack.c.l.b16 %v2337_v11  ;;  %v4340_v44 = vmul.f32 %v4339_v55, %v4338_v10  ;;  %v2070_v43 = vrot.slane %v2069_v50, 1  ;;  %v2126_v48 = vrot.slane %v2125_v23, 1  ;;  %2880 = vmatpush.bf16.msrb.mxu3 %v4301_v17  ;;  %v4275_v55 = vld [vmem:[%s5147_s28 + $0x908] sm:$0xff] }
  0xed   : > { %v2010_v16 = vmul.f32 %v1978_v40, %v1946_v61  ;;  %v2018_v59 = vmul.f32 %v1986_v12, %v1954_v36  ;;  %v2026_v2 = vmul.f32 %v1994_v45, %v1962_v58  ;;  %v2034_v28 = vmul.f32 %v2002_v6, %v1970_v63  ;;  %v4276_v61 = vld [vmem:[%s5147_s28 + $0x910] sm:$0xff]  ;;  %v976_v40 = vpop.f32.mrf.mxu0  ;;  %v4291_v12 = vld [vmem:[%s5147_s28 + $0x988] sm:$0xff] }
  0xee   : > { %v2377_v4 = vsel %vm556_vm0, %v2369_v42, %v2361_v53  ;;  %v4341_v0 = vsub.f32 %v4340_v44, %v4796_v57  ;;  %v2071_v19 = vadd.f32 %v2070_v43, %v2069_v50  ;;  %v2127_v62 = vadd.f32 %v2126_v48, %v2125_v23  ;;  %2842 = vmatpush.bf16.msrb.mxu0 %v4276_v61  ;;  %v4283_v50 = vld [vmem:[%s5147_s28 + $0x948] sm:$0xff] }
  0xef   : > { %v2385_v1 = vpack.c.b16 %v2377_v4, %v2377_v4  ;;  %v2072_v13 = vadd.f32 %v2018_v59, %v2010_v16  ;;  %vm4331_vm1 = vcmp.lt.f32.partialorder %v5759_v29, 0.0  ;;  %v2128_v24 = vadd.f32 %v2034_v28, %v2026_v2  ;;  %v4299_v45 = vld [vmem:[%s5147_s28 + $0x9c8] sm:$0xff]  ;;  %2856 = vmatpush.bf16.msrb.mxu1 %v4283_v50  ;;  %v4274_v59 = vld [vmem:[%s5147_s28 + $0x900] sm:$0xff]  ;;  %2869 = vmatpush.bf16.msrb.mxu2 %v4291_v12 }
  0xf0   : > { %v4342_v52 = vmul.f32 -0.33333334, %v4341_v0  ;;  %v2153_v46 = vmul.f32 0.0625, %v2071_v19  ;;  %v2161_v20 = vmul.f32 0.0625, %v2127_v62  ;;  %v1947_v3 = vunpack.c.l.bf16 %v5897_v31  ;;  %2881 = vmatpush.bf16.msrb.mxu3 %v4300_v9  ;;  %v4282_v2 = vld [vmem:[%s5147_s28 + $0x940] sm:$0xff] }
  0xf1   : > { %v5902_v37 = vpop.eup %4799  ;;  %2793 = vmatmul.bf16.vlgmr.msra.gmra.mxu0 %v2385_v1  ;;  %v2129_v58 = vrot.slane %v2128_v24, 4  ;;  %v1955_v51 = vunpack.c.l.bf16 %v5900_v49  ;;  %vm4346_vm2 = vweird.f32 %v5797_v5  ;;  %v1963_v41 = vunpack.c.l.bf16 %v5906_v33  ;;  %v4290_v0 = vld [vmem:[%s5147_s28 + $0x980] sm:$0xff] }
  0xf2   : > { %v4343_v35 = vadd.f32 %v4796_v57, %v4342_v52  ;;  %v4530_v26 = vmul.f32 %v5902_v37, %v5902_v37  ;;  %v5912_v56 = vmax.f32 %v2153_v46, 1e-30  ;;  %v5920_v36 = vmax.f32 %v2161_v20, 1e-30  ;;  %2843 = vmatpush.bf16.msrb.mxu0 %v4275_v55 }
  0xf3   : > { %v2073_v57 = vrot.slane %v2072_v13, 4  ;;  %v4349_v27 = vand.u32 2147483648, %v5759_v29  ;;  %v1971_v54 = vunpack.c.l.bf16 %v5915_v39  ;;  %vm4348_vm3 = vcmp.eq.f32.partialorder %v5797_v5, 0.0  ;;  %2857 = vmatpush.bf16.msrb.mxu1 %v4282_v2  ;;  %2870 = vmatpush.bf16.msrb.mxu2 %v4290_v0 }
  0xf4   : > { %v4344_v7 = vmul.f32 %v4343_v35, %v5759_v29  ;;  %v4531_v10 = vmul.f32 %v4530_v26, %v5848_v22  ;;  %v5929_v34 = vand.u32 2147483647, %v5912_v56  ;;  %v5932_v53 = vand.u32 2147483647, %v5920_v36  ;;  %2882 = vmatpush.bf16.msrb.mxu3 %v4299_v45 }
  0xf5   : > { %v1979_v23 = vmul.f32 %v1947_v3, %v1947_v3  ;;  %v2074_v42 = vadd.f32 %v2073_v57, %v2072_v13  ;;  %v2130_v44 = vadd.f32 %v2129_v58, %v2128_v24  ;;  %v1987_v32 = vmul.f32 %v1955_v51, %v1955_v51 }
  0xf6   : > { %v4345_v63 = vmul.f32 %v4344_v7, %v4343_v35  ;;  %v4532_v11 = vmul.f32 %v4531_v10, %v4530_v26  ;;  %4801 = vlog2.f32 %v5929_v34  ;;  %v1995_v43 = vmul.f32 %v1963_v41, %v1963_v41  ;;  %2844 = vmatpush.bf16.msrb.mxu0 %v4274_v59 }
  0xf7   : > { %4803 = vlog2.f32 %v5932_v53  ;;  %vm4330_vm4 = vcmp.eq.f32.partialorder %v5759_v29, 0.0  ;;  %vm4333_vm5 = vcmp.eq.f32.partialorder %v5797_v5, inf  ;;  %v2003_v18 = vmul.f32 %v1971_v54, %v1971_v54 }
  0xf8   : > { %v4347_v25 = vsel %vm4346_vm2, %v5759_v29, %v4345_v63  ;;  %v4533_v38 = vsub.f32 %v4532_v11, %v5902_v37  ;;  %vm4522_vm6 = vcmp.eq.f32.partialorder %v5818_v8, 0.0  ;;  %v4541_v4 = vand.u32 2147483648, %v5818_v8  ;;  %2883 = vmatpush.bf16.msrb.mxu3 %v4298_v60 }
  0xf9   : > { %v4350_v48 = vsel %vm4348_vm3, %v4349_v27, %v4347_v25  ;;  %v2075_v14 = vrot.slane %v2074_v42, 2  ;;  %v2131_v19 = vrot.slane %v2130_v44, 2  ;;  %v2011_v1 = vmul.f32 %v1979_v23, %v1947_v3 }
  0xfa   : > { %v4351_v6 = vsel %vm4331_vm1, nan, %v4350_v48  ;;  %v4534_v16 = vmul.f32 -0.33333334, %v4533_v38  ;;  %v2019_v62 = vmul.f32 %v1987_v32, %v1955_v51  ;;  %v2027_v28 = vmul.f32 %v1995_v43, %v1963_v41 }
  0xfb   : > { %v4352_v15 = vsel %vm4330_vm4, 0.0, %v4351_v6  ;;  %vm4538_vm7 = vweird.f32 %v5848_v22  ;;  %v2076_v46 = vadd.f32 %v2075_v14, %v2074_v42  ;;  %v2132_v13 = vadd.f32 %v2131_v19, %v2130_v44 }
  0xfc   : > { %v4535_v17 = vadd.f32 %v5902_v37, %v4534_v16  ;;  %v4802_v52 = vpop.eup %4801  ;;  %v2035_v20 = vmul.f32 %v2003_v18, %v1971_v54  ;;  %vm4540_vm8 = vcmp.eq.f32.partialorder %v5848_v22, 0.0  ;;  %v2079_v29 = vadd.f32 %v2019_v62, %v2011_v1 }
  0xfd   : > { %v4804_v24 = vpop.eup %4803  ;;  %v4408_v26 = vmul.f32 -0.33333334, %v4802_v52  ;;  %v4353_v37 = vsel %vm4333_vm5, inf, %v4352_v15  ;;  %v2077_v21 = vrot.slane %v2076_v46, 1  ;;  %v2133_v3 = vrot.slane %v2132_v13, 1 }
  0xfe   : > { %v4536_v35 = vmul.f32 %v4535_v17, %v5818_v8  ;;  %v4600_v61 = vmul.f32 -0.33333334, %v4804_v24  ;;  %v2080_v9 = vrot.slane %v2079_v29, 4  ;;  %v2135_v57 = vadd.f32 %v2035_v20, %v2027_v28 }
  0xff   : > { %4805 = vpow2.f32 %v4408_v26  ;;  %vm4523_vm9 = vcmp.lt.f32.partialorder %v5818_v8, 0.0  ;;  %v2078_v58 = vadd.f32 %v2077_v21, %v2076_v46  ;;  %v2134_v51 = vadd.f32 %v2133_v3, %v2132_v13 }
 0x100   : > { %v4537_v30 = vmul.f32 %v4536_v35, %v4535_v17  ;;  %4807 = vpow2.f32 %v4600_v61  ;;  %vm4525_vm10 = vcmp.eq.f32.partialorder %v5848_v22, inf  ;;  %v2081_v7 = vadd.f32 %v2080_v9, %v2079_v29 }
 0x101   : > { %v2136_v10 = vrot.slane %v2135_v57, 4  ;;  %v2330_v27 = vpack.c.bf16 %v4353_v37, %v4353_v37  ;;  %v2154_v54 = vmul.f32 0.0625, %v2078_v58  ;;  %v2162_v63 = vmul.f32 0.0625, %v2134_v51 }
 0x102   : > { %v4539_v5 = vsel %vm4538_vm7, %v5818_v8, %v4537_v30  ;;  %v2082_v55 = vrot.slane %v2081_v7, 2  ;;  %v1948_v22 = vunpack.c.h.bf16 %v5897_v31  ;;  %v1956_v18 = vunpack.c.h.bf16 %v5900_v49 }
 0x103   : > { %v4542_v41 = vsel %vm4540_vm8, %v4541_v4, %v4539_v5  ;;  %v2137_v50 = vadd.f32 %v2136_v10, %v2135_v57  ;;  %v5975_v40 = vmax.f32 %v2154_v54, 1e-30  ;;  %v5977_v12 = vmax.f32 %v2162_v63, 1e-30 }
 0x104   : > { %v4543_v11 = vsel %vm4523_vm9, nan, %v4542_v41  ;;  %v2083_v44 = vadd.f32 %v2082_v55, %v2081_v7  ;;  %v2362_v43 = vunpack.c.l.b16 %v2330_v27  ;;  %v1964_v4 = vunpack.c.h.bf16 %v5906_v33 }
 0x105   : > { %v4544_v23 = vsel %vm4522_vm6, 0.0, %v4543_v11  ;;  %v4806_v45 = vpop.eup %4805  ;;  %v2138_v32 = vrot.slane %v2137_v50, 2  ;;  %v5982_v8 = vand.u32 2147483647, %v5975_v40  ;;  %v5985_v16 = vand.u32 2147483647, %v5977_v12 }
 0x106   : > { %v4545_v42 = vsel %vm4525_vm10, inf, %v4544_v23  ;;  %v4808_v25 = vpop.eup %4807  ;;  %v4410_v48 = vmul.f32 %v4806_v45, %v4806_v45  ;;  %v1972_v31 = vunpack.c.h.bf16 %v5915_v39  ;;  %v2084_v60 = vrot.slane %v2083_v44, 1 }
 0x107   : > { %v2338_v38 = vpack.c.bf16 %v4545_v42, %v4545_v42  ;;  %v4602_v6 = vmul.f32 %v4808_v25, %v4808_v25  ;;  %4809 = vlog2.f32 %v5982_v8  ;;  %v2139_v49 = vadd.f32 %v2138_v32, %v2137_v50 }
 0x108   : > { %v4411_v2 = vmul.f32 %v4410_v48, %v5929_v34  ;;  %v1980_v1 = vmul.f32 %v1948_v22, %v1948_v22  ;;  %v1988_v15 = vmul.f32 %v1956_v18, %v1956_v18  ;;  %4811 = vlog2.f32 %v5985_v16 }
 0x109   : > { %v2370_v59 = vunpack.c.l.b16 %v2338_v38  ;;  %v4603_v0 = vmul.f32 %v4602_v6, %v5932_v53  ;;  %v1996_v52 = vmul.f32 %v1964_v4, %v1964_v4  ;;  %v4421_v33 = vand.u32 2147483648, %v5912_v56 }
 0x10a   : > { %v4412_v19 = vmul.f32 %v4411_v2, %v4410_v48  ;;  %v2085_v46 = vadd.f32 %v2084_v60, %v2083_v44  ;;  %v2140_v13 = vrot.slane %v2139_v49, 1  ;;  %vm4402_vm11 = vcmp.eq.f32.partialorder %v5912_v56, 0.0 }
 0x10b   : > { %v2378_v14 = vsel %vm556_vm0, %v2370_v59, %v2362_v43  ;;  %v4604_v62 = vmul.f32 %v4603_v0, %v4602_v6  ;;  %v2004_v24 = vmul.f32 %v1972_v31, %v1972_v31  ;;  %v2012_v35 = vmul.f32 %v1980_v1, %v1948_v22 }
 0x10c   : > { %v2386_v17 = vpack.c.b16 %v2378_v14, %v2378_v14  ;;  %v4413_v28 = vsub.f32 %v4412_v19, %v4806_v45  ;;  %v2020_v26 = vmul.f32 %v1988_v15, %v1956_v18  ;;  %vm4418_vm12 = vweird.f32 %v5929_v34 }
 0x10d   : > { %v4605_v39 = vsub.f32 %v4604_v62, %v4808_v25  ;;  %v4810_v29 = vpop.eup %4809  ;;  %v2141_v61 = vadd.f32 %v2140_v13, %v2139_v49  ;;  %v2155_v21 = vmul.f32 0.0625, %v2085_v46  ;;  %v2028_v9 = vmul.f32 %v1996_v52, %v1964_v4 }
 0x10e   : > { %2806 = vmatmul.bf16.vlgmr.msra.gmra.mxu1 %v2386_v17  ;;  %v4414_v20 = vmul.f32 -0.33333334, %v4413_v28  ;;  %v4432_v30 = vmul.f32 -0.33333334, %v4810_v29  ;;  %v2086_v57 = vadd.f32 %v2020_v26, %v2012_v35  ;;  %v4812_v58 = vpop.eup %4811  ;;  %v2036_v10 = vmul.f32 %v2004_v24, %v1972_v31 }
 0x10f   : > { %v4606_v37 = vmul.f32 -0.33333334, %v4605_v39  ;;  %v2163_v5 = vmul.f32 0.0625, %v2141_v61  ;;  %v5997_v7 = vmax.f32 %v2155_v21, 1e-30  ;;  %vm4420_vm13 = vcmp.eq.f32.partialorder %v5929_v34, 0.0 }
 0x110   : > { %v4415_v3 = vadd.f32 %v4806_v45, %v4414_v20  ;;  %4813 = vpow2.f32 %v4432_v30  ;;  %v4624_v27 = vmul.f32 -0.33333334, %v4812_v58  ;;  %v2087_v54 = vrot.slane %v2086_v57, 4 }
 0x111   : > { %v4607_v51 = vadd.f32 %v4808_v25, %v4606_v37  ;;  %vm4610_vm14 = vweird.f32 %v5932_v53  ;;  %v6004_v11 = vand.u32 2147483647, %v5997_v7  ;;  %v4613_v50 = vand.u32 2147483648, %v5920_v36 }
 0x112   : > { %v4416_v41 = vmul.f32 %v4415_v3, %v5912_v56  ;;  %4815 = vpow2.f32 %v4624_v27  ;;  %v6007_v23 = vmax.f32 %v2163_v5, 1e-30  ;;  %vm4403_vm15 = vcmp.lt.f32.partialorder %v5912_v56, 0.0 }
 0x113   : > { %v4608_v63 = vmul.f32 %v4607_v51, %v5920_v36  ;;  %vm4612_vm1 = vcmp.eq.f32.partialorder %v5932_v53, 0.0  ;;  %4817 = vlog2.f32 %v6004_v11  ;;  %vm4595_vm2 = vcmp.lt.f32.partialorder %v5920_v36, 0.0 }
 0x114   : > { %v4417_v55 = vmul.f32 %v4416_v41, %v4415_v3  ;;  %v2088_v44 = vadd.f32 %v2087_v54, %v2086_v57  ;;  %v2142_v32 = vadd.f32 %v2036_v10, %v2028_v9  ;;  %vm4405_vm3 = vcmp.eq.f32.partialorder %v5929_v34, inf }
 0x115   : > { %v4609_v45 = vmul.f32 %v4608_v63, %v4607_v51  ;;  %vm4594_vm4 = vcmp.eq.f32.partialorder %v5920_v36, 0.0  ;;  %vm4597_vm5 = vcmp.eq.f32.partialorder %v5932_v53, inf  ;;  %v6025_v18 = vand.u32 2147483647, %v6007_v23 }
 0x116   : > { %v4419_v42 = vsel %vm4418_vm12, %v5912_v56, %v4417_v55  ;;  %v4814_v38 = vpop.eup %4813  ;;  %v2089_v0 = vrot.slane %v2088_v44, 2  ;;  %v2143_v60 = vrot.slane %v2142_v32, 4  ;;  %vm4426_vm6 = vcmp.eq.f32.partialorder %v5975_v40, 0.0 }
 0x117   : > { %v4422_v22 = vsel %vm4420_vm13, %v4421_v33, %v4419_v42  ;;  %v4611_v25 = vsel %vm4610_vm14, %v5920_v36, %v4609_v45  ;;  %v4434_v34 = vmul.f32 %v4814_v38, %v4814_v38  ;;  %4819 = vlog2.f32 %v6025_v18 }
 0x118   : > { %v4423_v43 = vsel %vm4403_vm15, nan, %v4422_v22  ;;  %v4614_v48 = vsel %vm4612_vm1, %v4613_v50, %v4611_v25  ;;  %v4816_v2 = vpop.eup %4815  ;;  %v2090_v52 = vadd.f32 %v2089_v0, %v2088_v44  ;;  %v2144_v46 = vadd.f32 %v2143_v60, %v2142_v32 }
 0x119   : > { %v4424_v6 = vsel %vm4402_vm11, 0.0, %v4423_v43  ;;  %v4615_v59 = vsel %vm4595_vm2, nan, %v4614_v48  ;;  %v4818_v49 = vpop.eup %4817  ;;  %v4435_v19 = vmul.f32 %v4434_v34, %v5982_v8  ;;  %v4626_v53 = vmul.f32 %v4816_v2, %v4816_v2 }
 0x11a   : > { %v4425_v4 = vsel %vm4405_vm3, inf, %v4424_v6  ;;  %v4616_v31 = vsel %vm4594_vm4, 0.0, %v4615_v59  ;;  %v4456_v15 = vmul.f32 -0.33333334, %v4818_v49  ;;  %v2091_v20 = vrot.slane %v2090_v52, 1 }
 0x11b   : > { %v4617_v36 = vsel %vm4597_vm5, inf, %v4616_v31  ;;  %v2333_v14 = vpack.c.bf16 %v4425_v4, %v4425_v4  ;;  %v4436_v56 = vmul.f32 %v4435_v19, %v4434_v34  ;;  %v4627_v62 = vmul.f32 %v4626_v53, %v5985_v16 }
 0x11c   : > { %v2341_v1 = vpack.c.bf16 %v4617_v36, %v4617_v36  ;;  %4821 = vpow2.f32 %v4456_v15  ;;  %v2145_v29 = vrot.slane %v2144_v46, 2  ;;  %v2092_v61 = vadd.f32 %v2091_v20, %v2090_v52 }
 0x11d   : > { %v2365_v17 = vunpack.c.l.b16 %v2333_v14  ;;  %v4437_v33 = vsub.f32 %v4436_v56, %v4814_v38  ;;  %v4628_v39 = vmul.f32 %v4627_v62, %v4626_v53  ;;  %v4820_v37 = vpop.eup %4819  ;;  %vm4427_vm7 = vcmp.lt.f32.partialorder %v5975_v40, 0.0 }
 0x11e   : > { %v2373_v28 = vunpack.c.l.b16 %v2341_v1  ;;  %v4648_v30 = vmul.f32 -0.33333334, %v4820_v37  ;;  %v2146_v9 = vadd.f32 %v2145_v29, %v2144_v46  ;;  %vm4429_vm8 = vcmp.eq.f32.partialorder %v5982_v8, inf }
 0x11f   : > { %v4438_v35 = vmul.f32 -0.33333334, %v4437_v33  ;;  %v4629_v26 = vsub.f32 %v4628_v39, %v4816_v2  ;;  %v4445_v58 = vand.u32 2147483648, %v5975_v40  ;;  %v2156_v51 = vmul.f32 0.0625, %v2092_v61 }
 0x120   : > { %v2381_v13 = vsel %vm556_vm0, %v2373_v28, %v2365_v17  ;;  %4823 = vpow2.f32 %v4648_v30  ;;  %vm4442_vm9 = vweird.f32 %v5982_v8  ;;  %vm4444_vm10 = vcmp.eq.f32.partialorder %v5982_v8, 0.0 }
 0x121   : > { %v2389_v24 = vpack.c.b16 %v2381_v13, %v2381_v13  ;;  %v4439_v21 = vadd.f32 %v4814_v38, %v4438_v35  ;;  %v4630_v3 = vmul.f32 -0.33333334, %v4629_v26  ;;  %v2147_v27 = vrot.slane %v2146_v9, 1 }
 0x122   : > { %v4822_v57 = vpop.eup %4821  ;;  %v6040_v54 = vmax.f32 %v2156_v51, 1e-30  ;;  %vm4619_vm11 = vcmp.lt.f32.partialorder %v5977_v12, 0.0  ;;  %vm4634_vm12 = vweird.f32 %v5985_v16  ;;  %v4637_v45 = vand.u32 2147483648, %v5977_v12 }
 0x123   : > { %2845 = vmatmul.bf16.vlgmr.msrb.gmra.mxu0 %v2389_v24  ;;  %v4440_v5 = vmul.f32 %v4439_v21, %v5975_v40  ;;  %v4631_v10 = vadd.f32 %v4816_v2, %v4630_v3  ;;  %v4458_v41 = vmul.f32 %v4822_v57, %v4822_v57  ;;  %v2148_v42 = vadd.f32 %v2147_v27, %v2146_v9 }
 0x124   : > { %v6048_v44 = vand.u32 2147483647, %v6040_v54  ;;  %vm4636_vm13 = vcmp.eq.f32.partialorder %v5985_v16, 0.0  ;;  %vm4618_vm14 = vcmp.eq.f32.partialorder %v5977_v12, 0.0  ;;  %vm4621_vm15 = vcmp.eq.f32.partialorder %v5985_v16, inf }
 0x125   : > { %v4441_v63 = vmul.f32 %v4440_v5, %v4439_v21  ;;  %v4632_v55 = vmul.f32 %v4631_v10, %v5977_v12  ;;  %v4459_v50 = vmul.f32 %v4458_v41, %v6004_v11  ;;  %v2164_v43 = vmul.f32 0.0625, %v2148_v42  ;;  %v1013_v42 = vpop.f32.mrf.mxu3 }
 0x126   : > { %4825 = vlog2.f32 %v6048_v44  ;;  %v4824_v48 = vpop.eup %4823  ;;  %vm4466_vm1 = vweird.f32 %v6004_v11  ;;  %v4469_v52 = vand.u32 2147483648, %v5997_v7  ;;  %vm4468_vm2 = vcmp.eq.f32.partialorder %v6004_v11, 0.0 }
 0x127   : > { %v4443_v32 = vsel %vm4442_vm9, %v5975_v40, %v4441_v63  ;;  %v4633_v22 = vmul.f32 %v4632_v55, %v4631_v10  ;;  %v4460_v25 = vmul.f32 %v4459_v50, %v4458_v41  ;;  %v4650_v31 = vmul.f32 %v4824_v48, %v4824_v48  ;;  %v987_v63 = vpop.f32.mrf.mxu1  ;;  %v1000_v55 = vpop.f32.mrf.mxu2 }
 0x128   : > { %v4446_v38 = vsel %vm4444_vm10, %v4445_v58, %v4443_v32  ;;  %v6060_v0 = vmax.f32 %v2164_v43, 1e-30  ;;  %vm4451_vm3 = vcmp.lt.f32.partialorder %v5997_v7, 0.0  ;;  %vm4450_vm4 = vcmp.eq.f32.partialorder %v5997_v7, 0.0  ;;  %v1026_v32 = vpop.f32.mrf.mxu0 }
 0x129   : > { %v4447_v6 = vsel %vm4427_vm7, nan, %v4446_v38  ;;  %v4635_v59 = vsel %vm4634_vm12, %v5977_v12, %v4633_v22  ;;  %v4461_v34 = vsub.f32 %v4460_v25, %v4822_v57  ;;  %v4651_v16 = vmul.f32 %v4650_v31, %v6025_v18 }
 0x12a   : > { %v4448_v2 = vsel %vm4426_vm6, 0.0, %v4447_v6  ;;  %v4638_v4 = vsel %vm4636_vm13, %v4637_v45, %v4635_v59  ;;  %v6068_v62 = vand.u32 2147483647, %v6060_v0  ;;  %vm4453_vm5 = vcmp.eq.f32.partialorder %v6004_v11, inf }
 0x12b   : > { %v4449_v60 = vsel %vm4429_vm8, inf, %v4448_v2  ;;  %v4639_v49 = vsel %vm4619_vm11, nan, %v4638_v4  ;;  %v4462_v36 = vmul.f32 -0.33333334, %v4461_v34  ;;  %v4652_v56 = vmul.f32 %v4651_v16, %v4650_v31 }
 0x12c   : > { %v4640_v14 = vsel %vm4618_vm14, 0.0, %v4639_v49  ;;  %v2334_v19 = vpack.c.bf16 %v4449_v60, %v4449_v60  ;;  %v4826_v15 = vpop.eup %4825  ;;  %4827 = vlog2.f32 %v6068_v62  ;;  %vm4658_vm6 = vweird.f32 %v6025_v18 }
 0x12d   : > { %v4641_v53 = vsel %vm4621_vm15, inf, %v4640_v14  ;;  %v4463_v1 = vadd.f32 %v4822_v57, %v4462_v36  ;;  %v4480_v12 = vmul.f32 -0.33333334, %v4826_v15  ;;  %v4653_v33 = vsub.f32 %v4652_v56, %v4824_v48  ;;  %v1015_v16 = vpop.f32.mrf.mxu3 }
 0x12e   : > { %v2342_v40 = vpack.c.bf16 %v4641_v53, %v4641_v53  ;;  %v2366_v17 = vunpack.c.l.b16 %v2334_v19  ;;  %v4661_v30 = vand.u32 2147483648, %v6007_v23  ;;  %vm4660_vm7 = vcmp.eq.f32.partialorder %v6025_v18, 0.0 }
 0x12f   : > { %v4464_v8 = vmul.f32 %v4463_v1, %v5997_v7  ;;  %4829 = vpow2.f32 %v4480_v12  ;;  %v4654_v13 = vmul.f32 -0.33333334, %v4653_v33  ;;  %vm4643_vm8 = vcmp.lt.f32.partialorder %v6007_v23, 0.0  ;;  %v989_v49 = vpop.f32.mrf.mxu1  ;;  %v1002_v36 = vpop.f32.mrf.mxu2 }
 0x130   : > { %v2374_v28 = vunpack.c.l.b16 %v2342_v40  ;;  %vm4642_vm9 = vcmp.eq.f32.partialorder %v6007_v23, 0.0  ;;  %vm4645_vm10 = vcmp.eq.f32.partialorder %v6025_v18, inf  ;;  %v988_v45 = vadd.f32 %v987_v63, %v5892_v47  ;;  %v1028_v53 = vpop.f32.mrf.mxu0 }
 0x131   : > { %v4465_v39 = vmul.f32 %v4464_v8, %v4463_v1  ;;  %v4655_v26 = vadd.f32 %v4824_v48, %v4654_v13  ;;  %vm4490_vm11 = vweird.f32 %v6048_v44  ;;  %v4493_v14 = vand.u32 2147483648, %v6040_v54 }
 0x132   : > { %v2382_v46 = vsel %vm556_vm0, %v2374_v28, %v2366_v17  ;;  %v4828_v37 = vpop.eup %4827  ;;  %v1001_v18 = vadd.f32 %v1000_v55, %v988_v45  ;;  %vm4492_vm12 = vcmp.eq.f32.partialorder %v6048_v44, 0.0  ;;  %vm4475_vm13 = vcmp.lt.f32.partialorder %v6040_v54, 0.0 }
 0x133   : > { %v2390_v20 = vpack.c.b16 %v2382_v46, %v2382_v46  ;;  %v4467_v24 = vsel %vm4466_vm1, %v5997_v7, %v4465_v39  ;;  %v4656_v21 = vmul.f32 %v4655_v26, %v6007_v23  ;;  %v4672_v9 = vmul.f32 -0.33333334, %v4828_v37  ;;  %v507_v37 = vld [vmem:[#allocation2] sm:$0x3] }
 0x134   : > { %v4470_v35 = vsel %vm4468_vm2, %v4469_v52, %v4467_v24  ;;  %v1014_v19 = vadd.f32 %v1013_v42, %v1001_v18  ;;  %vm4474_vm14 = vcmp.eq.f32.partialorder %v6040_v54, 0.0  ;;  %vm4477_vm15 = vcmp.eq.f32.partialorder %v6048_v44, inf }
 0x135   : > { %2858 = vmatmul.bf16.vlgmr.msrb.gmra.mxu1 %v2390_v20  ;;  %v4471_v29 = vsel %vm4451_vm3, nan, %v4470_v35  ;;  %v4830_v3 = vpop.eup %4829  ;;  %v4657_v58 = vmul.f32 %v4656_v21, %v4655_v26  ;;  %4831 = vpow2.f32 %v4672_v9  ;;  %vm4682_vm1 = vweird.f32 %v6068_v62  ;;  %v1065_v24 = vpop.f32.mrf.mxu3 }
 0x136   : > { %v4472_v61 = vsel %vm4450_vm4, 0.0, %v4471_v29  ;;  %v4482_v7 = vmul.f32 %v4830_v3, %v4830_v3  ;;  %v1027_v8 = vadd.f32 %v1026_v32, %v1014_v19  ;;  %v4685_v13 = vand.u32 2147483648, %v6060_v0 }
 0x137   : > { %v4473_v57 = vsel %vm4453_vm5, inf, %v4472_v61  ;;  %v4659_v11 = vsel %vm4658_vm6, %v6007_v23, %v4657_v58  ;;  %v1039_v39 = vpop.f32.mrf.mxu1  ;;  %v1052_v46 = vpop.f32.mrf.mxu2  ;;  %vm4684_vm2 = vcmp.eq.f32.partialorder %v6068_v62, 0.0  ;;  %vm4667_vm3 = vcmp.lt.f32.partialorder %v6060_v0, 0.0 }
 0x138   : > { %v4483_v51 = vmul.f32 %v4482_v7, %v6048_v44  ;;  %v4662_v5 = vsel %vm4660_vm7, %v4661_v30, %v4659_v11  ;;  %v2335_v10 = vpack.c.bf16 %v4473_v57, %v4473_v57  ;;  %v1040_v20 = vadd.f32 %v1039_v39, %v1027_v8  ;;  %v1828_v35 = vpop.f32.mrf.mxu0 }
 0x139   : > { %v4663_v41 = vsel %vm4643_vm8, nan, %v4662_v5  ;;  %vm4666_vm4 = vcmp.eq.f32.partialorder %v6060_v0, 0.0  ;;  %vm4669_vm5 = vcmp.eq.f32.partialorder %v6068_v62, inf }
 0x13a   : > { %v4484_v27 = vmul.f32 %v4483_v51, %v4482_v7  ;;  %v4664_v50 = vsel %vm4642_vm9, 0.0, %v4663_v41  ;;  %v2367_v23 = vunpack.c.l.b16 %v2335_v10  ;;  %v1053_v29 = vadd.f32 %v1052_v46, %v1040_v20 }
 0x13b   : > { %v4665_v22 = vsel %vm4645_vm10, inf, %v4664_v50  ;;  %v4832_v38 = vpop.eup %4831 }
 0x13c   : > { %v4485_v25 = vsub.f32 %v4484_v27, %v4830_v3  ;;  %v2343_v43 = vpack.c.bf16 %v4665_v22, %v4665_v22  ;;  %v4674_v6 = vmul.f32 %v4832_v38, %v4832_v38 }
 0x13d   : > { %v1067_v10 = vpop.f32.mrf.mxu3 }
 0x13e   : > { %v4486_v48 = vmul.f32 -0.33333334, %v4485_v25  ;;  %v2375_v59 = vunpack.c.l.b16 %v2343_v43  ;;  %v4675_v2 = vmul.f32 %v4674_v6, %v6068_v62 }
 0x13f   : > { %v1041_v7 = vpop.f32.mrf.mxu1  ;;  %v1054_v11 = vpop.f32.mrf.mxu2 }
 0x140   : > { %v4487_v34 = vadd.f32 %v4830_v3, %v4486_v48  ;;  %v2383_v4 = vsel %vm556_vm0, %v2375_v59, %v2367_v23  ;;  %v4676_v47 = vmul.f32 %v4675_v2, %v4674_v6  ;;  %v1066_v3 = vadd.f32 %v1065_v24, %v1053_v29  ;;  %v1830_v41 = vpop.f32.mrf.mxu0 }
 0x141   : > { %v2391_v31 = vpack.c.b16 %v2383_v4, %v2383_v4 }
 0x142   : > { %v4488_v60 = vmul.f32 %v4487_v34, %v6040_v54  ;;  %v4677_v15 = vsub.f32 %v4676_v47, %v4832_v38  ;;  %v1069_v57 = vadd.f32 %v1066_v3, %v507_v37 }
 0x143   : > { %2871 = vmatmul.bf16.vlgmr.msrb.gmra.mxu2 %v2391_v31  ;;  %v1378_v31 = vld [vmem:[#allocation2 + $0x2] sm:$0x3] }
 0x144   : > { %v4489_v1 = vmul.f32 %v4488_v60, %v4487_v34  ;;  %v4678_v17 = vmul.f32 -0.33333334, %v4677_v15  ;;  %1070 = vst [vmem:[#allocation2] sm:$0x3] %v1069_v57 }
 0x145   : > { %v1867_v45 = vpop.f32.mrf.mxu3 }
 0x146   : > { %v4491_v40 = vsel %vm4490_vm11, %v6040_v54, %v4489_v1  ;;  %v4679_v28 = vadd.f32 %v4832_v38, %v4678_v17 }
 0x147   : > { %v4494_v56 = vsel %vm4492_vm12, %v4493_v14, %v4491_v40  ;;  %v1841_v62 = vpop.f32.mrf.mxu1  ;;  %v1854_v55 = vpop.f32.mrf.mxu2 }
 0x148   : > { %v4495_v12 = vsel %vm4475_vm13, nan, %v4494_v56  ;;  %v4680_v33 = vmul.f32 %v4679_v28, %v6060_v0  ;;  %v1842_v50 = vadd.f32 %v1841_v62, %v1828_v35  ;;  %v1880_v42 = vpop.f32.mrf.mxu0 }
 0x149   : > { %v4496_v52 = vsel %vm4474_vm14, 0.0, %v4495_v12 }
 0x14a   : > { %v4497_v54 = vsel %vm4477_vm15, inf, %v4496_v52  ;;  %v4681_v26 = vmul.f32 %v4680_v33, %v4679_v28  ;;  %v1855_v32 = vadd.f32 %v1854_v55, %v1842_v50 }
 0x14b   : > { %v2336_v21 = vpack.c.bf16 %v4497_v54, %v4497_v54  ;;  %v2328_v54 = vld [vmem:[#allocation2 + $0x4] sm:$0x3] }
 0x14c   : > { %v4683_v44 = vsel %vm4682_vm1, %v6060_v0, %v4681_v26  ;;  %v1868_v38 = vadd.f32 %v1867_v45, %v1855_v32 }
 0x14d   : > { %v4686_v61 = vsel %vm4684_vm2, %v4685_v13, %v4683_v44  ;;  %v2368_v5 = vunpack.c.l.b16 %v2336_v21  ;;  %v1869_v43 = vpop.f32.mrf.mxu3 }
 0x14e   : > { %v4687_v30 = vsel %vm4667_vm3, nan, %v4686_v61  ;;  %v1881_v48 = vadd.f32 %v1880_v42, %v1868_v38 }
 0x14f   : > { %v4688_v9 = vsel %vm4666_vm4, 0.0, %v4687_v30  ;;  %v1843_v22 = vpop.f32.mrf.mxu1  ;;  %v1856_v25 = vpop.f32.mrf.mxu2 }
 0x150   : > { %v4689_v58 = vsel %vm4669_vm5, inf, %v4688_v9  ;;  %v1882_v23 = vpop.f32.mrf.mxu0 }
 0x151   : > { %v2344_v51 = vpack.c.bf16 %v4689_v58, %v4689_v58 }
 0x153   : > { %v2376_v27 = vunpack.c.l.b16 %v2344_v51 }
 0x155   : > { %v2384_v0 = vsel %vm556_vm0, %v2376_v27, %v2368_v5  ;;  %v1919_v34 = vpop.f32.mrf.mxu3 }
 0x156   : > { %v2392_v63 = vpack.c.b16 %v2384_v0, %v2384_v0 }
 0x157   : > { %v1893_v6 = vpop.f32.mrf.mxu1  ;;  %v1906_v59 = vpop.f32.mrf.mxu2 }
 0x158   : > { %2884 = vmatmul.bf16.vlgmr.msrb.gmra.mxu3 %v2392_v63  ;;  %v1894_v18 = vadd.f32 %v1893_v6, %v1881_v48 }
 0x15a   : > { %v1907_v4 = vadd.f32 %v1906_v59, %v1894_v18 }
 0x15c   : > { %v1920_v60 = vadd.f32 %v1919_v34, %v1907_v4 }
 0x15d   : > { %v1921_v14 = vpop.f32.mrf.mxu3 }
 0x15e   : > { %v1923_v47 = vadd.f32 %v1920_v60, %v1378_v31 }
 0x15f   : > { %v1895_v49 = vpop.f32.mrf.mxu1  ;;  %v1908_v36 = vpop.f32.mrf.mxu2 }
 0x160   : > { %1924 = vst [vmem:[#allocation2 + $0x2] sm:$0x3] %v1923_v47 }
 0x167   : > { %v2820_v16 = vpop.f32.mrf.mxu2 }
 0x169   : > { %v2833_v53 = vpop.f32.mrf.mxu3 }
 0x16e   : > { %v2794_v2 = vpop.f32.mrf.mxu0 }
 0x16f   : > { %v2822_v1 = vpop.f32.mrf.mxu2 }
 0x171   : > { %v2835_v15 = vpop.f32.mrf.mxu3 }
 0x176   : > { %v2796_v19 = vpop.f32.mrf.mxu0 }
 0x18b   : > { %v2807_v40 = vpop.f32.mrf.mxu1 }
 0x18c   : > { %v2808_v17 = vadd.f32 %v2807_v40, %v2794_v2 }
 0x18e   : > { %v2821_v56 = vadd.f32 %v2820_v16, %v2808_v17 }
 0x190   : > { %v2834_v8 = vadd.f32 %v2833_v53, %v2821_v56 }
 0x193   : > { %v2809_v12 = vpop.f32.mrf.mxu1 }
 0x1a0   : > { %v2846_v28 = vpop.f32.mrf.mxu0 }
 0x1a1   : > { %v2847_v20 = vadd.f32 %v2846_v28, %v2834_v8 }
 0x1a8   : > { %v2848_v52 = vpop.f32.mrf.mxu0 }
 0x1b2   : > { %v2859_v33 = vpop.f32.mrf.mxu1 }
 0x1b3   : > { %v2860_v24 = vadd.f32 %v2859_v33, %v2847_v20 }
 0x1ba   : > { %v2861_v39 = vpop.f32.mrf.mxu1 }
 0x1c6   : > { %v2872_v46 = vpop.f32.mrf.mxu2 }
 0x1c7   : > { %v2873_v35 = vadd.f32 %v2872_v46, %v2860_v24 }
 0x1ce   : > { %v2874_v13 = vpop.f32.mrf.mxu2 }
 0x1db   : > { %v2885_v26 = vpop.f32.mrf.mxu3 }
 0x1dc   : > { %v2886_v29 = vadd.f32 %v2885_v26, %v2873_v35 }
 0x1de   : > { %v2889_v44 = vadd.f32 %v2886_v29, %v2328_v54 }
 0x1df   : > { %2894 = sbr.rel (%p4108_p1) target bundleno = 667 (0x29b), region = 44 }
 0x1e0   : > { %2890 = vst [vmem:[#allocation2 + $0x4] sm:$0x3] %v2889_v44 }
 0x1e3   : > { %v2887_v37 = vpop.f32.mrf.mxu3 }
 0x1e4   : > { %vm2897_vm0 = vcmask 1041408   ;;  %v6110_v21 = vld [vmem:[#allocation2] sm:$0x3]  ;;  %v2915_v9 = vld [vmem:[#allocation2 + $0x2] sm:$0x3] }
 0x1e5   : > { %v2896_v30 = vmul.f32 %v6110_v21, %v6110_v21  ;;  %v2916_v7 = vmul.f32 %v2915_v9, %v2915_v9  ;;  %v2967_v52 = vld [vmem:[#allocation2 + $0x2] sm:$0x3] }
 0x1e7   : > { %v2934_v61 = vld [vmem:[#allocation2 + $0x4] sm:$0x3]  ;;  %v2898_v58 = vsel %vm2897_vm0, %v2896_v30, 0.0  ;;  %v2917_v11 = vsel %vm2897_vm0, %v2916_v7, 0.0 }
 0x1e8   : > { %v2935_v3 = vmul.f32 %v2934_v61, %v2934_v61  ;;  %2899 = vadd.xlane.f32.xlu0 %v2898_v58  ;;  %v2971_v33 = vld [vmem:[#allocation2 + $0x4] sm:$0x3] }
 0x1ea   : > { %v2936_v57 = vsel %vm2897_vm0, %v2935_v3, 0.0 }
 0x1eb   : > { %2937 = vadd.xlane.f32.xlu1 %v2936_v57 }
 0x1f0   : > { %2918 = vadd.xlane.f32.xlu0 %v2917_v11 }
 0x25b   : > { %v2900_v5 = vpop.xlane.xlu0 %2899 }
 0x25c   : > { %v2901_v41 = vmax.f32 %v2900_v5, 1e-24 }
 0x25e   : > { %v2938_v51 = vpop.xlane.xlu1 %2937  ;;  %vm2908_vm9 = vweird.f32 %v2901_v41 }
 0x25f   : > { %v2939_v10 = vmax.f32 %v2938_v51, 1e-24 }
 0x261   : > { %4833 = vrsqrt.f32 %v2939_v10  ;;  %vm2946_vm7 = vweird.f32 %v2939_v10 }
 0x262   : > { %4835 = vrsqrt.f32 %v2901_v41 }
 0x263   : > { %v2919_v27 = vpop.xlane.xlu0 %2918 }
 0x264   : > { %v2920_v63 = vmax.f32 %v2919_v27, 1e-24 }
 0x266   : > { %4837 = vrsqrt.f32 %v2920_v63  ;;  %vm2927_vm13 = vweird.f32 %v2920_v63 }
 0x267   : > { %v4834_v0 = vpop.eup %4833 }
 0x268   : > { %v4836_v62 = vpop.eup %4835  ;;  %v2941_v55 = vmul.f32 %v4834_v0, %v2939_v10  ;;  %vm2947_vm8 = vweird.f32 %v4834_v0 }
 0x269   : > { %v2903_v50 = vmul.f32 %v4836_v62, %v2901_v41  ;;  %vm2909_vm6 = vweird.f32 %v4836_v62  ;;  %vm2948_vm12 = vmor %vm2946_vm7, %vm2947_vm8 }
 0x26a   : > { %v2942_v45 = vmul.f32 %v4834_v0, %v2941_v55  ;;  %vm2910_vm10 = vmor %vm2908_vm9, %vm2909_vm6 }
 0x26b   : > { %v2904_v42 = vmul.f32 %v4836_v62, %v2903_v50 }
 0x26c   : > { %v2943_v32 = vmul.f32 0.5, %v2942_v45  ;;  %v4838_v25 = vpop.eup %4837 }
 0x26d   : > { %v2905_v22 = vmul.f32 0.5, %v2904_v42  ;;  %v2922_v23 = vmul.f32 %v4838_v25, %v2920_v63  ;;  %vm2928_vm11 = vweird.f32 %v4838_v25 }
 0x26e   : > { %v2944_v43 = vsub.f32 1.5, %v2943_v32  ;;  %vm2929_vm14 = vmor %vm2927_vm13, %vm2928_vm11 }
 0x26f   : > { %v2906_v38 = vsub.f32 1.5, %v2905_v22  ;;  %v2923_v6 = vmul.f32 %v4838_v25, %v2922_v23 }
 0x270   : > { %v2945_v59 = vmul.f32 %v4834_v0, %v2944_v43 }
 0x271   : > { %v2907_v48 = vmul.f32 %v4836_v62, %v2906_v38  ;;  %v2924_v18 = vmul.f32 0.5, %v2923_v6 }
 0x272   : > { %v2949_v4 = vsel %vm2948_vm12, %v4834_v0, %v2945_v59 }
 0x273   : > { %v2911_v34 = vsel %vm2910_vm10, %v4836_v62, %v2907_v48  ;;  %v2925_v2 = vsub.f32 1.5, %v2924_v18  ;;  %v2950_v49 = vmul.f32 %v2949_v4, %v2938_v51 }
 0x274   : > { %v2912_v60 = vmul.f32 %v2911_v34, %v2900_v5 }
 0x275   : > { %v2926_v31 = vmul.f32 %v4838_v25, %v2925_v2  ;;  %v2951_v16 = vmul.f32 %v2950_v49, %v2949_v4 }
 0x276   : > { %v2913_v14 = vmul.f32 %v2912_v60, %v2911_v34 }
 0x277   : > { %v2930_v47 = vsel %vm2929_vm14, %v4838_v25, %v2926_v31 }
 0x278   : > { %v2931_v36 = vmul.f32 %v2930_v47, %v2919_v27 }
 0x27a   : > { %v2932_v19 = vmul.f32 %v2931_v36, %v2930_v47 }
 0x27c   : > { %v2933_v53 = vadd.f32 %v2932_v19, %v2913_v14 }
 0x27e   : > { %v2952_v1 = vadd.f32 %v2951_v16, %v2933_v53 }
 0x280   : > { %v2953_v15 = vmax.f32 %v2952_v1, 1e-24 }
 0x282   : > { %4839 = vrsqrt.f32 %v2953_v15  ;;  %vm2960_vm1 = vweird.f32 %v2953_v15 }
 0x288   : > { %v4840_v40 = vpop.eup %4839 }
 0x289   : > { %v2955_v17 = vmul.f32 %v4840_v40, %v2953_v15  ;;  %vm2961_vm15 = vweird.f32 %v4840_v40 }
 0x28a   : > { %vm2962_vm2 = vmor %vm2960_vm1, %vm2961_vm15 }
 0x28b   : > { %v2956_v56 = vmul.f32 %v4840_v40, %v2955_v17 }
 0x28d   : > { %v2957_v8 = vmul.f32 0.5, %v2956_v56 }
 0x28f   : > { %v2958_v12 = vsub.f32 1.5, %v2957_v8 }
 0x291   : > { %v2959_v28 = vmul.f32 %v4840_v40, %v2958_v12 }
 0x293   : > { %v2963_v39 = vsel %vm2962_vm2, %v4840_v40, %v2959_v28 }
 0x294   : > { %v2964_v46 = vmul.f32 %v2963_v39, %v2911_v34  ;;  %v2968_v13 = vmul.f32 %v2963_v39, %v2930_v47  ;;  %v2972_v20 = vmul.f32 %v2963_v39, %v2949_v4 }
 0x296   : > { %v2965_v24 = vmul.f32 %v2964_v46, %v6110_v21  ;;  %v2969_v35 = vmul.f32 %v2968_v13, %v2967_v52  ;;  %v2973_v54 = vmul.f32 %v2972_v20, %v2971_v33 }
 0x298   : > { %2966 = vst [vmem:[#allocation8] sm:$0x3] %v2965_v24 }
 0x299   : > { %2970 = vst [vmem:[#allocation8 + $0x2] sm:$0x3] %v2969_v35 }
 0x29a   : > { %2974 = vst [vmem:[#allocation8 + $0x4] sm:$0x3] %v2973_v54 }
 0x29b PF: > { %p4711_p3 = scmp.eq.s32.totalorder %s3069_s15, 1  ;;  %s2986_s4 = sshll.u32 %s6140_s2, 4  ;;  %s2987_s4 = int_to_ptr.hbm [resolvable:$true] %s2986_s4 }
 0x29c   : > { %s4996_s6 = smov [#allocation8]  }
 0x29d   : > { %s2984_s7 = sshll.u32 %s4996_s6, 4  ;;  %s2985_s7 = int_to_ptr.vmem [resolvable:$true] %s2984_s7 }
 0x29e   : > { %4697 = dma.vmem_to_hbm [thread:$0]  (%p4711_p3), %s2985_s7, 96, %s2987_s4, [#allocation5]  }
 0x29f   : > { %4962 = dma.done.wait (%p4711_p3), [#allocation5], 96  }
 0x2a0   : > { %4964 = vsyncadd (%p4711_p3), [#allocation5], 4294967200 }
 0x2a1 PF: > { %s17_s14 = sadd.s32 1, %s4987_s14   ;;  %s6180_s9 = smov %s4971_s10 }
 0x2a2   : > { %p14_p4 = scmp.ge.s32.totalorder %s17_s14, 4   ;;  %s6181_s10 = smov %s4975_s11 }
 0x2a3   : > { %s6182_s11 = smov %s5084_s5  ;;  %s6183_s12 = smov %s4983_s13 }
 0x2a4   : > { %s6184_s13 = smov %s6186_s26  ;;  %16 = sbr.rel (!%p14_p4) target bundleno = 6 (0x6), region = 81 }
 0x2a9   :  { %3000 = vsyncpa [#allocation4], 1 }
 0x2aa   :  { %3002 = vsyncpa [#allocation4 + $0x1], 1 }
 0x2ab   :  { %3003 = vsyncpa [#allocation7], 1 }
 0x2ac   :  { %3004 = vsyncpa [#allocation5], 1 }
 0x2ad   :  { %3006 = vsyncpa [#allocation5 + $0x1], 1 }

// kernel: tpu_custom_call.1
= control target key start
LH: loop header
LB: loop body
LE: loop exit
PB: predicated region body
PF: predicated region fallthrough
CT: control target
= control target key end

     0   :  { %7 = vsyncpa [#allocation4], 0  ;;  %s6138_s0 = inlined_call_operand.hbm [shape: bf16[2,16,2048], index: 0, kind: input, shape index: {}]   ;;  %s6139_s1 = inlined_call_operand.hbm [shape: bf16[3,2048,128], index: 1, kind: input, shape index: {}]   ;;  %s6140_s2 = inlined_call_operand.hbm [shape: f32[2,384], index: 2, kind: output, shape index: {}]  }
   0x1   :  { %9 = vsyncpa [#allocation4 + $0x1], 0 }
   0x2   :  { %10 = vsyncpa [#allocation7], 0 }
   0x3   :  { %11 = vsyncpa [#allocation5], 0  ;;  %s5012_s9 = smov 0   ;;  %s5014_s10 = smov 0  }
   0x4   :  { %s5016_s11 = smov 0   ;;  %s5018_s12 = smov 0  }
   0x5   :  { %s5020_s13 = smov 0   ;;  %s5022_s14 = smov 0  }
   0x6 LB: > { %s3069_s15 = sadd.s32 4294967295, %s4987_s14   ;;  %p51_p0 = scmp.ne.s32.totalorder %s4971_s10, %s4967_s9  ;;  %s4987_s14 = sphi %s5022_s14, %s17_s14   ;;  %s4983_s13 = sphi %s5020_s13, %s6184_s13   ;;  %s4979_s12 = sphi %s5018_s12, %s6183_s12   ;;  %s4975_s11 = sphi %s5016_s11, %s6182_s11   ;;  %s4971_s10 = sphi %s5014_s10, %s6181_s10   ;;  %s4967_s9 = sphi %s5012_s9, %s6180_s9  }
   0x7   : > { %p5044_p1 = scmp.eq.s32.totalorder %s3069_s15, 0  ;;  %p3070_p2 = scmp.ge.s32.totalorder %s4987_s14, 1 }
   0x8   : > { %p109_p3 = scmp.lt.s32.totalorder %s4987_s14, 3  ;;  %s120_s20 = sshll.u32 %s6139_s1, 4  ;;  %s121_s20 = int_to_ptr.hbm [resolvable:$true] %s120_s20 }
   0x9   : > { %p5052_p4 = por %p5044_p1, %p51_p0  ;;  %s4989_s22 = smov [#allocation6]  }
   0xa   : > { %p5059_p5 = pnand %p3070_p2, %p109_p3  ;;  %s122_s23 = sshll.u32 %s4989_s22, 4  ;;  %s123_s23 = int_to_ptr.vmem [resolvable:$true] %s122_s23 }
   0xb   : > { %s4990_s24 = smov 64   ;;  %s4991_s25 = smov 4  }
   0xc   : > { %p4700_p6 = pneg %p5059_p5  ;;  %s26_s26 = sadd.s32 1, %s4983_s13 }
   0xd   : > { %p27_p8 = scmp.ge.s32.totalorder %s26_s26, 2  ;;  %s38_s27 = sadd.s32 1, %s4975_s11 }
   0xe   : > { %p4701_p7 = pnand %p4700_p6, %p5044_p1  ;;  %p45_p9 = scmp.ne.s32.totalorder %s4975_s11, %s4971_s10 }
   0xf   : > { %p46_p10 = scmp.eq.s32.totalorder %s4987_s14, 0  ;;  %s6186_s26 = smov (%p27_p8, %s26_s26), 0 }
  0x10   : > { %4703 = dma.hbm_to_vmem [thread:$0]  (!%p4701_p7), %s121_s20, 49152, %s123_s23, [#allocation7], %s4990_s24, %s4990_s24, %s4991_s25  }
  0x11   : > { %p5074_p11 = por %p46_p10, %p45_p9  ;;  %p4709_p12 = scmp.lt.s32.totalorder %s4987_s14, 2 }
  0x12   : > { %s34_s29 = ssub.s32 %s4983_s13, %s6186_s26  ;;  %s136_s30 = sand.u32 1, %s4975_s11  }
  0x13   : > { %p36_p13 = scmp.eq.s32.totalorder %s34_s29, 0  ;;  %s3073_s3 = sshll.u32 %s136_s30, 7 }
  0x14   : > { %s4113_s4 = sshll.u32 %s4983_s13, 5  ;;  %s140_s18 = scalar_lea.vmem [#allocation3], %s3073_s3 }
  0x15   : > { %s5084_s5 = scalar_select %p36_p13, %s4975_s11, %s38_s27  }
  0x16   : > { %s148_s8 = scalar_lea.hbm %s6138_s0, %s4113_s4  ;;  %s151_s19 = sshll.u32 %s140_s18, 4  ;;  %s152_s19 = int_to_ptr.vmem [resolvable:$true] %s151_s19 }
  0x17   : > { %s149_s9 = sshll.u32 %s148_s8, 4  ;;  %p4705_p0 = pnand %p4709_p12, %p5074_p11  ;;  %s150_s9 = int_to_ptr.hbm [resolvable:$true] %s149_s9 }
  0x18   : > { %s137_s20 = scalar_lea.sflag [#allocation4], %s136_s30  ;;  %s4992_s22 = smov 1024  }
  0x19   : > { %s4993_s23 = smov 512   ;;  %s4994_s24 = smov 32  }
  0x1a   : > { %4707 = dma.hbm_to_vmem [thread:$0]  (!%p4705_p0), %s150_s9, 2048, %s152_s19, %s137_s20, %s4992_s22, %s4993_s23, %s4994_s24  }
  0x1b   : > { %163 = sbr.rel (%p5059_p5) target bundleno = 673 (0x2a1), region = 28  ;;  %s165_s25 = sand.u32 (!%p5059_p5), 1, %s4971_s10  }
  0x1c   : > { %s3077_s27 = sshll.u32 (!%p5059_p5), %s165_s25, 7  ;;  %s166_s29 = scalar_lea.sflag (!%p5059_p5), [#allocation4], %s165_s25 }
  0x1d   : > { %s5096_s3 = scalar_lea.vmem (!%p5059_p5), [#allocation3], %s3077_s27 }
  0x20   : > { %4954 = dma.done.wait (%p5052_p4), %s166_s29, 2048  }
  0x21   : > { %4956 = vsyncadd (%p5052_p4), %s166_s29, 4294965248 }
  0x22   : > { %4958 = dma.done.wait (%p5044_p1), [#allocation7], 49152  }
  0x23   : > { %4960 = vsyncadd (%p5044_p1), [#allocation7], 4294918144  ;;  %p3079_p2 = scmp.ne.s32.totalorder %s4979_s12, 0 }
  0x25   : > { %196 = sbr.rel (%p3079_p2) target bundleno = 44 (0x2c), region = 40 }
  0x2a   : > { %v4995_v0 = vmov 0.0  }
  0x2b   : > { %197 = vst [vmem:[#allocation2] sm:$0x3f] %v4995_v0 }
  0x2c PF: > { %s3080_s17 = sshll.u32 %s4979_s12, 10  ;;  %v5109_v1 = vld [vmem:[%s5096_s3 + $0x8] sm:$0xff]  ;;  %v5124_v8 = vld [vmem:[%s5096_s3] sm:$0xff]  ;;  %vm556_vm0 = vcmask 1041409   ;;  %p4108_p1 = scmp.ne.s32.totalorder %s4979_s12, 1 }
  0x2d   : > { %v5112_v2 = vld [vmem:[%s5096_s3 + $0x28] sm:$0xff]  ;;  %s375_s16 = sshra.s32 %s3080_s17, 3  ;;  %v217_v5 = vunpack.c.l.bf16 %v5109_v1  ;;  %v5127_v9 = vld [vmem:[%s5096_s3 + $0x20] sm:$0xff]  ;;  %v218_v10 = vunpack.c.h.bf16 %v5109_v1  ;;  %v215_v14 = vunpack.c.l.bf16 %v5124_v8  ;;  %v6153_v31 = vunpack.c.h.bf16 %v5124_v8 }
  0x2e   : > { %v5115_v3 = vld [vmem:[%s5096_s3 + $0x48] sm:$0xff]  ;;  %v225_v6 = vunpack.c.l.bf16 %v5112_v2  ;;  %s3081_s21 = sshll.u32 %s375_s16, 2  ;;  %v5132_v12 = vld [vmem:[%s5096_s3 + $0x40] sm:$0xff]  ;;  %v223_v15 = vunpack.c.l.bf16 %v5127_v9  ;;  %v226_v16 = vunpack.c.h.bf16 %v5112_v2  ;;  %v6156_v32 = vunpack.c.h.bf16 %v5127_v9 }
  0x2f   : > { %v5118_v4 = vld [vmem:[%s5096_s3 + $0x68] sm:$0xff]  ;;  %v233_v7 = vunpack.c.l.bf16 %v5115_v3  ;;  %v5135_v13 = vld [vmem:[%s5096_s3 + $0x60] sm:$0xff]  ;;  %v231_v18 = vunpack.c.l.bf16 %v5132_v12  ;;  %v6157_v20 = vunpack.c.h.bf16 %v5115_v3  ;;  %s5147_s28 = scalar_lea.vmem [#allocation6], %s3081_s21  ;;  %v6151_v43 = vunpack.c.h.bf16 %v5132_v12 }
  0x30   : > { %v241_v11 = vunpack.c.l.bf16 %v5118_v4  ;;  %v261_v17 = vadd.f32 %v225_v6, %v217_v5  ;;  %v239_v19 = vunpack.c.l.bf16 %v5135_v13  ;;  %v4121_v21 = vld [vmem:[%s5147_s28 + $0x38] sm:$0xff]  ;;  %v247_v25 = vadd.f32 %v223_v15, %v215_v14  ;;  %v4120_v33 = vld [vmem:[%s5147_s28 + $0x30] sm:$0xff]  ;;  %v4119_v53 = vld [vmem:[%s5147_s28 + $0x28] sm:$0xff] }
  0x31   : > { %v4129_v22 = vld [vmem:[%s5147_s28 + $0x78] sm:$0xff]  ;;  %v242_v26 = vunpack.c.h.bf16 %v5118_v4  ;;  %v268_v27 = vadd.f32 %v226_v16, %v218_v10  ;;  %965 = vmatpush.bf16.msra.mxu0 %v4121_v21  ;;  %v4128_v34 = vld [vmem:[%s5147_s28 + $0x70] sm:$0xff]  ;;  %v6152_v44 = vunpack.c.h.bf16 %v5135_v13  ;;  %v254_v51 = vadd.f32 %v6156_v32, %v6153_v31  ;;  %v4127_v54 = vld [vmem:[%s5147_s28 + $0x68] sm:$0xff] }
  0x32   : > { %v4137_v23 = vld [vmem:[%s5147_s28 + $0xb8] sm:$0xff]  ;;  %v317_v24 = vadd.f32 %v241_v11, %v233_v7  ;;  %v262_v29 = vrot.slane %v261_v17, 4  ;;  %v303_v30 = vadd.f32 %v239_v19, %v231_v18  ;;  %978 = vmatpush.bf16.msra.mxu1 %v4129_v22  ;;  %v248_v36 = vrot.slane %v247_v25, 4  ;;  %v4136_v39 = vld [vmem:[%s5147_s28 + $0xb0] sm:$0xff]  ;;  %v4135_v59 = vld [vmem:[%s5147_s28 + $0xa8] sm:$0xff] }
  0x33   : > { %v4145_v28 = vld [vmem:[%s5147_s28 + $0xf8] sm:$0xff]  ;;  %v269_v37 = vrot.slane %v268_v27, 4  ;;  %v324_v38 = vadd.f32 %v242_v26, %v6157_v20  ;;  %991 = vmatpush.bf16.msra.mxu2 %v4137_v23  ;;  %v4144_v40 = vld [vmem:[%s5147_s28 + $0xf0] sm:$0xff]  ;;  %v310_v52 = vadd.f32 %v6152_v44, %v6151_v43  ;;  %v4143_v60 = vld [vmem:[%s5147_s28 + $0xe8] sm:$0xff]  ;;  %v255_v63 = vrot.slane %v254_v51, 4 }
  0x34   : > { %v318_v35 = vrot.slane %v317_v24, 4  ;;  %1004 = vmatpush.bf16.msra.mxu3 %v4145_v28  ;;  %v263_v41 = vadd.f32 %v262_v29, %v261_v17  ;;  %v304_v42 = vrot.slane %v303_v30, 4  ;;  %v249_v46 = vadd.f32 %v248_v36, %v247_v25  ;;  %v4118_v29 = vld [vmem:[%s5147_s28 + $0x20] sm:$0xff]  ;;  %v4160_v32 = vld [vmem:[%s5147_s28 + $0x170] sm:$0xff] }
  0x35   : > { %v270_v47 = vadd.f32 %v269_v37, %v268_v27  ;;  %v325_v48 = vrot.slane %v324_v38, 4  ;;  %966 = vmatpush.bf16.msra.mxu0 %v4120_v33  ;;  %v311_v0 = vrot.slane %v310_v52, 4  ;;  %v256_v27 = vadd.f32 %v255_v63, %v254_v51  ;;  %v4134_v37 = vld [vmem:[%s5147_s28 + $0xa0] sm:$0xff] }
  0x36   : > { %v319_v45 = vadd.f32 %v318_v35, %v317_v24  ;;  %v264_v49 = vrot.slane %v263_v41, 2  ;;  %v305_v50 = vadd.f32 %v304_v42, %v303_v30  ;;  %979 = vmatpush.bf16.msra.mxu1 %v4128_v34  ;;  %v250_v56 = vrot.slane %v249_v46, 2  ;;  %v4126_v30 = vld [vmem:[%s5147_s28 + $0x60] sm:$0xff] }
  0x37   : > { %v271_v57 = vrot.slane %v270_v47, 2  ;;  %v326_v58 = vadd.f32 %v325_v48, %v324_v38  ;;  %992 = vmatpush.bf16.msra.mxu2 %v4136_v39  ;;  %v312_v28 = vadd.f32 %v311_v0, %v310_v52  ;;  %v4142_v38 = vld [vmem:[%s5147_s28 + $0xe0] sm:$0xff] }
  0x38   : > { %v320_v55 = vrot.slane %v319_v45, 2  ;;  %1005 = vmatpush.bf16.msra.mxu3 %v4144_v40  ;;  %v265_v61 = vadd.f32 %v264_v49, %v263_v41  ;;  %v306_v62 = vrot.slane %v305_v50, 2  ;;  %v251_v21 = vadd.f32 %v250_v56, %v249_v46 }
  0x39   : > { %v272_v22 = vadd.f32 %v271_v57, %v270_v47  ;;  %v327_v23 = vrot.slane %v326_v58, 2  ;;  %967 = vmatpush.bf16.msra.mxu0 %v4119_v53  ;;  %v257_v41 = vrot.slane %v256_v27, 2  ;;  %v313_v42 = vrot.slane %v312_v28, 2  ;;  %v4117_v53 = vld [vmem:[%s5147_s28 + $0x18] sm:$0xff] }
  0x3a   : > { %v321_v17 = vadd.f32 %v320_v55, %v319_v45  ;;  %v266_v24 = vrot.slane %v265_v61, 1  ;;  %v307_v25 = vadd.f32 %v306_v62, %v305_v50  ;;  %980 = vmatpush.bf16.msra.mxu1 %v4127_v54  ;;  %v252_v34 = vrot.slane %v251_v21, 1  ;;  %v4125_v54 = vld [vmem:[%s5147_s28 + $0x58] sm:$0xff] }
  0x3b   : > { %v273_v35 = vrot.slane %v272_v22, 1  ;;  %v328_v36 = vadd.f32 %v327_v23, %v326_v58  ;;  %993 = vmatpush.bf16.msra.mxu2 %v4135_v59  ;;  %v258_v51 = vadd.f32 %v257_v41, %v256_v27  ;;  %v314_v52 = vadd.f32 %v313_v42, %v312_v28  ;;  %v4133_v59 = vld [vmem:[%s5147_s28 + $0x98] sm:$0xff]  ;;  %v4116_v23 = vld [vmem:[%s5147_s28 + $0x10] sm:$0xff] }
  0x3c   : > { %v322_v33 = vrot.slane %v321_v17, 1  ;;  %1006 = vmatpush.bf16.msra.mxu3 %v4143_v60  ;;  %v267_v39 = vadd.f32 %v266_v24, %v265_v61  ;;  %v308_v40 = vrot.slane %v307_v25, 1  ;;  %v253_v46 = vadd.f32 %v252_v34, %v251_v21  ;;  %v4141_v60 = vld [vmem:[%s5147_s28 + $0xd8] sm:$0xff] }
  0x3d   : > { %v274_v47 = vadd.f32 %v273_v35, %v272_v22  ;;  %v329_v48 = vrot.slane %v328_v36, 1  ;;  %968 = vmatpush.bf16.msra.mxu0 %v4118_v29  ;;  %v259_v63 = vrot.slane %v258_v51, 1  ;;  %v315_v0 = vrot.slane %v314_v52, 1  ;;  %v5204_v29 = vld [vmem:[%s5096_s3 + $0x18] sm:$0xff] }
  0x3e   : > { %v323_v45 = vadd.f32 %v322_v33, %v321_v17  ;;  %v361_v49 = vmul.f32 0.0625, %v267_v39  ;;  %v309_v50 = vadd.f32 %v308_v40, %v307_v25  ;;  %981 = vmatpush.bf16.msra.mxu1 %v4126_v30  ;;  %v359_v56 = vmul.f32 0.0625, %v253_v46  ;;  %v4124_v30 = vld [vmem:[%s5147_s28 + $0x50] sm:$0xff]  ;;  %v5216_v46 = vld [vmem:[%s5096_s3 + $0x78] sm:$0xff] }
  0x3f   : > { %v330_v57 = vadd.f32 %v329_v48, %v328_v36  ;;  %v362_v58 = vmul.f32 0.0625, %v274_v47  ;;  %994 = vmatpush.bf16.msra.mxu2 %v4134_v37  ;;  %v260_v28 = vadd.f32 %v259_v63, %v258_v51  ;;  %v316_v36 = vadd.f32 %v315_v0, %v314_v52  ;;  %v5208_v37 = vld [vmem:[%s5096_s3 + $0x38] sm:$0xff]  ;;  %v4132_v39 = vld [vmem:[%s5147_s28 + $0x90] sm:$0xff] }
  0x40   : > { %v369_v55 = vmul.f32 0.0625, %v323_v45  ;;  %1007 = vmatpush.bf16.msra.mxu3 %v4142_v38  ;;  %v510_v61 = vpack.c.bf16 %v361_v49, %v361_v49  ;;  %v367_v62 = vmul.f32 0.0625, %v309_v50  ;;  %v508_v21 = vpack.c.bf16 %v359_v56, %v359_v56  ;;  %v5211_v38 = vld [vmem:[%s5096_s3 + $0x58] sm:$0xff]  ;;  %v4140_v40 = vld [vmem:[%s5147_s28 + $0xd0] sm:$0xff] }
  0x41   : > { %v370_v22 = vmul.f32 0.0625, %v330_v57  ;;  %v511_v27 = vpack.c.bf16 %v362_v58, %v362_v58  ;;  %969 = vmatpush.bf16.msra.mxu0 %v4117_v53  ;;  %v360_v45 = vmul.f32 0.0625, %v260_v28  ;;  %v6143_v47 = vunpack.c.l.bf16 %v5204_v29  ;;  %v5224_v52 = vld [vmem:[%s5096_s3 + $0x10] sm:$0xff] }
  0x42   : > { %v518_v17 = vpack.c.bf16 %v369_v55, %v369_v55  ;;  %v542_v24 = vunpack.c.l.b16 %v510_v61  ;;  %v516_v25 = vpack.c.bf16 %v367_v62, %v367_v62  ;;  %982 = vmatpush.bf16.msra.mxu1 %v4125_v54  ;;  %v540_v34 = vunpack.c.l.b16 %v508_v21  ;;  %v5233_v57 = vld [vmem:[%s5096_s3 + $0x30] sm:$0xff]  ;;  %v4131_v21 = vld [vmem:[%s5147_s28 + $0x88] sm:$0xff] }
  0x43   : > { %v519_v35 = vpack.c.bf16 %v370_v22, %v370_v22  ;;  %995 = vmatpush.bf16.msra.mxu2 %v4133_v59  ;;  %v543_v42 = vunpack.c.l.b16 %v511_v27  ;;  %v368_v50 = vmul.f32 0.0625, %v316_v36  ;;  %v6146_v51 = vunpack.c.l.bf16 %v5208_v37  ;;  %v5236_v58 = vld [vmem:[%s5096_s3 + $0x50] sm:$0xff]  ;;  %v4115_v59 = vld [vmem:[%s5147_s28 + $0x8] sm:$0xff] }
  0x44   : > { %v550_v33 = vunpack.c.l.b16 %v518_v17  ;;  %1008 = vmatpush.bf16.msra.mxu3 %v4141_v60  ;;  %v548_v41 = vunpack.c.l.b16 %v516_v25  ;;  %v509_v55 = vpack.c.bf16 %v360_v45, %v360_v45  ;;  %v6141_v56 = vunpack.c.l.bf16 %v5211_v38  ;;  %v4123_v60 = vld [vmem:[%s5147_s28 + $0x48] sm:$0xff]  ;;  %v5247_v17 = vld [vmem:[%s5096_s3 + $0x70] sm:$0xff] }
  0x45   : > { %v551_v49 = vunpack.c.l.b16 %v519_v35  ;;  %970 = vmatpush.bf16.msra.mxu0 %v4116_v23  ;;  %v517_v63 = vpack.c.bf16 %v368_v50, %v368_v50  ;;  %v6142_v0 = vunpack.c.l.bf16 %v5216_v46  ;;  %v4139_v22 = vld [vmem:[%s5147_s28 + $0xc8] sm:$0xff]  ;;  %v289_v25 = vadd.f32 %v6146_v51, %v6143_v47  ;;  %v4161_v47 = vld [vmem:[%s5147_s28 + $0x178] sm:$0xff] }
  0x46   : > { %v5220_v48 = vsel %vm556_vm0, %v550_v33, %v542_v24  ;;  %v5229_v54 = vsel %vm556_vm0, %v548_v41, %v540_v34  ;;  %983 = vmatpush.bf16.msra.mxu1 %v4124_v30  ;;  %v541_v24 = vunpack.c.l.b16 %v509_v55  ;;  %v6144_v27 = vunpack.c.l.bf16 %v5224_v52  ;;  %v4114_v41 = vld [vmem:[%s5147_s28] sm:$0xff] }
  0x47   : > { %v567_v53 = vpack.c.b16 %v5220_v48, %v5220_v48  ;;  %v565_v61 = vpack.c.b16 %v5229_v54, %v5229_v54  ;;  %v5243_v62 = vsel %vm556_vm0, %v551_v49, %v543_v42  ;;  %996 = vmatpush.bf16.msra.mxu2 %v4132_v39  ;;  %v549_v28 = vunpack.c.l.b16 %v517_v63  ;;  %v4122_v42 = vld [vmem:[%s5147_s28 + $0x40] sm:$0xff]  ;;  %v4159_v54 = vld [vmem:[%s5147_s28 + $0x168] sm:$0xff] }
  0x48   : > { %1009 = vmatpush.bf16.msra.mxu3 %v4140_v40  ;;  %v568_v23 = vpack.c.b16 %v5243_v62, %v5243_v62  ;;  %v345_v30 = vadd.f32 %v6142_v0, %v6141_v56  ;;  %v6145_v33 = vunpack.c.l.bf16 %v5233_v57  ;;  %v6147_v34 = vunpack.c.l.bf16 %v5236_v58  ;;  %v4138_v63 = vld [vmem:[%s5147_s28 + $0xc0] sm:$0xff]  ;;  %v4153_v0 = vld [vmem:[%s5147_s28 + $0x138] sm:$0xff]  ;;  %v4167_v62 = vld [vmem:[%s5147_s28 + $0x1a8] sm:$0xff] }
  0x49   : > { %v290_v35 = vrot.slane %v289_v25, 4  ;;  %v6148_v36 = vunpack.c.l.bf16 %v5247_v17  ;;  %v6149_v39 = vunpack.c.h.bf16 %v5204_v29  ;;  %v6150_v40 = vunpack.c.h.bf16 %v5208_v37  ;;  %971 = vmatpush.bf16.msra.mxu0 %v4115_v59  ;;  %v4130_v59 = vld [vmem:[%s5147_s28 + $0x80] sm:$0xff] }
  0x4a   : > { %984 = vmatpush.bf16.msra.mxu1 %v4123_v60  ;;  %v558_v45 = vsel %vm556_vm0, %v549_v28, %v541_v24  ;;  %v346_v49 = vrot.slane %v345_v30, 4  ;;  %v275_v50 = vadd.f32 %v6145_v33, %v6144_v27  ;;  %v6154_v55 = vunpack.c.h.bf16 %v5211_v38 }
  0x4b   : > { %997 = vmatpush.bf16.msra.mxu2 %v4131_v21  ;;  %v566_v60 = vpack.c.b16 %v558_v45, %v558_v45  ;;  %v291_v56 = vadd.f32 %v290_v35, %v289_v25  ;;  %v331_v24 = vadd.f32 %v6148_v36, %v6147_v34  ;;  %v6155_v28 = vunpack.c.h.bf16 %v5216_v46  ;;  %v4169_v45 = vld [vmem:[%s5147_s28 + $0x1b8] sm:$0xff] }
  0x4c   : > { %1010 = vmatpush.bf16.msra.mxu3 %v4139_v22  ;;  %v347_v27 = vadd.f32 %v346_v49, %v345_v30  ;;  %v276_v33 = vrot.slane %v275_v50, 4  ;;  %v296_v21 = vadd.f32 %v6150_v40, %v6149_v39  ;;  %v220_v22 = vunpack.c.h.bf16 %v5224_v52  ;;  %v4177_v25 = vld [vmem:[%s5147_s28 + $0x1f8] sm:$0xff] }
  0x4d   : > { %v292_v35 = vrot.slane %v291_v56, 2  ;;  %v332_v51 = vrot.slane %v331_v24, 4  ;;  %v352_v34 = vadd.f32 %v6155_v28, %v6154_v55  ;;  %v228_v30 = vunpack.c.h.bf16 %v5233_v57  ;;  %972 = vmatpush.bf16.msra.mxu0 %v4114_v41  ;;  %v4152_v28 = vld [vmem:[%s5147_s28 + $0x130] sm:$0xff] }
  0x4e   : > { %985 = vmatpush.bf16.msra.mxu1 %v4122_v42  ;;  %v348_v49 = vrot.slane %v347_v27, 2  ;;  %v277_v36 = vadd.f32 %v276_v33, %v275_v50  ;;  %v297_v39 = vrot.slane %v296_v21, 4  ;;  %v236_v40 = vunpack.c.h.bf16 %v5236_v58  ;;  %v4168_v50 = vld [vmem:[%s5147_s28 + $0x1b0] sm:$0xff] }
  0x4f   : > { %998 = vmatpush.bf16.msra.mxu2 %v4130_v59  ;;  %v293_v43 = vadd.f32 %v292_v35, %v291_v56  ;;  %v333_v44 = vadd.f32 %v332_v51, %v331_v24  ;;  %v353_v31 = vrot.slane %v352_v34, 4  ;;  %v244_v55 = vunpack.c.h.bf16 %v5247_v17  ;;  %v4176_v56 = vld [vmem:[%s5147_s28 + $0x1f0] sm:$0xff] }
  0x50   : > { %1011 = vmatpush.bf16.msra.mxu3 %v4138_v63  ;;  %v349_v41 = vadd.f32 %v348_v49, %v347_v27  ;;  %v278_v42 = vrot.slane %v277_v36, 2  ;;  %v298_v20 = vadd.f32 %v297_v39, %v296_v21  ;;  %v282_v33 = vadd.f32 %v228_v30, %v220_v22  ;;  %973 = vmatmul.bf16.vlgmr.msra.gmra.mxu0 %v565_v61 }
  0x51   : > { %1017 = vmatpush.bf16.msrb.mxu0 %v4153_v0  ;;  %v334_v51 = vrot.slane %v333_v44, 2  ;;  %v354_v59 = vadd.f32 %v353_v31, %v352_v34  ;;  %v294_v0 = vrot.slane %v293_v43, 1  ;;  %986 = vmatmul.bf16.vlgmr.msra.gmra.mxu1 %v566_v60 }
  0x52   : > { %1030 = vmatpush.bf16.msrb.mxu1 %v4161_v47  ;;  %v338_v47 = vadd.f32 %v244_v55, %v236_v40  ;;  %999 = vmatmul.bf16.vlgmr.msra.gmra.mxu2 %v567_v53  ;;  %v279_v27 = vadd.f32 %v278_v42, %v277_v36  ;;  %v299_v39 = vrot.slane %v298_v20, 2  ;;  %v283_v63 = vrot.slane %v282_v33, 4  ;;  %v4151_v53 = vld [vmem:[%s5147_s28 + $0x128] sm:$0xff] }
  0x53   : > { %1043 = vmatpush.bf16.msrb.mxu2 %v4169_v45  ;;  %1012 = vmatmul.bf16.vlgmr.msra.gmra.mxu3 %v568_v23  ;;  %v350_v31 = vrot.slane %v349_v41, 1  ;;  %v335_v34 = vadd.f32 %v334_v51, %v333_v44  ;;  %v355_v48 = vrot.slane %v354_v59, 2  ;;  %v4175_v45 = vld [vmem:[%s5147_s28 + $0x1e8] sm:$0xff]  ;;  %v295_v35 = vadd.f32 %v294_v0, %v293_v43  ;;  %v4166_v43 = vld [vmem:[%s5147_s28 + $0x1a0] sm:$0xff] }
  0x54   : > { %1056 = vmatpush.bf16.msrb.mxu3 %v4177_v25  ;;  %v339_v24 = vrot.slane %v338_v47, 4  ;;  %v280_v61 = vrot.slane %v279_v27, 1  ;;  %v300_v21 = vadd.f32 %v299_v39, %v298_v20  ;;  %v284_v36 = vadd.f32 %v283_v63, %v282_v33  ;;  %v4150_v20 = vld [vmem:[%s5147_s28 + $0x120] sm:$0xff] }
  0x55   : > { %1018 = vmatpush.bf16.msrb.mxu0 %v4152_v28  ;;  %v336_v23 = vrot.slane %v335_v34, 1  ;;  %v356_v25 = vadd.f32 %v355_v48, %v354_v59  ;;  %v4158_v33 = vld [vmem:[%s5147_s28 + $0x160] sm:$0xff]  ;;  %v4149_v48 = vld [vmem:[%s5147_s28 + $0x118] sm:$0xff] }
  0x56   : > { %1031 = vmatpush.bf16.msrb.mxu1 %v4160_v32  ;;  %v340_v60 = vadd.f32 %v339_v24, %v338_v47  ;;  %v301_v44 = vrot.slane %v300_v21, 1  ;;  %v285_v28 = vrot.slane %v284_v36, 2  ;;  %v351_v32 = vadd.f32 %v350_v31, %v349_v41  ;;  %v4174_v59 = vld [vmem:[%s5147_s28 + $0x1e0] sm:$0xff]  ;;  %v4157_v24 = vld [vmem:[%s5147_s28 + $0x158] sm:$0xff] }
  0x57   : > { %1044 = vmatpush.bf16.msrb.mxu2 %v4168_v50  ;;  %v281_v49 = vadd.f32 %v280_v61, %v279_v27  ;;  %v357_v42 = vrot.slane %v356_v25, 1  ;;  %v337_v50 = vadd.f32 %v336_v23, %v335_v34  ;;  %v365_v27 = vmul.f32 0.0625, %v295_v35 }
  0x58   : > { %1057 = vmatpush.bf16.msrb.mxu3 %v4176_v56  ;;  %v341_v51 = vrot.slane %v340_v60, 2  ;;  %v302_v56 = vadd.f32 %v301_v44, %v300_v21  ;;  %v286_v39 = vadd.f32 %v285_v28, %v284_v36  ;;  %v373_v63 = vmul.f32 0.0625, %v351_v32  ;;  %v4165_v21 = vld [vmem:[%s5147_s28 + $0x198] sm:$0xff]  ;;  %v4148_v44 = vld [vmem:[%s5147_s28 + $0x110] sm:$0xff] }
  0x59   : > { %1019 = vmatpush.bf16.msrb.mxu0 %v4151_v53  ;;  %v358_v47 = vadd.f32 %v357_v42, %v356_v25  ;;  %v363_v34 = vmul.f32 0.0625, %v281_v49  ;;  %v371_v53 = vmul.f32 0.0625, %v337_v50  ;;  %v4173_v36 = vld [vmem:[%s5147_s28 + $0x1d8] sm:$0xff]  ;;  %v514_v25 = vpack.c.bf16 %v365_v27, %v365_v27  ;;  %v4156_v28 = vld [vmem:[%s5147_s28 + $0x150] sm:$0xff]  ;;  %v4163_v27 = vld [vmem:[%s5147_s28 + $0x188] sm:$0xff] }
  0x5a   : > { %1032 = vmatpush.bf16.msrb.mxu1 %v4159_v54  ;;  %v342_v0 = vadd.f32 %v341_v51, %v340_v60  ;;  %v287_v41 = vrot.slane %v286_v39, 1  ;;  %v366_v54 = vmul.f32 0.0625, %v302_v56  ;;  %v522_v60 = vpack.c.bf16 %v373_v63, %v373_v63  ;;  %v4164_v51 = vld [vmem:[%s5147_s28 + $0x190] sm:$0xff]  ;;  %v4171_v63 = vld [vmem:[%s5147_s28 + $0x1c8] sm:$0xff] }
  0x5b   : > { %1045 = vmatpush.bf16.msrb.mxu2 %v4167_v62  ;;  %v374_v62 = vmul.f32 0.0625, %v358_v47  ;;  %v512_v32 = vpack.c.bf16 %v363_v34, %v363_v34  ;;  %v520_v49 = vpack.c.bf16 %v371_v53, %v371_v53  ;;  %v4146_v53 = vld [vmem:[%s5147_s28 + $0x100] sm:$0xff] }
  0x5c   : > { %1058 = vmatpush.bf16.msrb.mxu3 %v4175_v45  ;;  %v343_v31 = vrot.slane %v342_v0, 1  ;;  %v288_v61 = vadd.f32 %v287_v41, %v286_v39  ;;  %v515_v42 = vpack.c.bf16 %v366_v54, %v366_v54  ;;  %v4147_v39 = vld [vmem:[%s5147_s28 + $0x108] sm:$0xff]  ;;  %v554_v47 = vunpack.c.l.b16 %v522_v60  ;;  %v4154_v54 = vld [vmem:[%s5147_s28 + $0x140] sm:$0xff]  ;;  %v4193_v60 = vld [vmem:[%s5147_s28 + $0x478] sm:$0xff] }
  0x5d   : > { %1020 = vmatpush.bf16.msrb.mxu0 %v4150_v20  ;;  %v4172_v20 = vld [vmem:[%s5147_s28 + $0x1d0] sm:$0xff]  ;;  %v552_v41 = vunpack.c.l.b16 %v520_v49  ;;  %v1189_v49 = vmax.f32 %v233_v7, %v241_v11  ;;  %v1119_v7 = vmax.f32 %v215_v14, %v223_v15  ;;  %v1175_v11 = vmax.f32 %v231_v18, %v239_v19 }
  0x5e   : > { %1033 = vmatpush.bf16.msrb.mxu1 %v4158_v33  ;;  %v344_v45 = vadd.f32 %v343_v31, %v342_v0  ;;  %v364_v23 = vmul.f32 0.0625, %v288_v61  ;;  %v523_v33 = vpack.c.bf16 %v374_v62, %v374_v62  ;;  %v544_v0 = vunpack.c.l.b16 %v512_v32  ;;  %v4200_v18 = vld [vmem:[%s5147_s28 + $0x4b0] sm:$0xff] }
  0x5f   : > { %1046 = vmatpush.bf16.msrb.mxu2 %v4166_v43  ;;  %v4155_v43 = vld [vmem:[%s5147_s28 + $0x148] sm:$0xff]  ;;  %v547_v31 = vunpack.c.l.b16 %v515_v42  ;;  %v1133_v32 = vmax.f32 %v217_v5, %v225_v6  ;;  %v1190_v6 = vrot.slane %v1189_v49, 4  ;;  %v4208_v19 = vld [vmem:[%s5147_s28 + $0x4f0] sm:$0xff]  ;;  %v1176_v1 = vrot.slane %v1175_v11, 4 }
  0x60   : > { %1059 = vmatpush.bf16.msrb.mxu3 %v4174_v59  ;;  %v372_v35 = vmul.f32 0.0625, %v344_v45  ;;  %v513_v50 = vpack.c.bf16 %v364_v23, %v364_v23  ;;  %v546_v59 = vunpack.c.l.b16 %v514_v25  ;;  %v561_v62 = vsel %vm556_vm0, %v552_v41, %v544_v0  ;;  %v4185_v25 = vld [vmem:[%s5147_s28 + $0x438] sm:$0xff]  ;;  %v5360_v42 = vld [vmem:[%s5096_s3 + $0x8] sm:$0xff] }
  0x61   : > { %1021 = vmatpush.bf16.msrb.mxu0 %v4149_v48  ;;  %v555_v48 = vunpack.c.l.b16 %v523_v33  ;;  %v1134_v5 = vrot.slane %v1133_v32, 4  ;;  %v5384_v14 = vunpack.c.l.bf16 %v5360_v42  ;;  %v1191_v2 = vmax.f32 %v1189_v49, %v1190_v6 }
  0x62   : > { %1034 = vmatpush.bf16.msrb.mxu1 %v4157_v24  ;;  %v521_v56 = vpack.c.bf16 %v372_v35, %v372_v35  ;;  %v545_v24 = vunpack.c.l.b16 %v513_v50  ;;  %v563_v61 = vsel %vm556_vm0, %v554_v47, %v546_v59  ;;  %v4201_v35 = vld [vmem:[%s5147_s28 + $0x4b8] sm:$0xff]  ;;  %v6162_v59 = vunpack.c.h.bf16 %v5115_v3 }
  0x63   : > { %1047 = vmatpush.bf16.msrb.mxu2 %v4165_v21  ;;  %v4162_v21 = vld [vmem:[%s5147_s28 + $0x180] sm:$0xff]  ;;  %v564_v45 = vsel %vm556_vm0, %v555_v48, %v547_v31  ;;  %v1135_v0 = vmax.f32 %v1133_v32, %v1134_v5  ;;  %v1120_v41 = vrot.slane %v1119_v7, 4 }
  0x64   : > { %1060 = vmatpush.bf16.msrb.mxu3 %v4173_v36  ;;  %v553_v34 = vunpack.c.l.b16 %v521_v56  ;;  %v4170_v36 = vld [vmem:[%s5147_s28 + $0x1c0] sm:$0xff]  ;;  %v572_v33 = vpack.c.b16 %v564_v45, %v564_v45  ;;  %v4184_v56 = vld [vmem:[%s5147_s28 + $0x430] sm:$0xff]  ;;  %v1196_v47 = vmax.f32 %v6162_v59, %v242_v26 }
  0x65   : > { %1022 = vmatpush.bf16.msrb.mxu0 %v4148_v44  ;;  %v4209_v44 = vld [vmem:[%s5147_s28 + $0x4f8] sm:$0xff]  ;;  %v1136_v48 = vrot.slane %v1135_v0, 2  ;;  %v4190_v5 = vld [vmem:[%s5147_s28 + $0x460] sm:$0xff] }
  0x66   : > { %1035 = vmatpush.bf16.msrb.mxu1 %v4156_v28  ;;  %v562_v23 = vsel %vm556_vm0, %v553_v34, %v545_v24  ;;  %v571_v28 = vpack.c.b16 %v563_v61, %v563_v61  ;;  %v1197_v4 = vrot.slane %v1196_v47, 4  ;;  %v1192_v24 = vrot.slane %v1191_v2, 2 }
  0x67   : > { %1048 = vmatpush.bf16.msrb.mxu2 %v4164_v51  ;;  %v5363_v51 = vld [vmem:[%s5096_s3 + $0x28] sm:$0xff]  ;;  %v570_v50 = vpack.c.b16 %v562_v23, %v562_v23  ;;  %v1121_v34 = vmax.f32 %v1119_v7, %v1120_v41 }
  0x68   : > { %1061 = vmatpush.bf16.msrb.mxu3 %v4172_v20  ;;  %v569_v20 = vpack.c.b16 %v561_v62, %v561_v62  ;;  %v5387_v15 = vunpack.c.l.bf16 %v5363_v51  ;;  %v1137_v62 = vmax.f32 %v1135_v0, %v1136_v48  ;;  %v1193_v45 = vmax.f32 %v1191_v2, %v1192_v24 }
  0x69   : > { %1023 = vmatpush.bf16.msrb.mxu0 %v4147_v39  ;;  %v4192_v39 = vld [vmem:[%s5147_s28 + $0x470] sm:$0xff]  ;;  %v1122_v23 = vrot.slane %v1121_v34, 2 }
  0x6a   : > { %1036 = vmatpush.bf16.msrb.mxu1 %v4155_v43  ;;  %v1140_v43 = vmax.f32 %v218_v10, %v226_v16  ;;  %v6163_v10 = vunpack.c.h.bf16 %v5127_v9  ;;  %v6164_v16 = vunpack.c.h.bf16 %v5124_v8  ;;  %v4191_v9 = vld [vmem:[%s5147_s28 + $0x468] sm:$0xff]  ;;  %v1198_v8 = vmax.f32 %v1196_v47, %v1197_v4 }
  0x6b   : > { %1049 = vmatpush.bf16.msrb.mxu2 %v4163_v27  ;;  %v6165_v27 = vunpack.c.h.bf16 %v5135_v13  ;;  %v4207_v13 = vld [vmem:[%s5147_s28 + $0x4e8] sm:$0xff]  ;;  %v1138_v32 = vrot.slane %v1137_v62, 1  ;;  %v1194_v49 = vrot.slane %v1193_v45, 1 }
  0x6c   : > { %1062 = vmatpush.bf16.msrb.mxu3 %v4171_v63  ;;  %v1141_v3 = vrot.slane %v1140_v43, 4  ;;  %v1126_v26 = vmax.f32 %v6164_v16, %v6163_v10  ;;  %v6166_v63 = vunpack.c.h.bf16 %v5132_v12  ;;  %v4199_v12 = vld [vmem:[%s5147_s28 + $0x4a8] sm:$0xff] }
  0x6d   : > { %1024 = vmatpush.bf16.msrb.mxu0 %v4146_v53  ;;  %v1177_v53 = vmax.f32 %v1175_v11, %v1176_v1  ;;  %v1139_v59 = vmax.f32 %v1137_v62, %v1138_v32  ;;  %v1195_v47 = vmax.f32 %v1193_v45, %v1194_v49 }
  0x6e   : > { %1037 = vmatpush.bf16.msrb.mxu1 %v4154_v54  ;;  %v1182_v31 = vmax.f32 %v6166_v63, %v6165_v27  ;;  %v4183_v54 = vld [vmem:[%s5147_s28 + $0x428] sm:$0xff]  ;;  %v1142_v61 = vmax.f32 %v1140_v43, %v1141_v3  ;;  %v4206_v43 = vld [vmem:[%s5147_s28 + $0x4e0] sm:$0xff]  ;;  %v4189_v27 = vld [vmem:[%s5147_s28 + $0x458] sm:$0xff] }
  0x6f   : > { %1050 = vmatpush.bf16.msrb.mxu2 %v4162_v21  ;;  %v1127_v21 = vrot.slane %v1126_v26, 4  ;;  %v1233_v3 = vpack.c.bf16 %v1139_v59, %v1139_v59  ;;  %v1241_v4 = vpack.c.bf16 %v1195_v47, %v1195_v47 }
  0x70   : > { %1063 = vmatpush.bf16.msrb.mxu3 %v4170_v36  ;;  %1025 = vmatmul.bf16.vlgmr.msrb.gmra.mxu0 %v569_v20  ;;  %v1183_v36 = vrot.slane %v1182_v31, 4  ;;  %v1123_v20 = vmax.f32 %v1121_v34, %v1122_v23  ;;  %v4197_v34 = vld [vmem:[%s5147_s28 + $0x498] sm:$0xff] }
  0x71   : > { %1819 = vmatpush.bf16.msra.mxu0 %v4185_v25  ;;  %1038 = vmatmul.bf16.vlgmr.msrb.gmra.mxu1 %v570_v50  ;;  %v1178_v25 = vrot.slane %v1177_v53, 2  ;;  %v4182_v50 = vld [vmem:[%s5147_s28 + $0x420] sm:$0xff] }
  0x72   : > { %1832 = vmatpush.bf16.msra.mxu1 %v4193_v60  ;;  %1051 = vmatmul.bf16.vlgmr.msrb.gmra.mxu2 %v571_v28  ;;  %v1143_v60 = vrot.slane %v1142_v61, 2  ;;  %v1184_v28 = vmax.f32 %v1182_v31, %v1183_v36 }
  0x73   : > { %1845 = vmatpush.bf16.msra.mxu2 %v4201_v35  ;;  %1064 = vmatmul.bf16.vlgmr.msrb.gmra.mxu3 %v572_v33  ;;  %v1199_v35 = vrot.slane %v1198_v8, 2  ;;  %v1179_v33 = vmax.f32 %v1177_v53, %v1178_v25  ;;  %v4205_v53 = vld [vmem:[%s5147_s28 + $0x4d8] sm:$0xff]  ;;  %v6167_v25 = vunpack.c.l.bf16 %v5208_v37 }
  0x74   : > { %1858 = vmatpush.bf16.msra.mxu3 %v4209_v44  ;;  %v1128_v44 = vmax.f32 %v1126_v26, %v1127_v21  ;;  %v1144_v6 = vmax.f32 %v1142_v61, %v1143_v60  ;;  %v4181_v26 = vld [vmem:[%s5147_s28 + $0x418] sm:$0xff]  ;;  %v6168_v60 = vunpack.c.l.bf16 %v5204_v29 }
  0x75   : > { %1820 = vmatpush.bf16.msra.mxu0 %v4184_v56  ;;  %v1200_v7 = vmax.f32 %v1198_v8, %v1199_v35  ;;  %v1185_v56 = vrot.slane %v1184_v28, 2 }
  0x76   : > { %1833 = vmatpush.bf16.msra.mxu1 %v4192_v39  ;;  %v1129_v11 = vrot.slane %v1128_v44, 2  ;;  %v4198_v39 = vld [vmem:[%s5147_s28 + $0x4a0] sm:$0xff]  ;;  %v1145_v0 = vrot.slane %v1144_v6, 1  ;;  %v1161_v35 = vmax.f32 %v6168_v60, %v6167_v25 }
  0x77   : > { %1846 = vmatpush.bf16.msra.mxu2 %v4200_v18  ;;  %v1124_v18 = vrot.slane %v1123_v20, 1  ;;  %v1201_v2 = vrot.slane %v1200_v7, 1  ;;  %v1186_v1 = vmax.f32 %v1184_v28, %v1185_v56  ;;  %v4188_v28 = vld [vmem:[%s5147_s28 + $0x450] sm:$0xff]  ;;  %v6169_v56 = vunpack.c.l.bf16 %v5216_v46 }
  0x78   : > { %1859 = vmatpush.bf16.msra.mxu3 %v4208_v19  ;;  %v1180_v19 = vrot.slane %v1179_v33, 1  ;;  %v1130_v41 = vmax.f32 %v1128_v44, %v1129_v11  ;;  %v1146_v63 = vmax.f32 %v1144_v6, %v1145_v0  ;;  %v4180_v44 = vld [vmem:[%s5147_s28 + $0x410] sm:$0xff]  ;;  %v1162_v11 = vrot.slane %v1161_v35, 4 }
  0x79   : > { %1821 = vmatpush.bf16.msra.mxu0 %v4183_v54  ;;  %v1125_v10 = vmax.f32 %v1123_v20, %v1124_v18  ;;  %v1202_v31 = vmax.f32 %v1200_v7, %v1201_v2  ;;  %v1187_v24 = vrot.slane %v1186_v1, 1  ;;  %v1397_v54 = vunpack.c.l.b16 %v1233_v3 }
  0x7a   : > { %1834 = vmatpush.bf16.msra.mxu1 %v4191_v9  ;;  %v1181_v16 = vmax.f32 %v1179_v33, %v1180_v19  ;;  %v1131_v48 = vrot.slane %v1130_v41, 1  ;;  %v1405_v9 = vunpack.c.l.b16 %v1241_v4  ;;  %v1234_v21 = vpack.c.bf16 %v1146_v63, %v1146_v63 }
  0x7b   : > { %1847 = vmatpush.bf16.msra.mxu2 %v4199_v12  ;;  %v1231_v61 = vpack.c.bf16 %v1125_v10, %v1125_v10  ;;  %v1242_v36 = vpack.c.bf16 %v1202_v31, %v1202_v31  ;;  %v6171_v19 = vunpack.c.l.bf16 %v5233_v57  ;;  %v6172_v0 = vunpack.c.l.bf16 %v5224_v52  ;;  %v4179_v10 = vld [vmem:[%s5147_s28 + $0x408] sm:$0xff]  ;;  %v4178_v57 = vld [vmem:[%s5147_s28 + $0x400] sm:$0xff] }
  0x7c   : > { %1860 = vmatpush.bf16.msra.mxu3 %v4207_v13  ;;  %v1239_v8 = vpack.c.bf16 %v1181_v16, %v1181_v16  ;;  %v1132_v12 = vmax.f32 %v1130_v41, %v1131_v48  ;;  %v1188_v13 = vmax.f32 %v1186_v1, %v1187_v24  ;;  %v5412_v62 = vsel %vm556_vm0, %v1405_v9, %v1397_v54  ;;  %v4187_v16 = vld [vmem:[%s5147_s28 + $0x448] sm:$0xff] }
  0x7d   : > { %1822 = vmatpush.bf16.msra.mxu0 %v4182_v50  ;;  %v1395_v45 = vunpack.c.l.b16 %v1231_v61  ;;  %v1421_v32 = vpack.c.b16 %v5412_v62, %v5412_v62  ;;  %v1398_v49 = vunpack.c.l.b16 %v1234_v21  ;;  %v1406_v20 = vunpack.c.l.b16 %v1242_v36  ;;  %v4196_v50 = vld [vmem:[%s5147_s28 + $0x490] sm:$0xff]  ;;  %v4195_v61 = vld [vmem:[%s5147_s28 + $0x488] sm:$0xff] }
  0x7e   : > { %1835 = vmatpush.bf16.msra.mxu1 %v4190_v5  ;;  %v1403_v23 = vunpack.c.l.b16 %v1239_v8  ;;  %v1232_v33 = vpack.c.bf16 %v1132_v12, %v1132_v12  ;;  %v4204_v5 = vld [vmem:[%s5147_s28 + $0x4d0] sm:$0xff]  ;;  %v1240_v7 = vpack.c.bf16 %v1188_v13, %v1188_v13  ;;  %v1147_v2 = vmax.f32 %v6172_v0, %v6171_v19  ;;  %v4203_v8 = vld [vmem:[%s5147_s28 + $0x4c8] sm:$0xff] }
  0x7f   : > { %1848 = vmatpush.bf16.msra.mxu2 %v4198_v39  ;;  %v6170_v39 = vunpack.c.l.bf16 %v5211_v38  ;;  %v5434_v47 = vsel %vm556_vm0, %v1406_v20, %v1398_v49  ;;  %v1163_v3 = vmax.f32 %v1161_v35, %v1162_v11  ;;  %v6174_v63 = vunpack.c.l.bf16 %v5236_v58  ;;  %v4186_v35 = vld [vmem:[%s5147_s28 + $0x440] sm:$0xff]  ;;  %v4225_v11 = vld [vmem:[%s5147_s28 + $0x578] sm:$0xff] }
  0x80   : > { %1861 = vmatpush.bf16.msra.mxu3 %v4206_v43  ;;  %v5425_v6 = vsel %vm556_vm0, %v1403_v23, %v1395_v45  ;;  %v1396_v18 = vunpack.c.l.b16 %v1232_v33  ;;  %v1422_v41 = vpack.c.b16 %v5434_v47, %v5434_v47  ;;  %v1404_v1 = vunpack.c.l.b16 %v1240_v7  ;;  %v4202_v49 = vld [vmem:[%s5147_s28 + $0x4c0] sm:$0xff]  ;;  %v4217_v7 = vld [vmem:[%s5147_s28 + $0x538] sm:$0xff] }
  0x81   : > { %1823 = vmatpush.bf16.msra.mxu0 %v4181_v26  ;;  %v1217_v43 = vmax.f32 %v6170_v39, %v6169_v56  ;;  %v1419_v59 = vpack.c.b16 %v5425_v6, %v5425_v6  ;;  %v1148_v26 = vrot.slane %v1147_v2, 4  ;;  %v6175_v48 = vunpack.c.h.bf16 %v5208_v37  ;;  %v4233_v58 = vld [vmem:[%s5147_s28 + $0x5b8] sm:$0xff] }
  0x82   : > { %1836 = vmatpush.bf16.msra.mxu1 %v4189_v27  ;;  %v6173_v27 = vunpack.c.l.bf16 %v5247_v17  ;;  %v6176_v24 = vunpack.c.h.bf16 %v5204_v29  ;;  %v6178_v54 = vunpack.c.h.bf16 %v5211_v38  ;;  %v5459_v21 = vsel %vm556_vm0, %v1404_v1, %v1396_v18  ;;  %v5478_v18 = vld [vmem:[%s5096_s3 + $0x48] sm:$0xff] }
  0x83   : > { %1849 = vmatpush.bf16.msra.mxu2 %v4197_v34  ;;  %v1218_v4 = vrot.slane %v1217_v43, 4  ;;  %v1164_v36 = vrot.slane %v1163_v3, 2  ;;  %v1154_v29 = vmax.f32 %v220_v22, %v228_v30  ;;  %v1420_v37 = vpack.c.b16 %v5459_v21, %v5459_v21  ;;  %v4239_v21 = vld [vmem:[%s5147_s28 + $0x5e8] sm:$0xff] }
  0x84   : > { %1862 = vmatpush.bf16.msra.mxu3 %v4205_v53  ;;  %v1203_v31 = vmax.f32 %v6174_v63, %v6173_v27  ;;  %v1168_v34 = vmax.f32 %v6176_v24, %v6175_v48  ;;  %v6177_v53 = vunpack.c.h.bf16 %v5216_v46  ;;  %v1149_v38 = vmax.f32 %v1147_v2, %v1148_v26  ;;  %v5483_v63 = vld [vmem:[%s5096_s3 + $0x68] sm:$0xff] }
  0x85   : > { %1824 = vmatpush.bf16.msra.mxu0 %v4180_v44  ;;  %v1219_v12 = vmax.f32 %v1217_v43, %v1218_v4  ;;  %v1165_v45 = vmax.f32 %v1163_v3, %v1164_v36  ;;  %v1155_v60 = vrot.slane %v1154_v29, 4  ;;  %v1210_v44 = vmax.f32 %v236_v40, %v244_v55  ;;  %v4241_v40 = vld [vmem:[%s5147_s28 + $0x5f8] sm:$0xff]  ;;  %v4216_v48 = vld [vmem:[%s5147_s28 + $0x530] sm:$0xff] }
  0x86   : > { %1837 = vmatpush.bf16.msra.mxu1 %v4188_v28  ;;  %v1224_v9 = vmax.f32 %v6178_v54, %v6177_v53  ;;  %v1204_v46 = vrot.slane %v1203_v31, 4  ;;  %v1169_v13 = vrot.slane %v1168_v34, 4  ;;  %v1150_v52 = vrot.slane %v1149_v38, 2  ;;  %v4194_v28 = vld [vmem:[%s5147_s28 + $0x480] sm:$0xff]  ;;  %v4224_v24 = vld [vmem:[%s5147_s28 + $0x570] sm:$0xff] }
  0x87   : > { %1850 = vmatpush.bf16.msra.mxu2 %v4196_v50  ;;  %v1220_v23 = vrot.slane %v1219_v12, 2  ;;  %v1166_v20 = vrot.slane %v1165_v45, 1  ;;  %v1211_v17 = vrot.slane %v1210_v44, 4  ;;  %v1975_v47 = vmul.f32 %v5384_v14, %v5384_v14 }
  0x88   : > { %1863 = vmatpush.bf16.msra.mxu3 %v4204_v5  ;;  %v1225_v25 = vrot.slane %v1224_v9, 4  ;;  %v1205_v22 = vmax.f32 %v1203_v31, %v1204_v46  ;;  %v1170_v30 = vmax.f32 %v1168_v34, %v1169_v13  ;;  %v1156_v5 = vmax.f32 %v1154_v29, %v1155_v60  ;;  %v4223_v60 = vld [vmem:[%s5147_s28 + $0x568] sm:$0xff] }
  0x89   : > { %1825 = vmatpush.bf16.msra.mxu0 %v4179_v10  ;;  %v1221_v33 = vmax.f32 %v1219_v12, %v1220_v23  ;;  %v1151_v56 = vmax.f32 %v1149_v38, %v1150_v52  ;;  %v1167_v55 = vmax.f32 %v1165_v45, %v1166_v20  ;;  %v1212_v10 = vmax.f32 %v1210_v44, %v1211_v17 }
  0x8a   : > { %1838 = vmatpush.bf16.msra.mxu1 %v4187_v16  ;;  %v1226_v50 = vmax.f32 %v1224_v9, %v1225_v25  ;;  %v1206_v39 = vrot.slane %v1205_v22, 2  ;;  %v1171_v43 = vrot.slane %v1170_v30, 2  ;;  %v1157_v2 = vrot.slane %v1156_v5, 2 }
  0x8b   : > { %1851 = vmatpush.bf16.msra.mxu2 %v4195_v61  ;;  %v1222_v19 = vrot.slane %v1221_v33, 1  ;;  %v1152_v1 = vrot.slane %v1151_v56, 1  ;;  %v1237_v26 = vpack.c.bf16 %v1167_v55, %v1167_v55  ;;  %v5486_v31 = vunpack.c.l.bf16 %v5478_v18  ;;  %v4232_v61 = vld [vmem:[%s5147_s28 + $0x5b0] sm:$0xff] }
  0x8c   : > { %1864 = vmatpush.bf16.msra.mxu3 %v4203_v8  ;;  %v1227_v0 = vrot.slane %v1226_v50, 2  ;;  %v1207_v3 = vmax.f32 %v1205_v22, %v1206_v39  ;;  %v1172_v4 = vmax.f32 %v1170_v30, %v1171_v43  ;;  %v1158_v9 = vmax.f32 %v1156_v5, %v1157_v2  ;;  %v4240_v8 = vld [vmem:[%s5147_s28 + $0x5f0] sm:$0xff]  ;;  %v4214_v5 = vld [vmem:[%s5147_s28 + $0x520] sm:$0xff] }
  0x8d   : > { %1826 = vmatpush.bf16.msra.mxu0 %v4178_v57  ;;  %v1223_v16 = vmax.f32 %v1221_v33, %v1222_v19  ;;  %v1153_v34 = vmax.f32 %v1151_v56, %v1152_v1  ;;  %v1401_v12 = vunpack.c.l.b16 %v1237_v26  ;;  %v1213_v38 = vrot.slane %v1212_v10, 2  ;;  %v4238_v43 = vld [vmem:[%s5147_s28 + $0x5e0] sm:$0xff]  ;;  %v4221_v26 = vld [vmem:[%s5147_s28 + $0x558] sm:$0xff] }
  0x8e   : > { %1839 = vmatpush.bf16.msra.mxu1 %v4186_v35  ;;  %v1228_v27 = vmax.f32 %v1226_v50, %v1227_v0  ;;  %v1208_v53 = vrot.slane %v1207_v3, 1  ;;  %v1173_v54 = vrot.slane %v1172_v4, 1  ;;  %v1159_v45 = vrot.slane %v1158_v9, 1  ;;  %v5531_v19 = vld [vmem:[%s5096_s3] sm:$0xff] }
  0x8f   : > { %1852 = vmatpush.bf16.msra.mxu2 %v4194_v28  ;;  %v1245_v36 = vpack.c.bf16 %v1223_v16, %v1223_v16  ;;  %v1967_v23 = vunpack.c.l.bf16 %v5483_v63  ;;  %v1214_v6 = vmax.f32 %v1212_v10, %v1213_v38  ;;  %v1983_v30 = vmul.f32 %v5387_v15, %v5387_v15  ;;  %v5537_v1 = vld [vmem:[%s5096_s3 + $0x20] sm:$0xff]  ;;  %v4213_v16 = vld [vmem:[%s5147_s28 + $0x518] sm:$0xff] }
  0x90   : > { %1865 = vmatpush.bf16.msra.mxu3 %v4202_v49  ;;  %v1229_v29 = vrot.slane %v1228_v27, 1  ;;  %1827 = vmatmul.bf16.vlgmr.msra.gmra.mxu0 %v1419_v59  ;;  %v1209_v46 = vmax.f32 %v1207_v3, %v1208_v53  ;;  %v1174_v13 = vmax.f32 %v1172_v4, %v1173_v54  ;;  %v4215_v59 = vld [vmem:[%s5147_s28 + $0x528] sm:$0xff]  ;;  %v1160_v52 = vmax.f32 %v1158_v9, %v1159_v45  ;;  %v4229_v53 = vld [vmem:[%s5147_s28 + $0x598] sm:$0xff] }
  0x91   : > { %1871 = vmatpush.bf16.msrb.mxu0 %v4217_v7  ;;  %1840 = vmatmul.bf16.vlgmr.msra.gmra.mxu1 %v1420_v37  ;;  %v1409_v62 = vunpack.c.l.b16 %v1245_v36  ;;  %v1215_v22 = vrot.slane %v1214_v6, 1  ;;  %v1944_v28 = vunpack.c.h.bf16 %v5360_v42  ;;  %v1991_v33 = vmul.f32 %v5486_v31, %v5486_v31  ;;  %v4222_v7 = vld [vmem:[%s5147_s28 + $0x560] sm:$0xff]  ;;  %v4237_v54 = vld [vmem:[%s5147_s28 + $0x5d8] sm:$0xff] }
  0x92   : > { %1884 = vmatpush.bf16.msrb.mxu1 %v4225_v11  ;;  %1853 = vmatmul.bf16.vlgmr.msra.gmra.mxu2 %v1421_v32  ;;  %v1235_v32 = vpack.c.bf16 %v1153_v34, %v1153_v34  ;;  %v1230_v25 = vmax.f32 %v1228_v27, %v1229_v29  ;;  %v1243_v57 = vpack.c.bf16 %v1209_v46, %v1209_v46  ;;  %v4230_v42 = vld [vmem:[%s5147_s28 + $0x5a0] sm:$0xff]  ;;  %v1952_v55 = vunpack.c.h.bf16 %v5363_v51 }
  0x93   : > { %1897 = vmatpush.bf16.msrb.mxu2 %v4233_v58  ;;  %1866 = vmatmul.bf16.vlgmr.msra.gmra.mxu3 %v1422_v41  ;;  %v1238_v35 = vpack.c.bf16 %v1174_v13, %v1174_v13  ;;  %v4231_v41 = vld [vmem:[%s5147_s28 + $0x5a8] sm:$0xff]  ;;  %v5512_v37 = vsel %vm556_vm0, %v1409_v62, %v1401_v12  ;;  %v1999_v50 = vmul.f32 %v1967_v23, %v1967_v23  ;;  %v1960_v4 = vunpack.c.h.bf16 %v5478_v18  ;;  %v4212_v62 = vld [vmem:[%s5147_s28 + $0x510] sm:$0xff] }
  0x94   : > { %1910 = vmatpush.bf16.msrb.mxu3 %v4241_v40  ;;  %v1246_v44 = vpack.c.bf16 %v1230_v25, %v1230_v25  ;;  %v1399_v49 = vunpack.c.l.b16 %v1235_v32  ;;  %v1407_v20 = vunpack.c.l.b16 %v1243_v57  ;;  %v1425_v11 = vpack.c.b16 %v5512_v37, %v5512_v37  ;;  %v4220_v32 = vld [vmem:[%s5147_s28 + $0x550] sm:$0xff]  ;;  %v4263_v37 = vld [vmem:[%s5147_s28 + $0x8a8] sm:$0xff] }
  0x95   : > { %1872 = vmatpush.bf16.msrb.mxu0 %v4216_v48  ;;  %v2007_v56 = vmul.f32 %v1975_v47, %v5384_v14  ;;  %v2015_v39 = vmul.f32 %v1983_v30, %v5387_v15  ;;  %v5527_v17 = vunpack.c.l.b16 %v1238_v35  ;;  %v1216_v58 = vmax.f32 %v1214_v6, %v1215_v22  ;;  %v4228_v57 = vld [vmem:[%s5147_s28 + $0x590] sm:$0xff] }
  0x96   : > { %1885 = vmatpush.bf16.msrb.mxu1 %v4224_v24  ;;  %v1236_v40 = vpack.c.bf16 %v1160_v52, %v1160_v52  ;;  %v5533_v0 = vunpack.c.l.b16 %v1246_v44  ;;  %v2023_v14 = vmul.f32 %v1991_v33, %v5486_v31  ;;  %v2031_v15 = vmul.f32 %v1999_v50, %v1967_v23  ;;  %v5547_v24 = vld [vmem:[%s5096_s3 + $0x40] sm:$0xff]  ;;  %v4236_v35 = vld [vmem:[%s5147_s28 + $0x5d0] sm:$0xff] }
  0x97   : > { %1898 = vmatpush.bf16.msrb.mxu2 %v4232_v61  ;;  %v2051_v2 = vadd.f32 %v2015_v39, %v2007_v56  ;;  %v5540_v3 = vsel %vm556_vm0, %v1407_v20, %v1399_v49  ;;  %v1968_v51 = vunpack.c.h.bf16 %v5483_v63  ;;  %v1976_v10 = vmul.f32 %v1944_v28, %v1944_v28  ;;  %v5553_v61 = vld [vmem:[%s5096_s3 + $0x60] sm:$0xff] }
  0x98   : > { %1911 = vmatpush.bf16.msrb.mxu3 %v4240_v8  ;;  %v2107_v31 = vadd.f32 %v2031_v15, %v2023_v14  ;;  %v1984_v48 = vmul.f32 %v1952_v55, %v1952_v55  ;;  %v1941_v34 = vunpack.c.l.bf16 %v5531_v19  ;;  %v1244_v18 = vpack.c.bf16 %v1216_v58, %v1216_v58  ;;  %v4227_v58 = vld [vmem:[%s5147_s28 + $0x588] sm:$0xff] }
  0x99   : > { %1873 = vmatpush.bf16.msrb.mxu0 %v4215_v59  ;;  %v2052_v27 = vrot.slane %v2051_v2, 4  ;;  %v1992_v63 = vmul.f32 %v1960_v4, %v1960_v4  ;;  %v2000_v9 = vmul.f32 %v1968_v51, %v1968_v51  ;;  %v1949_v8 = vunpack.c.l.bf16 %v5537_v1 }
  0x9a   : > { %1886 = vmatpush.bf16.msrb.mxu1 %v4223_v60  ;;  %v1400_v36 = vunpack.c.l.b16 %v1236_v40  ;;  %v2108_v29 = vrot.slane %v2107_v31, 4  ;;  %v2008_v38 = vmul.f32 %v1976_v10, %v1944_v28  ;;  %v2016_v46 = vmul.f32 %v1984_v48, %v1952_v55  ;;  %v4235_v40 = vld [vmem:[%s5147_s28 + $0x5c8] sm:$0xff]  ;;  %v4210_v48 = vld [vmem:[%s5147_s28 + $0x500] sm:$0xff] }
  0x9b   : > { %1899 = vmatpush.bf16.msrb.mxu2 %v4231_v41  ;;  %v2053_v12 = vadd.f32 %v2052_v27, %v2051_v2  ;;  %v2024_v13 = vmul.f32 %v1992_v63, %v1960_v4  ;;  %v2032_v45 = vmul.f32 %v2000_v9, %v1968_v51  ;;  %v1957_v23 = vunpack.c.l.bf16 %v5547_v24  ;;  %v4226_v9 = vld [vmem:[%s5147_s28 + $0x580] sm:$0xff] }
  0x9c   : > { %1912 = vmatpush.bf16.msrb.mxu3 %v4239_v21  ;;  %v2109_v6 = vadd.f32 %v2108_v29, %v2107_v31  ;;  %v1965_v59 = vunpack.c.l.bf16 %v5553_v61  ;;  %v1973_v60 = vmul.f32 %v1941_v34, %v1941_v34  ;;  %v1408_v47 = vunpack.c.l.b16 %v1244_v18  ;;  %v4249_v29 = vld [vmem:[%s5147_s28 + $0x838] sm:$0xff] }
  0x9d   : > { %1874 = vmatpush.bf16.msrb.mxu0 %v4214_v5  ;;  %v2054_v25 = vrot.slane %v2053_v12, 2  ;;  %v2058_v41 = vadd.f32 %v2016_v46, %v2008_v38  ;;  %v2114_v21 = vadd.f32 %v2032_v45, %v2024_v13  ;;  %v1981_v52 = vmul.f32 %v1949_v8, %v1949_v8  ;;  %v4211_v5 = vld [vmem:[%s5147_s28 + $0x508] sm:$0xff]  ;;  %v4257_v38 = vld [vmem:[%s5147_s28 + $0x878] sm:$0xff] }
  0x9e   : > { %1887 = vmatpush.bf16.msrb.mxu1 %v4222_v7  ;;  %v2110_v30 = vrot.slane %v2109_v6, 2  ;;  %v1989_v44 = vmul.f32 %v1957_v23, %v1957_v23  ;;  %v1997_v28 = vmul.f32 %v1965_v59, %v1965_v59  ;;  %v2005_v33 = vmul.f32 %v1973_v60, %v1941_v34  ;;  %v4219_v7 = vld [vmem:[%s5147_s28 + $0x548] sm:$0xff]  ;;  %v4218_v34 = vld [vmem:[%s5147_s28 + $0x540] sm:$0xff] }
  0x9f   : > { %1900 = vmatpush.bf16.msrb.mxu2 %v4230_v42  ;;  %v2055_v22 = vadd.f32 %v2054_v25, %v2053_v12  ;;  %v2059_v49 = vrot.slane %v2058_v41, 4  ;;  %v2115_v20 = vrot.slane %v2114_v21, 4  ;;  %v2013_v50 = vmul.f32 %v1981_v52, %v1949_v8  ;;  %v4248_v52 = vld [vmem:[%s5147_s28 + $0x830] sm:$0xff] }
  0xa0   : > { %1913 = vmatpush.bf16.msrb.mxu3 %v4238_v43  ;;  %v2111_v39 = vadd.f32 %v2110_v30, %v2109_v6  ;;  %v2021_v42 = vmul.f32 %v1989_v44, %v1957_v23  ;;  %v2029_v43 = vmul.f32 %v1997_v28, %v1965_v59  ;;  %v1423_v2 = vpack.c.b16 %v5540_v3, %v5540_v3  ;;  %v4265_v23 = vld [vmem:[%s5147_s28 + $0x8b8] sm:$0xff] }
  0xa1   : > { %1875 = vmatpush.bf16.msrb.mxu0 %v4213_v16  ;;  %v2056_v56 = vrot.slane %v2055_v22, 1  ;;  %v2060_v55 = vadd.f32 %v2059_v49, %v2058_v41  ;;  %v2116_v14 = vadd.f32 %v2115_v20, %v2114_v21  ;;  %v2037_v15 = vadd.f32 %v2013_v50, %v2005_v33  ;;  %v4264_v49 = vld [vmem:[%s5147_s28 + $0x8b0] sm:$0xff] }
  0xa2   : > { %1888 = vmatpush.bf16.msrb.mxu1 %v4221_v26  ;;  %v2112_v51 = vrot.slane %v2111_v39, 1  ;;  %v2093_v10 = vadd.f32 %v2029_v43, %v2021_v42  ;;  %v1418_v16 = vsel %vm556_vm0, %v5533_v0, %v5527_v17  ;;  %v4234_v17 = vld [vmem:[%s5147_s28 + $0x5c0] sm:$0xff]  ;;  %v1950_v59 = vunpack.c.h.bf16 %v5537_v1  ;;  %v4272_v20 = vld [vmem:[%s5147_s28 + $0x8f0] sm:$0xff] }
  0xa3   : > { %1901 = vmatpush.bf16.msrb.mxu2 %v4229_v53  ;;  %v2057_v4 = vadd.f32 %v2056_v56, %v2055_v22  ;;  %v2061_v26 = vrot.slane %v2060_v55, 2  ;;  %v2117_v27 = vrot.slane %v2116_v14, 2  ;;  %v2038_v31 = vrot.slane %v2037_v15, 4  ;;  %v4256_v22 = vld [vmem:[%s5147_s28 + $0x870] sm:$0xff]  ;;  %v4247_v56 = vld [vmem:[%s5147_s28 + $0x828] sm:$0xff] }
  0xa4   : > { %1914 = vmatpush.bf16.msrb.mxu3 %v4237_v54  ;;  %v1416_v53 = vsel %vm556_vm0, %v1408_v47, %v1400_v36  ;;  %v2113_v54 = vadd.f32 %v2112_v51, %v2111_v39  ;;  %v2094_v63 = vrot.slane %v2093_v10, 4  ;;  %v1942_v36 = vunpack.c.h.bf16 %v5531_v19  ;;  %v4255_v39 = vld [vmem:[%s5147_s28 + $0x868] sm:$0xff] }
  0xa5   : > { %1876 = vmatpush.bf16.msrb.mxu0 %v4212_v62  ;;  %v2151_v18 = vmul.f32 0.0625, %v2057_v4  ;;  %v2062_v0 = vadd.f32 %v2061_v26, %v2060_v55  ;;  %v2118_v8 = vadd.f32 %v2117_v27, %v2116_v14  ;;  %v2039_v12 = vadd.f32 %v2038_v31, %v2037_v15  ;;  %v4273_v62 = vld [vmem:[%s5147_s28 + $0x8f8] sm:$0xff]  ;;  %v4246_v26 = vld [vmem:[%s5147_s28 + $0x820] sm:$0xff] }
  0xa6   : > { %1889 = vmatpush.bf16.msrb.mxu1 %v4220_v32  ;;  %v2159_v46 = vmul.f32 0.0625, %v2113_v54  ;;  %v2095_v45 = vadd.f32 %v2094_v63, %v2093_v10  ;;  %v1426_v60 = vpack.c.b16 %v1418_v16, %v1418_v16  ;;  %v1424_v19 = vpack.c.b16 %v1416_v53, %v1416_v53  ;;  %v4254_v27 = vld [vmem:[%s5147_s28 + $0x860] sm:$0xff] }
  0xa7   : > { %1902 = vmatpush.bf16.msrb.mxu2 %v4228_v57  ;;  %v5578_v13 = vmax.f32 %v2151_v18, 1e-30  ;;  %v2063_v32 = vrot.slane %v2062_v0, 1  ;;  %v2119_v25 = vrot.slane %v2118_v8, 1  ;;  %v2040_v6 = vrot.slane %v2039_v12, 2  ;;  %v4262_v53 = vld [vmem:[%s5147_s28 + $0x8a0] sm:$0xff] }
  0xa8   : > { %1915 = vmatpush.bf16.msrb.mxu3 %v4236_v35  ;;  %v5584_v57 = vmax.f32 %v2159_v46, 1e-30  ;;  %v2096_v47 = vrot.slane %v2095_v45, 2  ;;  %v1958_v21 = vunpack.c.h.bf16 %v5547_v24  ;;  %v1966_v1 = vunpack.c.h.bf16 %v5553_v61  ;;  %v4270_v54 = vld [vmem:[%s5147_s28 + $0x8e0] sm:$0xff] }
  0xa9   : > { %1877 = vmatpush.bf16.msrb.mxu0 %v4211_v5  ;;  %v5587_v35 = vand.u32 2147483647, %v5578_v13  ;;  %v2064_v41 = vadd.f32 %v2063_v32, %v2062_v0  ;;  %v2120_v44 = vadd.f32 %v2119_v25, %v2118_v8  ;;  %v1974_v28 = vmul.f32 %v1942_v36, %v1942_v36  ;;  %v4253_v0 = vld [vmem:[%s5147_s28 + $0x858] sm:$0xff] }
  0xaa   : > { %1890 = vmatpush.bf16.msrb.mxu1 %v4219_v7  ;;  %v5595_v30 = vand.u32 2147483647, %v5584_v57  ;;  %v2041_v33 = vadd.f32 %v2040_v6, %v2039_v12  ;;  %v2097_v61 = vadd.f32 %v2096_v47, %v2095_v45  ;;  %v1982_v50 = vmul.f32 %v1950_v59, %v1950_v59  ;;  %v4252_v47 = vld [vmem:[%s5147_s28 + $0x850] sm:$0xff] }
  0xab   : > { %1903 = vmatpush.bf16.msrb.mxu2 %v4227_v58  ;;  %4769 = vlog2.f32 %v5587_v35  ;;  %v2152_v24 = vmul.f32 0.0625, %v2064_v41  ;;  %v1990_v5 = vmul.f32 %v1958_v21, %v1958_v21  ;;  %v1998_v7 = vmul.f32 %v1966_v1, %v1966_v1 }
  0xac   : > { %1916 = vmatpush.bf16.msrb.mxu3 %v4235_v40  ;;  %4771 = vlog2.f32 %v5595_v30  ;;  %v2160_v42 = vmul.f32 0.0625, %v2120_v44  ;;  %v2042_v3 = vrot.slane %v2041_v33, 1  ;;  %v2098_v58 = vrot.slane %v2097_v61, 1 }
  0xad   : > { %1878 = vmatpush.bf16.msrb.mxu0 %v4210_v48  ;;  %v5608_v43 = vmax.f32 %v2152_v24, 1e-30  ;;  %v2006_v40 = vmul.f32 %v1974_v28, %v1942_v36  ;;  %v2014_v55 = vmul.f32 %v1982_v50, %v1950_v59  ;;  %v2022_v51 = vmul.f32 %v1990_v5, %v1958_v21 }
  0xae   : > { %1891 = vmatpush.bf16.msrb.mxu1 %v4218_v34  ;;  %v5612_v15 = vmax.f32 %v2160_v42, 1e-30  ;;  %v2030_v10 = vmul.f32 %v1998_v7, %v1966_v1  ;;  %v2043_v48 = vadd.f32 %v2042_v3, %v2041_v33  ;;  %v2099_v34 = vadd.f32 %v2098_v58, %v2097_v61  ;;  %v4260_v1 = vld [vmem:[%s5147_s28 + $0x890] sm:$0xff]  ;;  %v4243_v33 = vld [vmem:[%s5147_s28 + $0x808] sm:$0xff] }
  0xaf   : > { %1904 = vmatpush.bf16.msrb.mxu2 %v4226_v9  ;;  %v2044_v63 = vadd.f32 %v2014_v55, %v2006_v40  ;;  %v4251_v61 = vld [vmem:[%s5147_s28 + $0x848] sm:$0xff]  ;;  %v5658_v7 = vld [vmem:[%s5096_s3 + $0x10] sm:$0xff]  ;;  %vm4370_vm1 = vweird.f32 %v5587_v35  ;;  %v4373_v42 = vand.u32 2147483648, %v5578_v13  ;;  %vm4372_vm2 = vcmp.eq.f32.partialorder %v5587_v35, 0.0 }
  0xb0   : > { %1917 = vmatpush.bf16.msrb.mxu3 %v4234_v17  ;;  %1879 = vmatmul.bf16.vlgmr.msrb.gmra.mxu0 %v1423_v2  ;;  %v5615_v2 = vand.u32 2147483647, %v5608_v43  ;;  %v5621_v31 = vand.u32 2147483647, %v5612_v15  ;;  %v2100_v9 = vadd.f32 %v2030_v10, %v2022_v51  ;;  %v4245_v17 = vld [vmem:[%s5147_s28 + $0x818] sm:$0xff]  ;;  %v2149_v8 = vmul.f32 0.0625, %v2043_v48 }
  0xb1   : > { %2785 = vmatpush.bf16.msra.mxu0 %v4249_v29  ;;  %1892 = vmatmul.bf16.vlgmr.msrb.gmra.mxu1 %v1424_v19  ;;  %v4770_v14 = vpop.eup %4769  ;;  %v2157_v12 = vmul.f32 0.0625, %v2099_v34  ;;  %v4261_v29 = vld [vmem:[%s5147_s28 + $0x898] sm:$0xff]  ;;  %v2045_v46 = vrot.slane %v2044_v63, 4  ;;  %v4397_v40 = vand.u32 2147483648, %v5608_v43  ;;  %vm4355_vm3 = vcmp.lt.f32.partialorder %v5578_v13, 0.0  ;;  %v4250_v48 = vld [vmem:[%s5147_s28 + $0x840] sm:$0xff] }
  0xb2   : > { %2798 = vmatpush.bf16.msra.mxu1 %v4257_v38  ;;  %1905 = vmatmul.bf16.vlgmr.msrb.gmra.mxu2 %v1425_v11  ;;  %v4271_v11 = vld [vmem:[%s5147_s28 + $0x8e8] sm:$0xff]  ;;  %v4360_v4 = vmul.f32 -0.33333334, %v4770_v14  ;;  %v4772_v16 = vpop.eup %4771  ;;  %4773 = vlog2.f32 %v5615_v2  ;;  %v4269_v38 = vld [vmem:[%s5147_s28 + $0x8d8] sm:$0xff]  ;;  %v5630_v36 = vmax.f32 %v2149_v8, 1e-30  ;;  %vm4562_vm4 = vweird.f32 %v5595_v30 }
  0xb3   : > { %2811 = vmatpush.bf16.msra.mxu2 %v4265_v23  ;;  %1918 = vmatmul.bf16.vlgmr.msrb.gmra.mxu3 %v1426_v60  ;;  %v4552_v18 = vmul.f32 -0.33333334, %v4772_v16  ;;  %v5632_v23 = vmax.f32 %v2157_v12, 1e-30  ;;  %v2046_v25 = vadd.f32 %v2045_v46, %v2044_v63  ;;  %v2101_v6 = vrot.slane %v2100_v9, 4  ;;  %v4244_v60 = vld [vmem:[%s5147_s28 + $0x810] sm:$0xff] }
  0xb4   : > { %2824 = vmatpush.bf16.msra.mxu3 %v4273_v62  ;;  %4775 = vpow2.f32 %v4360_v4  ;;  %v5641_v41 = vand.u32 2147483647, %v5630_v36  ;;  %v5673_v55 = vld [vmem:[%s5096_s3 + $0x50] sm:$0xff]  ;;  %v4589_v4 = vand.u32 2147483648, %v5612_v15  ;;  %v5681_v16 = vunpack.c.l.bf16 %v5658_v7 }
  0xb5   : > { %2786 = vmatpush.bf16.msra.mxu0 %v4248_v52  ;;  %4777 = vlog2.f32 %v5621_v31  ;;  %v4268_v52 = vld [vmem:[%s5147_s28 + $0x8d0] sm:$0xff]  ;;  %v5648_v44 = vand.u32 2147483647, %v5632_v23  ;;  %v2102_v24 = vadd.f32 %v2101_v6, %v2100_v9  ;;  %vm4354_vm5 = vcmp.eq.f32.partialorder %v5578_v13, 0.0  ;;  %v4281_v46 = vld [vmem:[%s5147_s28 + $0x938] sm:$0xff] }
  0xb6   : > { %2799 = vmatpush.bf16.msra.mxu1 %v4256_v22  ;;  %4779 = vpow2.f32 %v4552_v18  ;;  %vm4564_vm6 = vcmp.eq.f32.partialorder %v5595_v30, 0.0  ;;  %v5691_v18 = vld [vmem:[%s5096_s3 + $0x70] sm:$0xff]  ;;  %vm4357_vm7 = vcmp.eq.f32.partialorder %v5587_v35, inf  ;;  %vm4547_vm8 = vcmp.lt.f32.partialorder %v5584_v57, 0.0 }
  0xb7   : > { %2812 = vmatpush.bf16.msra.mxu2 %v4264_v49  ;;  %v2103_v10 = vrot.slane %v2102_v24, 2  ;;  %vm4546_vm9 = vcmp.eq.f32.partialorder %v5584_v57, 0.0  ;;  %vm4549_vm10 = vcmp.eq.f32.partialorder %v5595_v30, inf  ;;  %vm4394_vm11 = vweird.f32 %v5615_v2 }
  0xb8   : > { %2825 = vmatpush.bf16.msra.mxu3 %v4272_v20  ;;  %v4774_v45 = vpop.eup %4773  ;;  %v2047_v20 = vrot.slane %v2046_v25, 2  ;;  %vm4396_vm12 = vcmp.eq.f32.partialorder %v5615_v2, 0.0  ;;  %vm4379_vm13 = vcmp.lt.f32.partialorder %v5608_v43, 0.0  ;;  %vm4586_vm15 = vweird.f32 %v5621_v31 }
  0xb9   : > { %2787 = vmatpush.bf16.msra.mxu0 %v4247_v56  ;;  %v4384_v32 = vmul.f32 -0.33333334, %v4774_v45  ;;  %v4259_v56 = vld [vmem:[%s5147_s28 + $0x888] sm:$0xff]  ;;  %v4289_v45 = vld [vmem:[%s5147_s28 + $0x978] sm:$0xff]  ;;  %vm4588_vm14 = vcmp.eq.f32.partialorder %v5621_v31, 0.0 }
  0xba   : > { %2800 = vmatpush.bf16.msra.mxu1 %v4255_v39  ;;  %v5634_v62 = vpop.eup %4775  ;;  %v4267_v39 = vld [vmem:[%s5147_s28 + $0x8c8] sm:$0xff]  ;;  %v2048_v51 = vadd.f32 %v2047_v20, %v2046_v25 }
  0xbb   : > { %2813 = vmatpush.bf16.msra.mxu2 %v4263_v37  ;;  %v4778_v59 = vpop.eup %4777  ;;  %v4362_v19 = vmul.f32 %v5634_v62, %v5634_v62  ;;  %4781 = vpow2.f32 %v4384_v32  ;;  %v4565_v37 = vand.u32 2147483648, %v5584_v57 }
  0xbc   : > { %2826 = vmatpush.bf16.msra.mxu3 %v4271_v11  ;;  %v5643_v21 = vpop.eup %4779  ;;  %v4576_v22 = vmul.f32 -0.33333334, %v4778_v59  ;;  %4783 = vlog2.f32 %v5641_v41  ;;  %v5667_v11 = vld [vmem:[%s5096_s3 + $0x30] sm:$0xff]  ;;  %v2049_v12 = vrot.slane %v2048_v51, 1 }
  0xbd   : > { %2788 = vmatpush.bf16.msra.mxu0 %v4246_v26  ;;  %v4363_v28 = vmul.f32 %v4362_v19, %v5587_v35  ;;  %v4554_v49 = vmul.f32 %v5643_v21, %v5643_v21  ;;  %v5694_v63 = vunpack.c.l.bf16 %v5667_v11 }
  0xbe   : > { %2801 = vmatpush.bf16.msra.mxu1 %v4254_v27  ;;  %4785 = vpow2.f32 %v4576_v22  ;;  %v4242_v27 = vld [vmem:[%s5147_s28 + $0x800] sm:$0xff]  ;;  %v5716_v22 = vunpack.c.l.bf16 %v5691_v18 }
  0xbf   : > { %2814 = vmatpush.bf16.msra.mxu2 %v4262_v53  ;;  %v4364_v50 = vmul.f32 %v4363_v28, %v4362_v19  ;;  %v4555_v5 = vmul.f32 %v4554_v49, %v5595_v30  ;;  %4787 = vlog2.f32 %v5648_v44  ;;  %v4305_v19 = vld [vmem:[%s5147_s28 + $0x9f8] sm:$0xff] }
  0xc0   : > { %2827 = vmatpush.bf16.msra.mxu3 %v4270_v54 }
  0xc1   : > { %2789 = vmatpush.bf16.msra.mxu0 %v4245_v17  ;;  %v4365_v3 = vsub.f32 %v4364_v50, %v5634_v62  ;;  %v4556_v58 = vmul.f32 %v4555_v5, %v4554_v49  ;;  %v5675_v14 = vpop.eup %4781  ;;  %v4258_v17 = vld [vmem:[%s5147_s28 + $0x880] sm:$0xff]  ;;  %v5726_v50 = vmul.f32 %v5694_v63, %v5694_v63  ;;  %v4288_v5 = vld [vmem:[%s5147_s28 + $0x970] sm:$0xff] }
  0xc2   : > { %2802 = vmatpush.bf16.msra.mxu1 %v4253_v0  ;;  %v4784_v26 = vpop.eup %4783  ;;  %v4386_v54 = vmul.f32 %v5675_v14, %v5675_v14  ;;  %v4266_v0 = vld [vmem:[%s5147_s28 + $0x8c0] sm:$0xff] }
  0xc3   : > { %2815 = vmatpush.bf16.msra.mxu2 %v4261_v29  ;;  %v4366_v34 = vmul.f32 -0.33333334, %v4365_v3  ;;  %v4557_v53 = vsub.f32 %v4556_v58, %v5643_v21  ;;  %v4312_v8 = vmul.f32 -0.33333334, %v4784_v26  ;;  %v2104_v29 = vadd.f32 %v2103_v10, %v2102_v24  ;;  %v4296_v58 = vld [vmem:[%s5147_s28 + $0x9b0] sm:$0xff] }
  0xc4   : > { %2828 = vmatpush.bf16.msra.mxu3 %v4269_v38  ;;  %v5696_v9 = vpop.eup %4785  ;;  %v5703_v38 = vunpack.c.l.bf16 %v5673_v55  ;;  %v4387_v6 = vmul.f32 %v4386_v54, %v5615_v2  ;;  %v4325_v26 = vand.u32 2147483648, %v5630_v36 }
  0xc5   : > { %2790 = vmatpush.bf16.msra.mxu0 %v4244_v60  ;;  %v4367_v32 = vadd.f32 %v5634_v62, %v4366_v34  ;;  %v4558_v25 = vmul.f32 -0.33333334, %v4557_v53  ;;  %v4578_v59 = vmul.f32 %v5696_v9, %v5696_v9  ;;  %v4788_v60 = vpop.eup %4787  ;;  %4789 = vpow2.f32 %v4312_v8 }
  0xc6   : > { %2803 = vmatpush.bf16.msra.mxu1 %v4252_v47  ;;  %v4297_v47 = vld [vmem:[%s5147_s28 + $0x9b8] sm:$0xff]  ;;  %v4388_v49 = vmul.f32 %v4387_v6, %v4386_v54  ;;  %v4504_v20 = vmul.f32 -0.33333334, %v4788_v60  ;;  %v4287_v6 = vld [vmem:[%s5147_s28 + $0x968] sm:$0xff] }
  0xc7   : > { %2816 = vmatpush.bf16.msra.mxu2 %v4260_v1  ;;  %v2050_v1 = vadd.f32 %v2049_v12, %v2048_v51  ;;  %v4368_v62 = vmul.f32 %v4367_v32, %v5578_v13  ;;  %v4559_v28 = vadd.f32 %v5643_v21, %v4558_v25  ;;  %v4579_v24 = vmul.f32 %v4578_v59, %v5621_v31  ;;  %v4280_v21 = vld [vmem:[%s5147_s28 + $0x930] sm:$0xff]  ;;  %v4279_v25 = vld [vmem:[%s5147_s28 + $0x928] sm:$0xff] }
  0xc8   : > { %2829 = vmatpush.bf16.msra.mxu3 %v4268_v52  ;;  %v2105_v52 = vrot.slane %v2104_v29, 1  ;;  %v4389_v3 = vsub.f32 %v4388_v49, %v5675_v14  ;;  %4791 = vpow2.f32 %v4504_v20  ;;  %v4304_v51 = vld [vmem:[%s5147_s28 + $0x9f0] sm:$0xff] }
  0xc9   : > { %2791 = vmatpush.bf16.msra.mxu0 %v4243_v33  ;;  %v2150_v33 = vmul.f32 0.0625, %v2050_v1  ;;  %v4580_v10 = vmul.f32 %v4579_v24, %v4578_v59 }
  0xca   : > { %2804 = vmatpush.bf16.msra.mxu1 %v4251_v61  ;;  %v1977_v61 = vmul.f32 %v5681_v16, %v5681_v16  ;;  %v4390_v54 = vmul.f32 -0.33333334, %v4389_v3 }
  0xcb   : > { %2817 = vmatpush.bf16.msra.mxu2 %v4259_v56  ;;  %v4369_v56 = vmul.f32 %v4368_v62, %v4367_v32  ;;  %v4581_v12 = vsub.f32 %v4580_v10, %v5696_v9 }
  0xcc   : > { %2830 = vmatpush.bf16.msra.mxu3 %v4267_v39  ;;  %v4560_v39 = vmul.f32 %v4559_v28, %v5584_v57  ;;  %v4391_v32 = vadd.f32 %v5675_v14, %v4390_v54 }
  0xcd   : > { %2792 = vmatpush.bf16.msra.mxu0 %v4242_v27  ;;  %v2106_v27 = vadd.f32 %v2105_v52, %v2104_v29  ;;  %v4371_v34 = vsel %vm4370_vm1, %v5578_v13, %v4369_v56  ;;  %vm4381_vm1 = vcmp.eq.f32.partialorder %v5615_v2, inf  ;;  %v5759_v29 = vmax.f32 %v2150_v33, 1e-30 }
  0xce   : > { %2805 = vmatpush.bf16.msra.mxu1 %v4250_v48  ;;  %v5739_v48 = vmul.f32 %v5703_v38, %v5703_v38  ;;  %v4561_v53 = vmul.f32 %v4560_v39, %v4559_v28  ;;  %v4374_v8 = vsel %vm4372_vm2, %v4373_v42, %v4371_v34  ;;  %vm4571_vm2 = vcmp.lt.f32.partialorder %v5612_v15, 0.0 }
  0xcf   : > { %2818 = vmatpush.bf16.msra.mxu2 %v4258_v17  ;;  %v5748_v17 = vmul.f32 %v5716_v22, %v5716_v22  ;;  %v4582_v14 = vmul.f32 -0.33333334, %v4581_v12  ;;  %v2158_v1 = vmul.f32 0.0625, %v2106_v27  ;;  %v4392_v13 = vmul.f32 %v4391_v32, %v5608_v43 }
  0xd0   : > { %2831 = vmatpush.bf16.msra.mxu3 %v4266_v0  ;;  %v5750_v0 = vpop.eup %4789  ;;  %v4563_v42 = vsel %vm4562_vm4, %v5584_v57, %v4561_v53  ;;  %vm4573_vm4 = vcmp.eq.f32.partialorder %v5621_v31, inf }
  0xd1   : > { %2837 = vmatpush.bf16.msrb.mxu0 %v4281_v46  ;;  %v5762_v46 = vmul.f32 %v1977_v61, %v5681_v16  ;;  %v4314_v16 = vmul.f32 %v5750_v0, %v5750_v0  ;;  %v4566_v60 = vsel %vm4564_vm6, %v4565_v37, %v4563_v42  ;;  %v4792_v52 = vpop.eup %4791  ;;  %v4583_v24 = vadd.f32 %v5696_v9, %v4582_v14 }
  0xd2   : > { %2850 = vmatpush.bf16.msrb.mxu1 %v4289_v45  ;;  %v4375_v45 = vsel %vm4355_vm3, nan, %v4374_v8  ;;  %vm4570_vm3 = vcmp.eq.f32.partialorder %v5612_v15, 0.0  ;;  %v4567_v28 = vsel %vm4547_vm8, nan, %v4566_v60  ;;  %v4506_v33 = vmul.f32 %v4792_v52, %v4792_v52 }
  0xd3   : > { %2863 = vmatpush.bf16.msrb.mxu2 %v4297_v47  ;;  %v4376_v59 = vsel %vm4354_vm5, 0.0, %v4375_v45  ;;  %v4295_v47 = vld [vmem:[%s5147_s28 + $0x9a8] sm:$0xff]  ;;  %v4315_v49 = vmul.f32 %v4314_v16, %v5641_v41  ;;  %v4568_v37 = vsel %vm4546_vm9, 0.0, %v4567_v28  ;;  %v4393_v61 = vmul.f32 %v4392_v13, %v4391_v32 }
  0xd4   : > { %2876 = vmatpush.bf16.msrb.mxu3 %v4305_v19  ;;  %v4303_v19 = vld [vmem:[%s5147_s28 + $0x9e8] sm:$0xff]  ;;  %v4377_v62 = vsel %vm4357_vm7, inf, %v4376_v59  ;;  %v4569_v35 = vsel %vm4549_vm10, inf, %v4568_v37  ;;  %v4584_v3 = vmul.f32 %v4583_v24, %v5612_v15  ;;  %vm4322_vm5 = vweird.f32 %v5641_v41 }
  0xd5   : > { %2838 = vmatpush.bf16.msrb.mxu0 %v4280_v21  ;;  %v2331_v20 = vpack.c.bf16 %v4377_v62, %v4377_v62  ;;  %v4316_v21 = vmul.f32 %v4315_v49, %v4314_v16  ;;  %v2339_v56 = vpack.c.bf16 %v4569_v35, %v4569_v35  ;;  %v4507_v57 = vmul.f32 %v4506_v33, %v5648_v44 }
  0xd6   : > { %2851 = vmatpush.bf16.msrb.mxu1 %v4288_v5  ;;  %v5797_v5 = vand.u32 2147483647, %v5759_v29  ;;  %v4395_v30 = vsel %vm4394_vm11, %v5608_v43, %v4393_v61  ;;  %vm4324_vm6 = vcmp.eq.f32.partialorder %v5641_v41, 0.0  ;;  %v4585_v27 = vmul.f32 %v4584_v3, %v4583_v24 }
  0xd7   : > { %2864 = vmatpush.bf16.msrb.mxu2 %v4296_v58  ;;  %v2363_v39 = vunpack.c.l.b16 %v2331_v20  ;;  %v4317_v9 = vsub.f32 %v4316_v21, %v5750_v0  ;;  %v2017_v58 = vmul.f32 %v5726_v50, %v5694_v63  ;;  %v4398_v10 = vsel %vm4396_vm12, %v4397_v40, %v4395_v30 }
  0xd8   : > { %2877 = vmatpush.bf16.msrb.mxu3 %v4304_v51  ;;  %4793 = vlog2.f32 %v5797_v5  ;;  %v2371_v51 = vunpack.c.l.b16 %v2339_v56  ;;  %vm4307_vm7 = vcmp.lt.f32.partialorder %v5630_v36, 0.0  ;;  %v4508_v34 = vmul.f32 %v4507_v57, %v4506_v33 }
  0xd9   : > { %2839 = vmatpush.bf16.msrb.mxu0 %v4279_v25  ;;  %v4399_v53 = vsel %vm4379_vm13, nan, %v4398_v10  ;;  %vm4306_vm8 = vcmp.eq.f32.partialorder %v5630_v36, 0.0  ;;  %v4318_v54 = vmul.f32 -0.33333334, %v4317_v9  ;;  %v5818_v8 = vmax.f32 %v2158_v1, 1e-30 }
  0xda   : > { %2852 = vmatpush.bf16.msrb.mxu1 %v4287_v6  ;;  %v2025_v63 = vmul.f32 %v5739_v48, %v5703_v38  ;;  %v2379_v50 = vsel %vm556_vm0, %v2371_v51, %v2363_v39  ;;  %vm6179_vm9 = vcmp.eq.f32.partialorder %v5608_v43, 0.0  ;;  %v4587_v12 = vsel %vm4586_vm15, %v5612_v15, %v4585_v27 }
  0xdb   : > { %2865 = vmatpush.bf16.msrb.mxu2 %v4295_v47  ;;  %v4400_v40 = vsel %vm6179_vm9, 0.0, %v4399_v53  ;;  %v4509_v45 = vsub.f32 %v4508_v34, %v4792_v52  ;;  %v2387_v42 = vpack.c.b16 %v2379_v50, %v2379_v50  ;;  %v4590_v25 = vsel %vm4588_vm14, %v4589_v4, %v4587_v12 }
  0xdc   : > { %2878 = vmatpush.bf16.msrb.mxu3 %v4303_v19  ;;  %v4401_v32 = vsel %vm4381_vm1, inf, %v4400_v40  ;;  %v4319_v38 = vadd.f32 %v5750_v0, %v4318_v54  ;;  %vm4499_vm10 = vcmp.lt.f32.partialorder %v5632_v23, 0.0  ;;  %v4591_v43 = vsel %vm4571_vm2, nan, %v4590_v25  ;;  %v4286_v25 = vld [vmem:[%s5147_s28 + $0x960] sm:$0xff] }
  0xdd   : > { %v2332_v48 = vpack.c.bf16 %v4401_v32, %v4401_v32  ;;  %v4510_v6 = vmul.f32 -0.33333334, %v4509_v45  ;;  %v2033_v16 = vmul.f32 %v5748_v17, %v5716_v22  ;;  %2819 = vmatmul.bf16.vlgmr.msra.gmra.mxu2 %v2387_v42  ;;  %v4592_v2 = vsel %vm4570_vm3, 0.0, %v4591_v43  ;;  %v4278_v32 = vld [vmem:[%s5147_s28 + $0x920] sm:$0xff] }
  0xde   : > { %v4794_v59 = vpop.eup %4793  ;;  %vm4309_vm11 = vcmp.eq.f32.partialorder %v5641_v41, inf  ;;  %v4320_v4 = vmul.f32 %v4319_v38, %v5630_v36  ;;  %vm4498_vm12 = vcmp.eq.f32.partialorder %v5632_v23, 0.0  ;;  %v4593_v0 = vsel %vm4573_vm4, inf, %v4592_v2  ;;  %2840 = vmatpush.bf16.msrb.mxu0 %v4278_v32  ;;  %2853 = vmatpush.bf16.msrb.mxu1 %v4286_v25 }
  0xdf   : > { %v2364_v60 = vunpack.c.l.b16 %v2332_v48  ;;  %v4511_v14 = vadd.f32 %v4792_v52, %v4510_v6  ;;  %v4336_v47 = vmul.f32 -0.33333334, %v4794_v59  ;;  %v2340_v19 = vpack.c.bf16 %v4593_v0, %v4593_v0 }
  0xe0   : > { %v4321_v1 = vmul.f32 %v4320_v4, %v4319_v38  ;;  %v5848_v22 = vand.u32 2147483647, %v5818_v8  ;;  %v2065_v15 = vadd.f32 %v2017_v58, %v5762_v46  ;;  %vm4514_vm13 = vweird.f32 %v5648_v44  ;;  %v4294_v38 = vld [vmem:[%s5147_s28 + $0x9a0] sm:$0xff] }
  0xe1   : > { %v4512_v17 = vmul.f32 %v4511_v14, %v5632_v23  ;;  %4795 = vpow2.f32 %v4336_v47  ;;  %v2121_v62 = vadd.f32 %v2033_v16, %v2025_v63  ;;  %v2372_v28 = vunpack.c.l.b16 %v2340_v19  ;;  %v5892_v47 = vpop.f32.mrf.mxu0  ;;  %2866 = vmatpush.bf16.msrb.mxu2 %v4294_v38 }
  0xe2   : > { %v4323_v31 = vsel %vm4322_vm5, %v5630_v36, %v4321_v1  ;;  %v4517_v52 = vand.u32 2147483648, %v5632_v23  ;;  %4797 = vlog2.f32 %v5848_v22  ;;  %vm4501_vm14 = vcmp.eq.f32.partialorder %v5648_v44, inf }
  0xe3   : > { %v4326_v46 = vsel %vm4324_vm6, %v4325_v26, %v4323_v31  ;;  %v4513_v13 = vmul.f32 %v4512_v17, %v4511_v14  ;;  %vm4516_vm15 = vcmp.eq.f32.partialorder %v5648_v44, 0.0  ;;  %v2380_v49 = vsel %vm556_vm0, %v2372_v28, %v2364_v60  ;;  %v4277_v60 = vld [vmem:[%s5147_s28 + $0x918] sm:$0xff] }
  0xe4   : > { %v4327_v37 = vsel %vm4307_vm7, nan, %v4326_v46  ;;  %v2066_v20 = vrot.slane %v2065_v15, 4  ;;  %v2122_v24 = vrot.slane %v2121_v62, 4  ;;  %v2388_v33 = vpack.c.b16 %v2380_v49, %v2380_v49  ;;  %v4285_v14 = vld [vmem:[%s5147_s28 + $0x958] sm:$0xff]  ;;  %2841 = vmatpush.bf16.msrb.mxu0 %v4277_v60  ;;  %v4298_v60 = vld [vmem:[%s5147_s28 + $0x9c0] sm:$0xff] }
  0xe5   : > { %v4328_v35 = vsel %vm4306_vm8, 0.0, %v4327_v37  ;;  %v4515_v26 = vsel %vm4514_vm13, %v5632_v23, %v4513_v13  ;;  %v1946_v61 = vunpack.c.h.bf16 %v5658_v7  ;;  %v1954_v36 = vunpack.c.h.bf16 %v5667_v11  ;;  %v4301_v17 = vld [vmem:[%s5147_s28 + $0x9d8] sm:$0xff]  ;;  %2854 = vmatpush.bf16.msrb.mxu1 %v4285_v14 }
  0xe6   : > { %v4329_v21 = vsel %vm4309_vm11, inf, %v4328_v35  ;;  %v4518_v56 = vsel %vm4516_vm15, %v4517_v52, %v4515_v26  ;;  %v2067_v39 = vadd.f32 %v2066_v20, %v2065_v15  ;;  %v2123_v3 = vadd.f32 %v2122_v24, %v2121_v62  ;;  %2832 = vmatmul.bf16.vlgmr.msra.gmra.mxu3 %v2388_v33  ;;  %v4293_v15 = vld [vmem:[%s5147_s28 + $0x998] sm:$0xff] }
  0xe7   : > { %v4796_v57 = vpop.eup %4795  ;;  %v4519_v30 = vsel %vm4499_vm10, nan, %v4518_v56  ;;  %v2329_v9 = vpack.c.bf16 %v4329_v21, %v4329_v21  ;;  %v1962_v58 = vunpack.c.h.bf16 %v5673_v55  ;;  %v1970_v63 = vunpack.c.h.bf16 %v5691_v18  ;;  %v4302_v18 = vld [vmem:[%s5147_s28 + $0x9e0] sm:$0xff]  ;;  %v4284_v21 = vld [vmem:[%s5147_s28 + $0x950] sm:$0xff]  ;;  %2867 = vmatpush.bf16.msrb.mxu2 %v4293_v15 }
  0xe8   : > { %v4798_v51 = vpop.eup %4797  ;;  %v4520_v7 = vsel %vm4498_vm12, 0.0, %v4519_v30  ;;  %v4338_v10 = vmul.f32 %v4796_v57, %v4796_v57  ;;  %v2068_v41 = vrot.slane %v2067_v39, 2  ;;  %v2124_v27 = vrot.slane %v2123_v3, 2  ;;  %2879 = vmatpush.bf16.msrb.mxu3 %v4302_v18  ;;  %v5897_v31 = vld [vmem:[%s5096_s3 + $0x18] sm:$0xff]  ;;  %v4292_v30 = vld [vmem:[%s5147_s28 + $0x990] sm:$0xff] }
  0xe9   : > { %v4521_v34 = vsel %vm4501_vm14, inf, %v4520_v7  ;;  %v2361_v53 = vunpack.c.l.b16 %v2329_v9  ;;  %v4528_v54 = vmul.f32 -0.33333334, %v4798_v51  ;;  %v1978_v40 = vmul.f32 %v1946_v61, %v1946_v61  ;;  %v5900_v49 = vld [vmem:[%s5096_s3 + $0x38] sm:$0xff]  ;;  %v4300_v9 = vld [vmem:[%s5147_s28 + $0x9d0] sm:$0xff]  ;;  %2855 = vmatpush.bf16.msrb.mxu1 %v4284_v21 }
  0xea   : > { %v2337_v11 = vpack.c.bf16 %v4521_v34, %v4521_v34  ;;  %v4339_v55 = vmul.f32 %v4338_v10, %v5797_v5  ;;  %v2069_v50 = vadd.f32 %v2068_v41, %v2067_v39  ;;  %v2125_v23 = vadd.f32 %v2124_v27, %v2123_v3  ;;  %v5906_v33 = vld [vmem:[%s5096_s3 + $0x58] sm:$0xff] }
  0xeb   : > { %4799 = vpow2.f32 %v4528_v54  ;;  %v1986_v12 = vmul.f32 %v1954_v36, %v1954_v36  ;;  %v1994_v45 = vmul.f32 %v1962_v58, %v1962_v58  ;;  %v2002_v6 = vmul.f32 %v1970_v63, %v1970_v63  ;;  %v5915_v39 = vld [vmem:[%s5096_s3 + $0x78] sm:$0xff]  ;;  %2868 = vmatpush.bf16.msrb.mxu2 %v4292_v30 }
  0xec   : > { %v2369_v42 = vunpack.c.l.b16 %v2337_v11  ;;  %v4340_v44 = vmul.f32 %v4339_v55, %v4338_v10  ;;  %v2070_v43 = vrot.slane %v2069_v50, 1  ;;  %v2126_v48 = vrot.slane %v2125_v23, 1  ;;  %2880 = vmatpush.bf16.msrb.mxu3 %v4301_v17  ;;  %v4275_v55 = vld [vmem:[%s5147_s28 + $0x908] sm:$0xff] }
  0xed   : > { %v2010_v16 = vmul.f32 %v1978_v40, %v1946_v61  ;;  %v2018_v59 = vmul.f32 %v1986_v12, %v1954_v36  ;;  %v2026_v2 = vmul.f32 %v1994_v45, %v1962_v58  ;;  %v2034_v28 = vmul.f32 %v2002_v6, %v1970_v63  ;;  %v4276_v61 = vld [vmem:[%s5147_s28 + $0x910] sm:$0xff]  ;;  %v976_v40 = vpop.f32.mrf.mxu0  ;;  %v4291_v12 = vld [vmem:[%s5147_s28 + $0x988] sm:$0xff] }
  0xee   : > { %v2377_v4 = vsel %vm556_vm0, %v2369_v42, %v2361_v53  ;;  %v4341_v0 = vsub.f32 %v4340_v44, %v4796_v57  ;;  %v2071_v19 = vadd.f32 %v2070_v43, %v2069_v50  ;;  %v2127_v62 = vadd.f32 %v2126_v48, %v2125_v23  ;;  %2842 = vmatpush.bf16.msrb.mxu0 %v4276_v61  ;;  %v4283_v50 = vld [vmem:[%s5147_s28 + $0x948] sm:$0xff] }
  0xef   : > { %v2385_v1 = vpack.c.b16 %v2377_v4, %v2377_v4  ;;  %v2072_v13 = vadd.f32 %v2018_v59, %v2010_v16  ;;  %vm4331_vm1 = vcmp.lt.f32.partialorder %v5759_v29, 0.0  ;;  %v2128_v24 = vadd.f32 %v2034_v28, %v2026_v2  ;;  %v4299_v45 = vld [vmem:[%s5147_s28 + $0x9c8] sm:$0xff]  ;;  %2856 = vmatpush.bf16.msrb.mxu1 %v4283_v50  ;;  %v4274_v59 = vld [vmem:[%s5147_s28 + $0x900] sm:$0xff]  ;;  %2869 = vmatpush.bf16.msrb.mxu2 %v4291_v12 }
  0xf0   : > { %v4342_v52 = vmul.f32 -0.33333334, %v4341_v0  ;;  %v2153_v46 = vmul.f32 0.0625, %v2071_v19  ;;  %v2161_v20 = vmul.f32 0.0625, %v2127_v62  ;;  %v1947_v3 = vunpack.c.l.bf16 %v5897_v31  ;;  %2881 = vmatpush.bf16.msrb.mxu3 %v4300_v9  ;;  %v4282_v2 = vld [vmem:[%s5147_s28 + $0x940] sm:$0xff] }
  0xf1   : > { %v5902_v37 = vpop.eup %4799  ;;  %2793 = vmatmul.bf16.vlgmr.msra.gmra.mxu0 %v2385_v1  ;;  %v2129_v58 = vrot.slane %v2128_v24, 4  ;;  %v1955_v51 = vunpack.c.l.bf16 %v5900_v49  ;;  %vm4346_vm2 = vweird.f32 %v5797_v5  ;;  %v1963_v41 = vunpack.c.l.bf16 %v5906_v33  ;;  %v4290_v0 = vld [vmem:[%s5147_s28 + $0x980] sm:$0xff] }
  0xf2   : > { %v4343_v35 = vadd.f32 %v4796_v57, %v4342_v52  ;;  %v4530_v26 = vmul.f32 %v5902_v37, %v5902_v37  ;;  %v5912_v56 = vmax.f32 %v2153_v46, 1e-30  ;;  %v5920_v36 = vmax.f32 %v2161_v20, 1e-30  ;;  %2843 = vmatpush.bf16.msrb.mxu0 %v4275_v55 }
  0xf3   : > { %v2073_v57 = vrot.slane %v2072_v13, 4  ;;  %v4349_v27 = vand.u32 2147483648, %v5759_v29  ;;  %v1971_v54 = vunpack.c.l.bf16 %v5915_v39  ;;  %vm4348_vm3 = vcmp.eq.f32.partialorder %v5797_v5, 0.0  ;;  %2857 = vmatpush.bf16.msrb.mxu1 %v4282_v2  ;;  %2870 = vmatpush.bf16.msrb.mxu2 %v4290_v0 }
  0xf4   : > { %v4344_v7 = vmul.f32 %v4343_v35, %v5759_v29  ;;  %v4531_v10 = vmul.f32 %v4530_v26, %v5848_v22  ;;  %v5929_v34 = vand.u32 2147483647, %v5912_v56  ;;  %v5932_v53 = vand.u32 2147483647, %v5920_v36  ;;  %2882 = vmatpush.bf16.msrb.mxu3 %v4299_v45 }
  0xf5   : > { %v1979_v23 = vmul.f32 %v1947_v3, %v1947_v3  ;;  %v2074_v42 = vadd.f32 %v2073_v57, %v2072_v13  ;;  %v2130_v44 = vadd.f32 %v2129_v58, %v2128_v24  ;;  %v1987_v32 = vmul.f32 %v1955_v51, %v1955_v51 }
  0xf6   : > { %v4345_v63 = vmul.f32 %v4344_v7, %v4343_v35  ;;  %v4532_v11 = vmul.f32 %v4531_v10, %v4530_v26  ;;  %4801 = vlog2.f32 %v5929_v34  ;;  %v1995_v43 = vmul.f32 %v1963_v41, %v1963_v41  ;;  %2844 = vmatpush.bf16.msrb.mxu0 %v4274_v59 }
  0xf7   : > { %4803 = vlog2.f32 %v5932_v53  ;;  %vm4330_vm4 = vcmp.eq.f32.partialorder %v5759_v29, 0.0  ;;  %vm4333_vm5 = vcmp.eq.f32.partialorder %v5797_v5, inf  ;;  %v2003_v18 = vmul.f32 %v1971_v54, %v1971_v54 }
  0xf8   : > { %v4347_v25 = vsel %vm4346_vm2, %v5759_v29, %v4345_v63  ;;  %v4533_v38 = vsub.f32 %v4532_v11, %v5902_v37  ;;  %vm4522_vm6 = vcmp.eq.f32.partialorder %v5818_v8, 0.0  ;;  %v4541_v4 = vand.u32 2147483648, %v5818_v8  ;;  %2883 = vmatpush.bf16.msrb.mxu3 %v4298_v60 }
  0xf9   : > { %v4350_v48 = vsel %vm4348_vm3, %v4349_v27, %v4347_v25  ;;  %v2075_v14 = vrot.slane %v2074_v42, 2  ;;  %v2131_v19 = vrot.slane %v2130_v44, 2  ;;  %v2011_v1 = vmul.f32 %v1979_v23, %v1947_v3 }
  0xfa   : > { %v4351_v6 = vsel %vm4331_vm1, nan, %v4350_v48  ;;  %v4534_v16 = vmul.f32 -0.33333334, %v4533_v38  ;;  %v2019_v62 = vmul.f32 %v1987_v32, %v1955_v51  ;;  %v2027_v28 = vmul.f32 %v1995_v43, %v1963_v41 }
  0xfb   : > { %v4352_v15 = vsel %vm4330_vm4, 0.0, %v4351_v6  ;;  %vm4538_vm7 = vweird.f32 %v5848_v22  ;;  %v2076_v46 = vadd.f32 %v2075_v14, %v2074_v42  ;;  %v2132_v13 = vadd.f32 %v2131_v19, %v2130_v44 }
  0xfc   : > { %v4535_v17 = vadd.f32 %v5902_v37, %v4534_v16  ;;  %v4802_v52 = vpop.eup %4801  ;;  %v2035_v20 = vmul.f32 %v2003_v18, %v1971_v54  ;;  %vm4540_vm8 = vcmp.eq.f32.partialorder %v5848_v22, 0.0  ;;  %v2079_v29 = vadd.f32 %v2019_v62, %v2011_v1 }
  0xfd   : > { %v4804_v24 = vpop.eup %4803  ;;  %v4408_v26 = vmul.f32 -0.33333334, %v4802_v52  ;;  %v4353_v37 = vsel %vm4333_vm5, inf, %v4352_v15  ;;  %v2077_v21 = vrot.slane %v2076_v46, 1  ;;  %v2133_v3 = vrot.slane %v2132_v13, 1 }
  0xfe   : > { %v4536_v35 = vmul.f32 %v4535_v17, %v5818_v8  ;;  %v4600_v61 = vmul.f32 -0.33333334, %v4804_v24  ;;  %v2080_v9 = vrot.slane %v2079_v29, 4  ;;  %v2135_v57 = vadd.f32 %v2035_v20, %v2027_v28 }
  0xff   : > { %4805 = vpow2.f32 %v4408_v26  ;;  %vm4523_vm9 = vcmp.lt.f32.partialorder %v5818_v8, 0.0  ;;  %v2078_v58 = vadd.f32 %v2077_v21, %v2076_v46  ;;  %v2134_v51 = vadd.f32 %v2133_v3, %v2132_v13 }
 0x100   : > { %v4537_v30 = vmul.f32 %v4536_v35, %v4535_v17  ;;  %4807 = vpow2.f32 %v4600_v61  ;;  %vm4525_vm10 = vcmp.eq.f32.partialorder %v5848_v22, inf  ;;  %v2081_v7 = vadd.f32 %v2080_v9, %v2079_v29 }
 0x101   : > { %v2136_v10 = vrot.slane %v2135_v57, 4  ;;  %v2330_v27 = vpack.c.bf16 %v4353_v37, %v4353_v37  ;;  %v2154_v54 = vmul.f32 0.0625, %v2078_v58  ;;  %v2162_v63 = vmul.f32 0.0625, %v2134_v51 }
 0x102   : > { %v4539_v5 = vsel %vm4538_vm7, %v5818_v8, %v4537_v30  ;;  %v2082_v55 = vrot.slane %v2081_v7, 2  ;;  %v1948_v22 = vunpack.c.h.bf16 %v5897_v31  ;;  %v1956_v18 = vunpack.c.h.bf16 %v5900_v49 }
 0x103   : > { %v4542_v41 = vsel %vm4540_vm8, %v4541_v4, %v4539_v5  ;;  %v2137_v50 = vadd.f32 %v2136_v10, %v2135_v57  ;;  %v5975_v40 = vmax.f32 %v2154_v54, 1e-30  ;;  %v5977_v12 = vmax.f32 %v2162_v63, 1e-30 }
 0x104   : > { %v4543_v11 = vsel %vm4523_vm9, nan, %v4542_v41  ;;  %v2083_v44 = vadd.f32 %v2082_v55, %v2081_v7  ;;  %v2362_v43 = vunpack.c.l.b16 %v2330_v27  ;;  %v1964_v4 = vunpack.c.h.bf16 %v5906_v33 }
 0x105   : > { %v4544_v23 = vsel %vm4522_vm6, 0.0, %v4543_v11  ;;  %v4806_v45 = vpop.eup %4805  ;;  %v2138_v32 = vrot.slane %v2137_v50, 2  ;;  %v5982_v8 = vand.u32 2147483647, %v5975_v40  ;;  %v5985_v16 = vand.u32 2147483647, %v5977_v12 }
 0x106   : > { %v4545_v42 = vsel %vm4525_vm10, inf, %v4544_v23  ;;  %v4808_v25 = vpop.eup %4807  ;;  %v4410_v48 = vmul.f32 %v4806_v45, %v4806_v45  ;;  %v1972_v31 = vunpack.c.h.bf16 %v5915_v39  ;;  %v2084_v60 = vrot.slane %v2083_v44, 1 }
 0x107   : > { %v2338_v38 = vpack.c.bf16 %v4545_v42, %v4545_v42  ;;  %v4602_v6 = vmul.f32 %v4808_v25, %v4808_v25  ;;  %4809 = vlog2.f32 %v5982_v8  ;;  %v2139_v49 = vadd.f32 %v2138_v32, %v2137_v50 }
 0x108   : > { %v4411_v2 = vmul.f32 %v4410_v48, %v5929_v34  ;;  %v1980_v1 = vmul.f32 %v1948_v22, %v1948_v22  ;;  %v1988_v15 = vmul.f32 %v1956_v18, %v1956_v18  ;;  %4811 = vlog2.f32 %v5985_v16 }
 0x109   : > { %v2370_v59 = vunpack.c.l.b16 %v2338_v38  ;;  %v4603_v0 = vmul.f32 %v4602_v6, %v5932_v53  ;;  %v1996_v52 = vmul.f32 %v1964_v4, %v1964_v4  ;;  %v4421_v33 = vand.u32 2147483648, %v5912_v56 }
 0x10a   : > { %v4412_v19 = vmul.f32 %v4411_v2, %v4410_v48  ;;  %v2085_v46 = vadd.f32 %v2084_v60, %v2083_v44  ;;  %v2140_v13 = vrot.slane %v2139_v49, 1  ;;  %vm4402_vm11 = vcmp.eq.f32.partialorder %v5912_v56, 0.0 }
 0x10b   : > { %v2378_v14 = vsel %vm556_vm0, %v2370_v59, %v2362_v43  ;;  %v4604_v62 = vmul.f32 %v4603_v0, %v4602_v6  ;;  %v2004_v24 = vmul.f32 %v1972_v31, %v1972_v31  ;;  %v2012_v35 = vmul.f32 %v1980_v1, %v1948_v22 }
 0x10c   : > { %v2386_v17 = vpack.c.b16 %v2378_v14, %v2378_v14  ;;  %v4413_v28 = vsub.f32 %v4412_v19, %v4806_v45  ;;  %v2020_v26 = vmul.f32 %v1988_v15, %v1956_v18  ;;  %vm4418_vm12 = vweird.f32 %v5929_v34 }
 0x10d   : > { %v4605_v39 = vsub.f32 %v4604_v62, %v4808_v25  ;;  %v4810_v29 = vpop.eup %4809  ;;  %v2141_v61 = vadd.f32 %v2140_v13, %v2139_v49  ;;  %v2155_v21 = vmul.f32 0.0625, %v2085_v46  ;;  %v2028_v9 = vmul.f32 %v1996_v52, %v1964_v4 }
 0x10e   : > { %2806 = vmatmul.bf16.vlgmr.msra.gmra.mxu1 %v2386_v17  ;;  %v4414_v20 = vmul.f32 -0.33333334, %v4413_v28  ;;  %v4432_v30 = vmul.f32 -0.33333334, %v4810_v29  ;;  %v2086_v57 = vadd.f32 %v2020_v26, %v2012_v35  ;;  %v4812_v58 = vpop.eup %4811  ;;  %v2036_v10 = vmul.f32 %v2004_v24, %v1972_v31 }
 0x10f   : > { %v4606_v37 = vmul.f32 -0.33333334, %v4605_v39  ;;  %v2163_v5 = vmul.f32 0.0625, %v2141_v61  ;;  %v5997_v7 = vmax.f32 %v2155_v21, 1e-30  ;;  %vm4420_vm13 = vcmp.eq.f32.partialorder %v5929_v34, 0.0 }
 0x110   : > { %v4415_v3 = vadd.f32 %v4806_v45, %v4414_v20  ;;  %4813 = vpow2.f32 %v4432_v30  ;;  %v4624_v27 = vmul.f32 -0.33333334, %v4812_v58  ;;  %v2087_v54 = vrot.slane %v2086_v57, 4 }
 0x111   : > { %v4607_v51 = vadd.f32 %v4808_v25, %v4606_v37  ;;  %vm4610_vm14 = vweird.f32 %v5932_v53  ;;  %v6004_v11 = vand.u32 2147483647, %v5997_v7  ;;  %v4613_v50 = vand.u32 2147483648, %v5920_v36 }
 0x112   : > { %v4416_v41 = vmul.f32 %v4415_v3, %v5912_v56  ;;  %4815 = vpow2.f32 %v4624_v27  ;;  %v6007_v23 = vmax.f32 %v2163_v5, 1e-30  ;;  %vm4403_vm15 = vcmp.lt.f32.partialorder %v5912_v56, 0.0 }
 0x113   : > { %v4608_v63 = vmul.f32 %v4607_v51, %v5920_v36  ;;  %vm4612_vm1 = vcmp.eq.f32.partialorder %v5932_v53, 0.0  ;;  %4817 = vlog2.f32 %v6004_v11  ;;  %vm4595_vm2 = vcmp.lt.f32.partialorder %v5920_v36, 0.0 }
 0x114   : > { %v4417_v55 = vmul.f32 %v4416_v41, %v4415_v3  ;;  %v2088_v44 = vadd.f32 %v2087_v54, %v2086_v57  ;;  %v2142_v32 = vadd.f32 %v2036_v10, %v2028_v9  ;;  %vm4405_vm3 = vcmp.eq.f32.partialorder %v5929_v34, inf }
 0x115   : > { %v4609_v45 = vmul.f32 %v4608_v63, %v4607_v51  ;;  %vm4594_vm4 = vcmp.eq.f32.partialorder %v5920_v36, 0.0  ;;  %vm4597_vm5 = vcmp.eq.f32.partialorder %v5932_v53, inf  ;;  %v6025_v18 = vand.u32 2147483647, %v6007_v23 }
 0x116   : > { %v4419_v42 = vsel %vm4418_vm12, %v5912_v56, %v4417_v55  ;;  %v4814_v38 = vpop.eup %4813  ;;  %v2089_v0 = vrot.slane %v2088_v44, 2  ;;  %v2143_v60 = vrot.slane %v2142_v32, 4  ;;  %vm4426_vm6 = vcmp.eq.f32.partialorder %v5975_v40, 0.0 }
 0x117   : > { %v4422_v22 = vsel %vm4420_vm13, %v4421_v33, %v4419_v42  ;;  %v4611_v25 = vsel %vm4610_vm14, %v5920_v36, %v4609_v45  ;;  %v4434_v34 = vmul.f32 %v4814_v38, %v4814_v38  ;;  %4819 = vlog2.f32 %v6025_v18 }
 0x118   : > { %v4423_v43 = vsel %vm4403_vm15, nan, %v4422_v22  ;;  %v4614_v48 = vsel %vm4612_vm1, %v4613_v50, %v4611_v25  ;;  %v4816_v2 = vpop.eup %4815  ;;  %v2090_v52 = vadd.f32 %v2089_v0, %v2088_v44  ;;  %v2144_v46 = vadd.f32 %v2143_v60, %v2142_v32 }
 0x119   : > { %v4424_v6 = vsel %vm4402_vm11, 0.0, %v4423_v43  ;;  %v4615_v59 = vsel %vm4595_vm2, nan, %v4614_v48  ;;  %v4818_v49 = vpop.eup %4817  ;;  %v4435_v19 = vmul.f32 %v4434_v34, %v5982_v8  ;;  %v4626_v53 = vmul.f32 %v4816_v2, %v4816_v2 }
 0x11a   : > { %v4425_v4 = vsel %vm4405_vm3, inf, %v4424_v6  ;;  %v4616_v31 = vsel %vm4594_vm4, 0.0, %v4615_v59  ;;  %v4456_v15 = vmul.f32 -0.33333334, %v4818_v49  ;;  %v2091_v20 = vrot.slane %v2090_v52, 1 }
 0x11b   : > { %v4617_v36 = vsel %vm4597_vm5, inf, %v4616_v31  ;;  %v2333_v14 = vpack.c.bf16 %v4425_v4, %v4425_v4  ;;  %v4436_v56 = vmul.f32 %v4435_v19, %v4434_v34  ;;  %v4627_v62 = vmul.f32 %v4626_v53, %v5985_v16 }
 0x11c   : > { %v2341_v1 = vpack.c.bf16 %v4617_v36, %v4617_v36  ;;  %4821 = vpow2.f32 %v4456_v15  ;;  %v2145_v29 = vrot.slane %v2144_v46, 2  ;;  %v2092_v61 = vadd.f32 %v2091_v20, %v2090_v52 }
 0x11d   : > { %v2365_v17 = vunpack.c.l.b16 %v2333_v14  ;;  %v4437_v33 = vsub.f32 %v4436_v56, %v4814_v38  ;;  %v4628_v39 = vmul.f32 %v4627_v62, %v4626_v53  ;;  %v4820_v37 = vpop.eup %4819  ;;  %vm4427_vm7 = vcmp.lt.f32.partialorder %v5975_v40, 0.0 }
 0x11e   : > { %v2373_v28 = vunpack.c.l.b16 %v2341_v1  ;;  %v4648_v30 = vmul.f32 -0.33333334, %v4820_v37  ;;  %v2146_v9 = vadd.f32 %v2145_v29, %v2144_v46  ;;  %vm4429_vm8 = vcmp.eq.f32.partialorder %v5982_v8, inf }
 0x11f   : > { %v4438_v35 = vmul.f32 -0.33333334, %v4437_v33  ;;  %v4629_v26 = vsub.f32 %v4628_v39, %v4816_v2  ;;  %v4445_v58 = vand.u32 2147483648, %v5975_v40  ;;  %v2156_v51 = vmul.f32 0.0625, %v2092_v61 }
 0x120   : > { %v2381_v13 = vsel %vm556_vm0, %v2373_v28, %v2365_v17  ;;  %4823 = vpow2.f32 %v4648_v30  ;;  %vm4442_vm9 = vweird.f32 %v5982_v8  ;;  %vm4444_vm10 = vcmp.eq.f32.partialorder %v5982_v8, 0.0 }
 0x121   : > { %v2389_v24 = vpack.c.b16 %v2381_v13, %v2381_v13  ;;  %v4439_v21 = vadd.f32 %v4814_v38, %v4438_v35  ;;  %v4630_v3 = vmul.f32 -0.33333334, %v4629_v26  ;;  %v2147_v27 = vrot.slane %v2146_v9, 1 }
 0x122   : > { %v4822_v57 = vpop.eup %4821  ;;  %v6040_v54 = vmax.f32 %v2156_v51, 1e-30  ;;  %vm4619_vm11 = vcmp.lt.f32.partialorder %v5977_v12, 0.0  ;;  %vm4634_vm12 = vweird.f32 %v5985_v16  ;;  %v4637_v45 = vand.u32 2147483648, %v5977_v12 }
 0x123   : > { %2845 = vmatmul.bf16.vlgmr.msrb.gmra.mxu0 %v2389_v24  ;;  %v4440_v5 = vmul.f32 %v4439_v21, %v5975_v40  ;;  %v4631_v10 = vadd.f32 %v4816_v2, %v4630_v3  ;;  %v4458_v41 = vmul.f32 %v4822_v57, %v4822_v57  ;;  %v2148_v42 = vadd.f32 %v2147_v27, %v2146_v9 }
 0x124   : > { %v6048_v44 = vand.u32 2147483647, %v6040_v54  ;;  %vm4636_vm13 = vcmp.eq.f32.partialorder %v5985_v16, 0.0  ;;  %vm4618_vm14 = vcmp.eq.f32.partialorder %v5977_v12, 0.0  ;;  %vm4621_vm15 = vcmp.eq.f32.partialorder %v5985_v16, inf }
 0x125   : > { %v4441_v63 = vmul.f32 %v4440_v5, %v4439_v21  ;;  %v4632_v55 = vmul.f32 %v4631_v10, %v5977_v12  ;;  %v4459_v50 = vmul.f32 %v4458_v41, %v6004_v11  ;;  %v2164_v43 = vmul.f32 0.0625, %v2148_v42  ;;  %v1013_v42 = vpop.f32.mrf.mxu3 }
 0x126   : > { %4825 = vlog2.f32 %v6048_v44  ;;  %v4824_v48 = vpop.eup %4823  ;;  %vm4466_vm1 = vweird.f32 %v6004_v11  ;;  %v4469_v52 = vand.u32 2147483648, %v5997_v7  ;;  %vm4468_vm2 = vcmp.eq.f32.partialorder %v6004_v11, 0.0 }
 0x127   : > { %v4443_v32 = vsel %vm4442_vm9, %v5975_v40, %v4441_v63  ;;  %v4633_v22 = vmul.f32 %v4632_v55, %v4631_v10  ;;  %v4460_v25 = vmul.f32 %v4459_v50, %v4458_v41  ;;  %v4650_v31 = vmul.f32 %v4824_v48, %v4824_v48  ;;  %v987_v63 = vpop.f32.mrf.mxu1  ;;  %v1000_v55 = vpop.f32.mrf.mxu2 }
 0x128   : > { %v4446_v38 = vsel %vm4444_vm10, %v4445_v58, %v4443_v32  ;;  %v6060_v0 = vmax.f32 %v2164_v43, 1e-30  ;;  %vm4451_vm3 = vcmp.lt.f32.partialorder %v5997_v7, 0.0  ;;  %vm4450_vm4 = vcmp.eq.f32.partialorder %v5997_v7, 0.0  ;;  %v1026_v32 = vpop.f32.mrf.mxu0 }
 0x129   : > { %v4447_v6 = vsel %vm4427_vm7, nan, %v4446_v38  ;;  %v4635_v59 = vsel %vm4634_vm12, %v5977_v12, %v4633_v22  ;;  %v4461_v34 = vsub.f32 %v4460_v25, %v4822_v57  ;;  %v4651_v16 = vmul.f32 %v4650_v31, %v6025_v18 }
 0x12a   : > { %v4448_v2 = vsel %vm4426_vm6, 0.0, %v4447_v6  ;;  %v4638_v4 = vsel %vm4636_vm13, %v4637_v45, %v4635_v59  ;;  %v6068_v62 = vand.u32 2147483647, %v6060_v0  ;;  %vm4453_vm5 = vcmp.eq.f32.partialorder %v6004_v11, inf }
 0x12b   : > { %v4449_v60 = vsel %vm4429_vm8, inf, %v4448_v2  ;;  %v4639_v49 = vsel %vm4619_vm11, nan, %v4638_v4  ;;  %v4462_v36 = vmul.f32 -0.33333334, %v4461_v34  ;;  %v4652_v56 = vmul.f32 %v4651_v16, %v4650_v31 }
 0x12c   : > { %v4640_v14 = vsel %vm4618_vm14, 0.0, %v4639_v49  ;;  %v2334_v19 = vpack.c.bf16 %v4449_v60, %v4449_v60  ;;  %v4826_v15 = vpop.eup %4825  ;;  %4827 = vlog2.f32 %v6068_v62  ;;  %vm4658_vm6 = vweird.f32 %v6025_v18 }
 0x12d   : > { %v4641_v53 = vsel %vm4621_vm15, inf, %v4640_v14  ;;  %v4463_v1 = vadd.f32 %v4822_v57, %v4462_v36  ;;  %v4480_v12 = vmul.f32 -0.33333334, %v4826_v15  ;;  %v4653_v33 = vsub.f32 %v4652_v56, %v4824_v48  ;;  %v1015_v16 = vpop.f32.mrf.mxu3 }
 0x12e   : > { %v2342_v40 = vpack.c.bf16 %v4641_v53, %v4641_v53  ;;  %v2366_v17 = vunpack.c.l.b16 %v2334_v19  ;;  %v4661_v30 = vand.u32 2147483648, %v6007_v23  ;;  %vm4660_vm7 = vcmp.eq.f32.partialorder %v6025_v18, 0.0 }
 0x12f   : > { %v4464_v8 = vmul.f32 %v4463_v1, %v5997_v7  ;;  %4829 = vpow2.f32 %v4480_v12  ;;  %v4654_v13 = vmul.f32 -0.33333334, %v4653_v33  ;;  %vm4643_vm8 = vcmp.lt.f32.partialorder %v6007_v23, 0.0  ;;  %v989_v49 = vpop.f32.mrf.mxu1  ;;  %v1002_v36 = vpop.f32.mrf.mxu2 }
 0x130   : > { %v2374_v28 = vunpack.c.l.b16 %v2342_v40  ;;  %vm4642_vm9 = vcmp.eq.f32.partialorder %v6007_v23, 0.0  ;;  %vm4645_vm10 = vcmp.eq.f32.partialorder %v6025_v18, inf  ;;  %v988_v45 = vadd.f32 %v987_v63, %v5892_v47  ;;  %v1028_v53 = vpop.f32.mrf.mxu0 }
 0x131   : > { %v4465_v39 = vmul.f32 %v4464_v8, %v4463_v1  ;;  %v4655_v26 = vadd.f32 %v4824_v48, %v4654_v13  ;;  %vm4490_vm11 = vweird.f32 %v6048_v44  ;;  %v4493_v14 = vand.u32 2147483648, %v6040_v54 }
 0x132   : > { %v2382_v46 = vsel %vm556_vm0, %v2374_v28, %v2366_v17  ;;  %v4828_v37 = vpop.eup %4827  ;;  %v1001_v18 = vadd.f32 %v1000_v55, %v988_v45  ;;  %vm4492_vm12 = vcmp.eq.f32.partialorder %v6048_v44, 0.0  ;;  %vm4475_vm13 = vcmp.lt.f32.partialorder %v6040_v54, 0.0 }
 0x133   : > { %v2390_v20 = vpack.c.b16 %v2382_v46, %v2382_v46  ;;  %v4467_v24 = vsel %vm4466_vm1, %v5997_v7, %v4465_v39  ;;  %v4656_v21 = vmul.f32 %v4655_v26, %v6007_v23  ;;  %v4672_v9 = vmul.f32 -0.33333334, %v4828_v37  ;;  %v507_v37 = vld [vmem:[#allocation2] sm:$0x3] }
 0x134   : > { %v4470_v35 = vsel %vm4468_vm2, %v4469_v52, %v4467_v24  ;;  %v1014_v19 = vadd.f32 %v1013_v42, %v1001_v18  ;;  %vm4474_vm14 = vcmp.eq.f32.partialorder %v6040_v54, 0.0  ;;  %vm4477_vm15 = vcmp.eq.f32.partialorder %v6048_v44, inf }
 0x135   : > { %2858 = vmatmul.bf16.vlgmr.msrb.gmra.mxu1 %v2390_v20  ;;  %v4471_v29 = vsel %vm4451_vm3, nan, %v4470_v35  ;;  %v4830_v3 = vpop.eup %4829  ;;  %v4657_v58 = vmul.f32 %v4656_v21, %v4655_v26  ;;  %4831 = vpow2.f32 %v4672_v9  ;;  %vm4682_vm1 = vweird.f32 %v6068_v62  ;;  %v1065_v24 = vpop.f32.mrf.mxu3 }
 0x136   : > { %v4472_v61 = vsel %vm4450_vm4, 0.0, %v4471_v29  ;;  %v4482_v7 = vmul.f32 %v4830_v3, %v4830_v3  ;;  %v1027_v8 = vadd.f32 %v1026_v32, %v1014_v19  ;;  %v4685_v13 = vand.u32 2147483648, %v6060_v0 }
 0x137   : > { %v4473_v57 = vsel %vm4453_vm5, inf, %v4472_v61  ;;  %v4659_v11 = vsel %vm4658_vm6, %v6007_v23, %v4657_v58  ;;  %v1039_v39 = vpop.f32.mrf.mxu1  ;;  %v1052_v46 = vpop.f32.mrf.mxu2  ;;  %vm4684_vm2 = vcmp.eq.f32.partialorder %v6068_v62, 0.0  ;;  %vm4667_vm3 = vcmp.lt.f32.partialorder %v6060_v0, 0.0 }
 0x138   : > { %v4483_v51 = vmul.f32 %v4482_v7, %v6048_v44  ;;  %v4662_v5 = vsel %vm4660_vm7, %v4661_v30, %v4659_v11  ;;  %v2335_v10 = vpack.c.bf16 %v4473_v57, %v4473_v57  ;;  %v1040_v20 = vadd.f32 %v1039_v39, %v1027_v8  ;;  %v1828_v35 = vpop.f32.mrf.mxu0 }
 0x139   : > { %v4663_v41 = vsel %vm4643_vm8, nan, %v4662_v5  ;;  %vm4666_vm4 = vcmp.eq.f32.partialorder %v6060_v0, 0.0  ;;  %vm4669_vm5 = vcmp.eq.f32.partialorder %v6068_v62, inf }
 0x13a   : > { %v4484_v27 = vmul.f32 %v4483_v51, %v4482_v7  ;;  %v4664_v50 = vsel %vm4642_vm9, 0.0, %v4663_v41  ;;  %v2367_v23 = vunpack.c.l.b16 %v2335_v10  ;;  %v1053_v29 = vadd.f32 %v1052_v46, %v1040_v20 }
 0x13b   : > { %v4665_v22 = vsel %vm4645_vm10, inf, %v4664_v50  ;;  %v4832_v38 = vpop.eup %4831 }
 0x13c   : > { %v4485_v25 = vsub.f32 %v4484_v27, %v4830_v3  ;;  %v2343_v43 = vpack.c.bf16 %v4665_v22, %v4665_v22  ;;  %v4674_v6 = vmul.f32 %v4832_v38, %v4832_v38 }
 0x13d   : > { %v1067_v10 = vpop.f32.mrf.mxu3 }
 0x13e   : > { %v4486_v48 = vmul.f32 -0.33333334, %v4485_v25  ;;  %v2375_v59 = vunpack.c.l.b16 %v2343_v43  ;;  %v4675_v2 = vmul.f32 %v4674_v6, %v6068_v62 }
 0x13f   : > { %v1041_v7 = vpop.f32.mrf.mxu1  ;;  %v1054_v11 = vpop.f32.mrf.mxu2 }
 0x140   : > { %v4487_v34 = vadd.f32 %v4830_v3, %v4486_v48  ;;  %v2383_v4 = vsel %vm556_vm0, %v2375_v59, %v2367_v23  ;;  %v4676_v47 = vmul.f32 %v4675_v2, %v4674_v6  ;;  %v1066_v3 = vadd.f32 %v1065_v24, %v1053_v29  ;;  %v1830_v41 = vpop.f32.mrf.mxu0 }
 0x141   : > { %v2391_v31 = vpack.c.b16 %v2383_v4, %v2383_v4 }
 0x142   : > { %v4488_v60 = vmul.f32 %v4487_v34, %v6040_v54  ;;  %v4677_v15 = vsub.f32 %v4676_v47, %v4832_v38  ;;  %v1069_v57 = vadd.f32 %v1066_v3, %v507_v37 }
 0x143   : > { %2871 = vmatmul.bf16.vlgmr.msrb.gmra.mxu2 %v2391_v31  ;;  %v1378_v31 = vld [vmem:[#allocation2 + $0x2] sm:$0x3] }
 0x144   : > { %v4489_v1 = vmul.f32 %v4488_v60, %v4487_v34  ;;  %v4678_v17 = vmul.f32 -0.33333334, %v4677_v15  ;;  %1070 = vst [vmem:[#allocation2] sm:$0x3] %v1069_v57 }
 0x145   : > { %v1867_v45 = vpop.f32.mrf.mxu3 }
 0x146   : > { %v4491_v40 = vsel %vm4490_vm11, %v6040_v54, %v4489_v1  ;;  %v4679_v28 = vadd.f32 %v4832_v38, %v4678_v17 }
 0x147   : > { %v4494_v56 = vsel %vm4492_vm12, %v4493_v14, %v4491_v40  ;;  %v1841_v62 = vpop.f32.mrf.mxu1  ;;  %v1854_v55 = vpop.f32.mrf.mxu2 }
 0x148   : > { %v4495_v12 = vsel %vm4475_vm13, nan, %v4494_v56  ;;  %v4680_v33 = vmul.f32 %v4679_v28, %v6060_v0  ;;  %v1842_v50 = vadd.f32 %v1841_v62, %v1828_v35  ;;  %v1880_v42 = vpop.f32.mrf.mxu0 }
 0x149   : > { %v4496_v52 = vsel %vm4474_vm14, 0.0, %v4495_v12 }
 0x14a   : > { %v4497_v54 = vsel %vm4477_vm15, inf, %v4496_v52  ;;  %v4681_v26 = vmul.f32 %v4680_v33, %v4679_v28  ;;  %v1855_v32 = vadd.f32 %v1854_v55, %v1842_v50 }
 0x14b   : > { %v2336_v21 = vpack.c.bf16 %v4497_v54, %v4497_v54  ;;  %v2328_v54 = vld [vmem:[#allocation2 + $0x4] sm:$0x3] }
 0x14c   : > { %v4683_v44 = vsel %vm4682_vm1, %v6060_v0, %v4681_v26  ;;  %v1868_v38 = vadd.f32 %v1867_v45, %v1855_v32 }
 0x14d   : > { %v4686_v61 = vsel %vm4684_vm2, %v4685_v13, %v4683_v44  ;;  %v2368_v5 = vunpack.c.l.b16 %v2336_v21  ;;  %v1869_v43 = vpop.f32.mrf.mxu3 }
 0x14e   : > { %v4687_v30 = vsel %vm4667_vm3, nan, %v4686_v61  ;;  %v1881_v48 = vadd.f32 %v1880_v42, %v1868_v38 }
 0x14f   : > { %v4688_v9 = vsel %vm4666_vm4, 0.0, %v4687_v30  ;;  %v1843_v22 = vpop.f32.mrf.mxu1  ;;  %v1856_v25 = vpop.f32.mrf.mxu2 }
 0x150   : > { %v4689_v58 = vsel %vm4669_vm5, inf, %v4688_v9  ;;  %v1882_v23 = vpop.f32.mrf.mxu0 }
 0x151   : > { %v2344_v51 = vpack.c.bf16 %v4689_v58, %v4689_v58 }
 0x153   : > { %v2376_v27 = vunpack.c.l.b16 %v2344_v51 }
 0x155   : > { %v2384_v0 = vsel %vm556_vm0, %v2376_v27, %v2368_v5  ;;  %v1919_v34 = vpop.f32.mrf.mxu3 }
 0x156   : > { %v2392_v63 = vpack.c.b16 %v2384_v0, %v2384_v0 }
 0x157   : > { %v1893_v6 = vpop.f32.mrf.mxu1  ;;  %v1906_v59 = vpop.f32.mrf.mxu2 }
 0x158   : > { %2884 = vmatmul.bf16.vlgmr.msrb.gmra.mxu3 %v2392_v63  ;;  %v1894_v18 = vadd.f32 %v1893_v6, %v1881_v48 }
 0x15a   : > { %v1907_v4 = vadd.f32 %v1906_v59, %v1894_v18 }
 0x15c   : > { %v1920_v60 = vadd.f32 %v1919_v34, %v1907_v4 }
 0x15d   : > { %v1921_v14 = vpop.f32.mrf.mxu3 }
 0x15e   : > { %v1923_v47 = vadd.f32 %v1920_v60, %v1378_v31 }
 0x15f   : > { %v1895_v49 = vpop.f32.mrf.mxu1  ;;  %v1908_v36 = vpop.f32.mrf.mxu2 }
 0x160   : > { %1924 = vst [vmem:[#allocation2 + $0x2] sm:$0x3] %v1923_v47 }
 0x167   : > { %v2820_v16 = vpop.f32.mrf.mxu2 }
 0x169   : > { %v2833_v53 = vpop.f32.mrf.mxu3 }
 0x16e   : > { %v2794_v2 = vpop.f32.mrf.mxu0 }
 0x16f   : > { %v2822_v1 = vpop.f32.mrf.mxu2 }
 0x171   : > { %v2835_v15 = vpop.f32.mrf.mxu3 }
 0x176   : > { %v2796_v19 = vpop.f32.mrf.mxu0 }
 0x18b   : > { %v2807_v40 = vpop.f32.mrf.mxu1 }
 0x18c   : > { %v2808_v17 = vadd.f32 %v2807_v40, %v2794_v2 }
 0x18e   : > { %v2821_v56 = vadd.f32 %v2820_v16, %v2808_v17 }
 0x190   : > { %v2834_v8 = vadd.f32 %v2833_v53, %v2821_v56 }
 0x193   : > { %v2809_v12 = vpop.f32.mrf.mxu1 }
 0x1a0   : > { %v2846_v28 = vpop.f32.mrf.mxu0 }
 0x1a1   : > { %v2847_v20 = vadd.f32 %v2846_v28, %v2834_v8 }
 0x1a8   : > { %v2848_v52 = vpop.f32.mrf.mxu0 }
 0x1b2   : > { %v2859_v33 = vpop.f32.mrf.mxu1 }
 0x1b3   : > { %v2860_v24 = vadd.f32 %v2859_v33, %v2847_v20 }
 0x1ba   : > { %v2861_v39 = vpop.f32.mrf.mxu1 }
 0x1c6   : > { %v2872_v46 = vpop.f32.mrf.mxu2 }
 0x1c7   : > { %v2873_v35 = vadd.f32 %v2872_v46, %v2860_v24 }
 0x1ce   : > { %v2874_v13 = vpop.f32.mrf.mxu2 }
 0x1db   : > { %v2885_v26 = vpop.f32.mrf.mxu3 }
 0x1dc   : > { %v2886_v29 = vadd.f32 %v2885_v26, %v2873_v35 }
 0x1de   : > { %v2889_v44 = vadd.f32 %v2886_v29, %v2328_v54 }
 0x1df   : > { %2894 = sbr.rel (%p4108_p1) target bundleno = 667 (0x29b), region = 44 }
 0x1e0   : > { %2890 = vst [vmem:[#allocation2 + $0x4] sm:$0x3] %v2889_v44 }
 0x1e3   : > { %v2887_v37 = vpop.f32.mrf.mxu3 }
 0x1e4   : > { %vm2897_vm0 = vcmask 1041408   ;;  %v6110_v21 = vld [vmem:[#allocation2] sm:$0x3]  ;;  %v2915_v9 = vld [vmem:[#allocation2 + $0x2] sm:$0x3] }
 0x1e5   : > { %v2896_v30 = vmul.f32 %v6110_v21, %v6110_v21  ;;  %v2916_v7 = vmul.f32 %v2915_v9, %v2915_v9  ;;  %v2967_v52 = vld [vmem:[#allocation2 + $0x2] sm:$0x3] }
 0x1e7   : > { %v2934_v61 = vld [vmem:[#allocation2 + $0x4] sm:$0x3]  ;;  %v2898_v58 = vsel %vm2897_vm0, %v2896_v30, 0.0  ;;  %v2917_v11 = vsel %vm2897_vm0, %v2916_v7, 0.0 }
 0x1e8   : > { %v2935_v3 = vmul.f32 %v2934_v61, %v2934_v61  ;;  %2899 = vadd.xlane.f32.xlu0 %v2898_v58  ;;  %v2971_v33 = vld [vmem:[#allocation2 + $0x4] sm:$0x3] }
 0x1ea   : > { %v2936_v57 = vsel %vm2897_vm0, %v2935_v3, 0.0 }
 0x1eb   : > { %2937 = vadd.xlane.f32.xlu1 %v2936_v57 }
 0x1f0   : > { %2918 = vadd.xlane.f32.xlu0 %v2917_v11 }
 0x25b   : > { %v2900_v5 = vpop.xlane.xlu0 %2899 }
 0x25c   : > { %v2901_v41 = vmax.f32 %v2900_v5, 1e-24 }
 0x25e   : > { %v2938_v51 = vpop.xlane.xlu1 %2937  ;;  %vm2908_vm9 = vweird.f32 %v2901_v41 }
 0x25f   : > { %v2939_v10 = vmax.f32 %v2938_v51, 1e-24 }
 0x261   : > { %4833 = vrsqrt.f32 %v2939_v10  ;;  %vm2946_vm7 = vweird.f32 %v2939_v10 }
 0x262   : > { %4835 = vrsqrt.f32 %v2901_v41 }
 0x263   : > { %v2919_v27 = vpop.xlane.xlu0 %2918 }
 0x264   : > { %v2920_v63 = vmax.f32 %v2919_v27, 1e-24 }
 0x266   : > { %4837 = vrsqrt.f32 %v2920_v63  ;;  %vm2927_vm13 = vweird.f32 %v2920_v63 }
 0x267   : > { %v4834_v0 = vpop.eup %4833 }
 0x268   : > { %v4836_v62 = vpop.eup %4835  ;;  %v2941_v55 = vmul.f32 %v4834_v0, %v2939_v10  ;;  %vm2947_vm8 = vweird.f32 %v4834_v0 }
 0x269   : > { %v2903_v50 = vmul.f32 %v4836_v62, %v2901_v41  ;;  %vm2909_vm6 = vweird.f32 %v4836_v62  ;;  %vm2948_vm12 = vmor %vm2946_vm7, %vm2947_vm8 }
 0x26a   : > { %v2942_v45 = vmul.f32 %v4834_v0, %v2941_v55  ;;  %vm2910_vm10 = vmor %vm2908_vm9, %vm2909_vm6 }
 0x26b   : > { %v2904_v42 = vmul.f32 %v4836_v62, %v2903_v50 }
 0x26c   : > { %v2943_v32 = vmul.f32 0.5, %v2942_v45  ;;  %v4838_v25 = vpop.eup %4837 }
 0x26d   : > { %v2905_v22 = vmul.f32 0.5, %v2904_v42  ;;  %v2922_v23 = vmul.f32 %v4838_v25, %v2920_v63  ;;  %vm2928_vm11 = vweird.f32 %v4838_v25 }
 0x26e   : > { %v2944_v43 = vsub.f32 1.5, %v2943_v32  ;;  %vm2929_vm14 = vmor %vm2927_vm13, %vm2928_vm11 }
 0x26f   : > { %v2906_v38 = vsub.f32 1.5, %v2905_v22  ;;  %v2923_v6 = vmul.f32 %v4838_v25, %v2922_v23 }
 0x270   : > { %v2945_v59 = vmul.f32 %v4834_v0, %v2944_v43 }
 0x271   : > { %v2907_v48 = vmul.f32 %v4836_v62, %v2906_v38  ;;  %v2924_v18 = vmul.f32 0.5, %v2923_v6 }
 0x272   : > { %v2949_v4 = vsel %vm2948_vm12, %v4834_v0, %v2945_v59 }
 0x273   : > { %v2911_v34 = vsel %vm2910_vm10, %v4836_v62, %v2907_v48  ;;  %v2925_v2 = vsub.f32 1.5, %v2924_v18  ;;  %v2950_v49 = vmul.f32 %v2949_v4, %v2938_v51 }
 0x274   : > { %v2912_v60 = vmul.f32 %v2911_v34, %v2900_v5 }
 0x275   : > { %v2926_v31 = vmul.f32 %v4838_v25, %v2925_v2  ;;  %v2951_v16 = vmul.f32 %v2950_v49, %v2949_v4 }
 0x276   : > { %v2913_v14 = vmul.f32 %v2912_v60, %v2911_v34 }
 0x277   : > { %v2930_v47 = vsel %vm2929_vm14, %v4838_v25, %v2926_v31 }
 0x278   : > { %v2931_v36 = vmul.f32 %v2930_v47, %v2919_v27 }
 0x27a   : > { %v2932_v19 = vmul.f32 %v2931_v36, %v2930_v47 }
 0x27c   : > { %v2933_v53 = vadd.f32 %v2932_v19, %v2913_v14 }
 0x27e   : > { %v2952_v1 = vadd.f32 %v2951_v16, %v2933_v53 }
 0x280   : > { %v2953_v15 = vmax.f32 %v2952_v1, 1e-24 }
 0x282   : > { %4839 = vrsqrt.f32 %v2953_v15  ;;  %vm2960_vm1 = vweird.f32 %v2953_v15 }
 0x288   : > { %v4840_v40 = vpop.eup %4839 }
 0x289   : > { %v2955_v17 = vmul.f32 %v4840_v40, %v2953_v15  ;;  %vm2961_vm15 = vweird.f32 %v4840_v40 }
 0x28a   : > { %vm2962_vm2 = vmor %vm2960_vm1, %vm2961_vm15 }
 0x28b   : > { %v2956_v56 = vmul.f32 %v4840_v40, %v2955_v17 }
 0x28d   : > { %v2957_v8 = vmul.f32 0.5, %v2956_v56 }
 0x28f   : > { %v2958_v12 = vsub.f32 1.5, %v2957_v8 }
 0x291   : > { %v2959_v28 = vmul.f32 %v4840_v40, %v2958_v12 }
 0x293   : > { %v2963_v39 = vsel %vm2962_vm2, %v4840_v40, %v2959_v28 }
 0x294   : > { %v2964_v46 = vmul.f32 %v2963_v39, %v2911_v34  ;;  %v2968_v13 = vmul.f32 %v2963_v39, %v2930_v47  ;;  %v2972_v20 = vmul.f32 %v2963_v39, %v2949_v4 }
 0x296   : > { %v2965_v24 = vmul.f32 %v2964_v46, %v6110_v21  ;;  %v2969_v35 = vmul.f32 %v2968_v13, %v2967_v52  ;;  %v2973_v54 = vmul.f32 %v2972_v20, %v2971_v33 }
 0x298   : > { %2966 = vst [vmem:[#allocation8] sm:$0x3] %v2965_v24 }
 0x299   : > { %2970 = vst [vmem:[#allocation8 + $0x2] sm:$0x3] %v2969_v35 }
 0x29a   : > { %2974 = vst [vmem:[#allocation8 + $0x4] sm:$0x3] %v2973_v54 }
 0x29b PF: > { %p4711_p3 = scmp.eq.s32.totalorder %s3069_s15, 1  ;;  %s2986_s4 = sshll.u32 %s6140_s2, 4  ;;  %s2987_s4 = int_to_ptr.hbm [resolvable:$true] %s2986_s4 }
 0x29c   : > { %s4996_s6 = smov [#allocation8]  }
 0x29d   : > { %s2984_s7 = sshll.u32 %s4996_s6, 4  ;;  %s2985_s7 = int_to_ptr.vmem [resolvable:$true] %s2984_s7 }
 0x29e   : > { %4697 = dma.vmem_to_hbm [thread:$0]  (%p4711_p3), %s2985_s7, 96, %s2987_s4, [#allocation5]  }
 0x29f   : > { %4962 = dma.done.wait (%p4711_p3), [#allocation5], 96  }
 0x2a0   : > { %4964 = vsyncadd (%p4711_p3), [#allocation5], 4294967200 }
 0x2a1 PF: > { %s17_s14 = sadd.s32 1, %s4987_s14   ;;  %s6180_s9 = smov %s4971_s10 }
 0x2a2   : > { %p14_p4 = scmp.ge.s32.totalorder %s17_s14, 4   ;;  %s6181_s10 = smov %s4975_s11 }
 0x2a3   : > { %s6182_s11 = smov %s5084_s5  ;;  %s6183_s12 = smov %s4983_s13 }
 0x2a4   : > { %s6184_s13 = smov %s6186_s26  ;;  %16 = sbr.rel (!%p14_p4) target bundleno = 6 (0x6), region = 81 }
 0x2a9   :  { %3000 = vsyncpa [#allocation4], 1 }
 0x2aa   :  { %3002 = vsyncpa [#allocation4 + $0x1], 1 }
 0x2ab   :  { %3003 = vsyncpa [#allocation7], 1 }
 0x2ac   :  { %3004 = vsyncpa [#allocation5], 1 }
 0x2ad   :  { %3006 = vsyncpa [#allocation5 + $0x1], 1 }

</bundles_post_ra>
